<compile_context>
chip_gen: v7x
topology: tpu7x:2x2x1
jax: 0.10.0
libtpu: 0.0.40
codegen_flags: <defaults>
</compile_context>

<pallas_src>
import numpy as np
import jax
import jax.numpy as jnp
from jax import lax
from jax.experimental import pallas as pl
from jax.experimental.pallas import tpu as pltpu

Nt = 2
N_NODES = 16
FX = 4 * Nt        # node feature dim  (8)
FE = 2 * Nt        # edge feature dim  (4)
H1 = 64            # mlp1 hidden / output dim
H2 = 32            # mlp2 hidden dim
OUT = 2 * Nt       # mlp2 output dim   (4)
N_LAYERS = 3
SRC_CHUNK = 8      # sources processed per chunk (8*16 = 128 message rows)
P_ROWS = 192       # rows of the packed parameter buffer

# Packed parameter buffer row layout (all 64 lanes wide, zero padded):
#   [  0: 8 ] w1a_x (8,64)    [  8:12] w1a_e (4,64)
#   [ 16:17] b1a  (1,64)      [ 17:18] b1b  (1,64)
#   [ 18:19] b2a  (1,:32)     [ 19:20] b2b  (1,:4)
#   [ 24:88] w1b  (64,64)     [ 88:96] w2a_x (8,:32)
#   [ 96:160] w2a_a (64,:32)  [160:192] w2b  (32,:4)


def igcnet_kernel(x_ref, e_ref, mask_ref, p_ref, out_ref):
    n = N_NODES
    rows = SRC_CHUNK * n
    n_chunks = n // SRC_CHUNK

    x = x_ref[0]                                            # (n, FX)

    for _ in range(N_LAYERS):   # 3 shared-weight IGConv applications, fused in-kernel
        # per-source part of mlp1 layer 1 (bias folded here)
        xs_part = (jnp.dot(x, p_ref[0:8, :], preferred_element_type=jnp.float32)
                   + p_ref[16:17, :])                       # (n, H1)

        aggr = None
        for c in range(n_chunks):   # chunk over source blocks -> bounded live ranges
            s0 = c * SRC_CHUNK
            r0 = s0 * n
            # broadcast each source row over its n destination rows
            # (sublane broadcasts + concat; replaces the old one-hot selector matmul)
            xs_b = jnp.concatenate(
                [jnp.broadcast_to(xs_part[s0 + s:s0 + s + 1, :], (n, H1))
                 for s in range(SRC_CHUNK)], axis=0)        # (rows, H1)
            es = jnp.dot(e_ref[0, r0:r0 + rows, :], p_ref[8:12, :],
                         preferred_element_type=jnp.float32)  # (rows, H1)
            h1 = jnp.maximum(es + xs_b, 0.0)
            msg = jnp.maximum(
                jnp.dot(h1, p_ref[24:88, :], preferred_element_type=jnp.float32)
                + p_ref[17:18, :], 0.0)                     # (rows, H1)
            # multiplicative 0/1 edge mask. Valid ONLY because mlp1 ends in ReLU
            # (messages >= 0), so zeroed non-edges reproduce PyG's
            # max-aggregation-with-0-fill semantics exactly.
            msg = msg * mask_ref[0, r0:r0 + rows, :]

            # balanced-tree max over the sources in this chunk (depth log2, not 15)
            m = msg
            while m.shape[0] > n:
                half = m.shape[0] // 2
                m = jnp.maximum(m[:half, :], m[half:, :])
            aggr = m if aggr is None else jnp.maximum(aggr, m)

        # update: mlp2(cat[x, aggr]) with the concat split across the two matmuls
        h2 = jnp.maximum(
            jnp.dot(x, p_ref[88:96, 0:32], preferred_element_type=jnp.float32)
            + jnp.dot(aggr, p_ref[96:160, 0:32], preferred_element_type=jnp.float32)
            + p_ref[18:19, 0:32], 0.0)                      # (n, H2)
        comb = (jnp.dot(h2, p_ref[160:192, 0:4], preferred_element_type=jnp.float32)
                + p_ref[19:20, 0:4])                        # (n, OUT)

        # L2 clip: comb / max(1, ||comb||) via a single EUP rsqrt
        ss = jnp.sum(comb * comb, axis=1, keepdims=True)
        comb = comb * lax.rsqrt(jnp.maximum(ss, 1.0))

        x = jnp.concatenate([comb, x[:, :OUT]], axis=1)     # (n, FX)

    out_ref[0] = x


@jax.jit
def igcnet_forward(x0, e_flat, mask, packed_params):
    B, n, _ = x0.shape
    return pl.pallas_call(
        igcnet_kernel,
        out_shape=jax.ShapeDtypeStruct((B, n, FX), jnp.float32),
        grid=(B,),
        in_specs=[
            pl.BlockSpec((1, n, FX), lambda b: (b, 0, 0)),        # per-graph node feats
            pl.BlockSpec((1, n * n, FE), lambda b: (b, 0, 0)),    # per-graph edge feats
            pl.BlockSpec((1, n * n, H1), lambda b: (b, 0, 0)),    # per-graph 0/1 mask
            pl.BlockSpec((P_ROWS, 64), lambda b: (0, 0)),         # packed weights, resident
        ],
        out_specs=pl.BlockSpec((1, n, FX), lambda b: (b, 0, 0)),
        compiler_params=pltpu.CompilerParams(dimension_semantics=("parallel",)),
    )(x0, e_flat, mask, packed_params)


def init_params(key):
    """Deterministic PyTorch-Linear-style init (uniform +-1/sqrt(fan_in))."""
    ks = jax.random.split(key, 4)

    def lin(k, fan_in, fan_out):
        bound = 1.0 / np.sqrt(fan_in)
        kw, kb = jax.random.split(k)
        w = jax.random.uniform(kw, (fan_in, fan_out), jnp.float32, -bound, bound)
        b = jax.random.uniform(kb, (1, fan_out), jnp.float32, -bound, bound)
        return w, b

    w1a, b1a = lin(ks[0], 6 * Nt, H1)        # mlp1 layer 1
    w1b, b1b = lin(ks[1], H1, H1)            # mlp1 layer 2
    w2a, b2a = lin(ks[2], H1 + 4 * Nt, H2)   # mlp2 layer 1
    w2b, b2b = lin(ks[3], H2, OUT)           # mlp2 layer 2 (no ReLU)
    # split the concat-facing first layers: cat[x_j, e] and cat[x, aggr]
    w1a_x, w1a_e = w1a[:FX], w1a[FX:]
    w2a_x, w2a_a = w2a[:FX], w2a[FX:]
    return (w1a_x, w1a_e, b1a, w1b, b1b, w2a_x, w2a_a, b2a, w2b, b2b)


def pack_params(params):
    """Pack the 10 weight/bias arrays into one zero-padded (P_ROWS, 64) buffer."""
    (w1a_x, w1a_e, b1a, w1b, b1b, w2a_x, w2a_a, b2a, w2b, b2b) = [np.asarray(p) for p in params]
    P = np.zeros((P_ROWS, 64), np.float32)
    P[0:8, :] = w1a_x
    P[8:12, :] = w1a_e
    P[16, :] = b1a[0]
    P[17, :] = b1b[0]
    P[18, :H2] = b2a[0]
    P[19, :OUT] = b2b[0]
    P[24:88, :] = w1b
    P[88:96, :H2] = w2a_x
    P[96:160, :H2] = w2a_a
    P[160:192, :OUT] = w2b
    return jnp.asarray(P)


def reference_forward(x0, edge_index, edge_attr, params, n):
    """Pure-JAX reference mirroring the PyG message/aggr='max'/update semantics."""
    w1a_x, w1a_e, b1a, w1b, b1b, w2a_x, w2a_a, b2a, w2b, b2b = params
    w1a = jnp.concatenate([w1a_x, w1a_e], axis=0)
    w2a = jnp.concatenate([w2a_x, w2a_a], axis=0)
    src, dst = edge_index[0], edge_index[1]

    def one_graph(x0_g, ea_g):
        def layer(x):
            tmp = jnp.concatenate([x[src], ea_g], axis=1)
            h = jax.nn.relu(tmp @ w1a + b1a)
            msg = jax.nn.relu(h @ w1b + b1b)
            aggr = jax.ops.segment_max(msg, dst, num_segments=n)
            aggr = jnp.maximum(aggr, 0.0)
            cat2 = jnp.concatenate([x, aggr], axis=1)
            comb = jax.nn.relu(cat2 @ w2a + b2a) @ w2b + b2b
            nor = jnp.sqrt(jnp.sum(comb * comb, axis=1, keepdims=True))
            comb = comb / jnp.maximum(1.0, nor)
            return jnp.concatenate([comb, x[:, :2 * Nt]], axis=1)

        x = x0_g
        for _ in range(N_LAYERS):
            x = layer(x)
        return x

    return jax.vmap(one_graph)(x0, edge_attr)


if __name__ == "__main__":
    key = jax.random.PRNGKey(0)
    k_x, k_e, k_p = jax.random.split(key, 3)
    n = N_NODES
    B = 4

    # complete directed interference graph without self loops (same topology per graph)
    src_np, dst_np = np.nonzero(1 - np.eye(n, dtype=np.int32))
    edge_index = jnp.asarray(np.stack([src_np, dst_np]), dtype=jnp.int32)   # (2, E)
    E = edge_index.shape[1]

    x0 = jax.random.normal(k_x, (B, n, FX), jnp.float32)
    edge_attr = jax.random.normal(k_e, (B, E, FE), jnp.float32)
    params = init_params(k_p)
    packed = pack_params(params)

    # glue: dense source-major edge features (row = src*n + dst) and 0/1 edge mask
    e_dense = jnp.zeros((B, n, n, FE), jnp.float32).at[:, edge_index[0], edge_index[1]].set(edge_attr)
    e_flat = e_dense.reshape(B, n * n, FE)
    adj = np.zeros((n, n), np.float32)
    adj[src_np, dst_np] = 1.0
    mask = np.ascontiguousarray(
        np.broadcast_to(adj.reshape(1, n * n, 1), (B, n * n, H1))).astype(np.float32)
    mask = jnp.asarray(mask)

    out = igcnet_forward(x0, e_flat, mask, packed)
    out = jax.block_until_ready(out)

    ref = reference_forward(x0, edge_index, edge_attr, params, n)
    np.testing.assert_allclose(np.asarray(out), np.asarray(ref), rtol=1e-3, atol=1e-3)

    print("KERNEL_OK")
</pallas_src>

<mosaic_0001>
module attributes {stable_mosaic.version = 11 : i64} {
  func.func @igcnet_kernel(%arg0: i32, %arg1: memref<1x16x8xf32, #tpu.memory_space<vmem>>, %arg2: memref<1x256x4xf32, #tpu.memory_space<vmem>>, %arg3: memref<1x256x64xf32, #tpu.memory_space<vmem>>, %arg4: memref<192x64xf32, #tpu.memory_space<vmem>>, %arg5: memref<1x16x8xf32, #tpu.memory_space<vmem>>) attributes {dimension_semantics = [#tpu.dimension_semantics<parallel>], iteration_bounds = array<i64: 4>, scalar_prefetch = 0 : i64, scratch_operands = 0 : i64, tpu.core_type = #tpu.core_type<tc>, window_params = [{transform_indices = @transform_0, window_bounds = array<i64: 1, 16, 8>}, {transform_indices = @transform_1, window_bounds = array<i64: 1, 256, 4>}, {transform_indices = @transform_2, window_bounds = array<i64: 1, 256, 64>}, {pipeline_mode = #tpu.pipeline_mode<synchronous>, transform_indices = @transform_3, window_bounds = array<i64: 192, 64>}, {transform_indices = @transform_4, window_bounds = array<i64: 1, 16, 8>}]} {
    %c0 = arith.constant 0 : index
    %c0_0 = arith.constant 0 : index
    %c0_1 = arith.constant 0 : index
    %0 = vector.load %arg1[%c0, %c0_0, %c0_1] : memref<1x16x8xf32, #tpu.memory_space<vmem>>, vector<1x16x8xf32>
    %1 = vector.shape_cast %0 : vector<1x16x8xf32> to vector<16x8xf32>
    %c0_2 = arith.constant 0 : index
    %c0_3 = arith.constant 0 : index
    %2 = vector.load %arg4[%c0_2, %c0_3] : memref<192x64xf32, #tpu.memory_space<vmem>>, vector<8x64xf32>
    %cst = arith.constant dense<0.000000e+00> : vector<16x64xf32>
    %3 = tpu.matmul %1, %2, %cst {dimension_numbers = #tpu.dot_dimension_numbers<[1], [0], [0], [1], [0, 0, 1, 1], [], []>} : vector<16x8xf32>, vector<8x64xf32>, vector<16x64xf32> -> vector<16x64xf32>
    %c16 = arith.constant 16 : index
    %c0_4 = arith.constant 0 : index
    %4 = vector.load %arg4[%c16, %c0_4] : memref<192x64xf32, #tpu.memory_space<vmem>>, vector<1x64xf32>
    %5 = vector.broadcast %4 : vector<1x64xf32> to vector<16x64xf32>
    %6 = arith.addf %3, %5 : vector<16x64xf32>
    %7 = vector.extract_strided_slice %6 {offsets = [0, 0], sizes = [1, 64], strides = [1, 1]} : vector<16x64xf32> to vector<1x64xf32>
    %8 = vector.shape_cast %7 : vector<1x64xf32> to vector<1x64xf32>
    %9 = vector.broadcast %8 : vector<1x64xf32> to vector<16x64xf32>
    %10 = vector.extract_strided_slice %6 {offsets = [1, 0], sizes = [1, 64], strides = [1, 1]} : vector<16x64xf32> to vector<1x64xf32>
    %11 = vector.shape_cast %10 : vector<1x64xf32> to vector<1x64xf32>
    %12 = vector.broadcast %11 : vector<1x64xf32> to vector<16x64xf32>
    %13 = vector.extract_strided_slice %6 {offsets = [2, 0], sizes = [1, 64], strides = [1, 1]} : vector<16x64xf32> to vector<1x64xf32>
    %14 = vector.shape_cast %13 : vector<1x64xf32> to vector<1x64xf32>
    %15 = vector.broadcast %14 : vector<1x64xf32> to vector<16x64xf32>
    %16 = vector.extract_strided_slice %6 {offsets = [3, 0], sizes = [1, 64], strides = [1, 1]} : vector<16x64xf32> to vector<1x64xf32>
    %17 = vector.shape_cast %16 : vector<1x64xf32> to vector<1x64xf32>
    %18 = vector.broadcast %17 : vector<1x64xf32> to vector<16x64xf32>
    %19 = vector.extract_strided_slice %6 {offsets = [4, 0], sizes = [1, 64], strides = [1, 1]} : vector<16x64xf32> to vector<1x64xf32>
    %20 = vector.shape_cast %19 : vector<1x64xf32> to vector<1x64xf32>
    %21 = vector.broadcast %20 : vector<1x64xf32> to vector<16x64xf32>
    %22 = vector.extract_strided_slice %6 {offsets = [5, 0], sizes = [1, 64], strides = [1, 1]} : vector<16x64xf32> to vector<1x64xf32>
    %23 = vector.shape_cast %22 : vector<1x64xf32> to vector<1x64xf32>
    %24 = vector.broadcast %23 : vector<1x64xf32> to vector<16x64xf32>
    %25 = vector.extract_strided_slice %6 {offsets = [6, 0], sizes = [1, 64], strides = [1, 1]} : vector<16x64xf32> to vector<1x64xf32>
    %26 = vector.shape_cast %25 : vector<1x64xf32> to vector<1x64xf32>
    %27 = vector.broadcast %26 : vector<1x64xf32> to vector<16x64xf32>
    %28 = vector.extract_strided_slice %6 {offsets = [7, 0], sizes = [1, 64], strides = [1, 1]} : vector<16x64xf32> to vector<1x64xf32>
    %29 = vector.shape_cast %28 : vector<1x64xf32> to vector<1x64xf32>
    %30 = vector.broadcast %29 : vector<1x64xf32> to vector<16x64xf32>
    %31 = tpu.concatenate %9, %12, %15, %18, %21, %24, %27, %30 in 0 : vector<16x64xf32>, vector<16x64xf32>, vector<16x64xf32>, vector<16x64xf32>, vector<16x64xf32>, vector<16x64xf32>, vector<16x64xf32>, vector<16x64xf32> -> vector<128x64xf32>
    %c0_5 = arith.constant 0 : index
    %c0_6 = arith.constant 0 : index
    %c0_7 = arith.constant 0 : index
    %32 = vector.load %arg2[%c0_5, %c0_6, %c0_7] : memref<1x256x4xf32, #tpu.memory_space<vmem>>, vector<1x128x4xf32>
    %33 = vector.shape_cast %32 : vector<1x128x4xf32> to vector<128x4xf32>
    %c8 = arith.constant 8 : index
    %c0_8 = arith.constant 0 : index
    %34 = vector.load %arg4[%c8, %c0_8] : memref<192x64xf32, #tpu.memory_space<vmem>>, vector<4x64xf32>
    %cst_9 = arith.constant dense<0.000000e+00> : vector<128x64xf32>
    %35 = tpu.matmul %33, %34, %cst_9 {dimension_numbers = #tpu.dot_dimension_numbers<[1], [0], [0], [1], [0, 0, 1, 1], [], []>} : vector<128x4xf32>, vector<4x64xf32>, vector<128x64xf32> -> vector<128x64xf32>
    %36 = arith.addf %35, %31 : vector<128x64xf32>
    %cst_10 = arith.constant 0.000000e+00 : f32
    %37 = vector.broadcast %cst_10 : f32 to vector<128x64xf32>
    %38 = arith.maximumf %36, %37 : vector<128x64xf32>
    %c24 = arith.constant 24 : index
    %c0_11 = arith.constant 0 : index
    %39 = vector.load %arg4[%c24, %c0_11] : memref<192x64xf32, #tpu.memory_space<vmem>>, vector<64x64xf32>
    %cst_12 = arith.constant dense<0.000000e+00> : vector<128x64xf32>
    %40 = tpu.matmul %38, %39, %cst_12 {dimension_numbers = #tpu.dot_dimension_numbers<[1], [0], [0], [1], [0, 0, 1, 1], [], []>} : vector<128x64xf32>, vector<64x64xf32>, vector<128x64xf32> -> vector<128x64xf32>
    %c17 = arith.constant 17 : index
    %c0_13 = arith.constant 0 : index
    %41 = vector.load %arg4[%c17, %c0_13] : memref<192x64xf32, #tpu.memory_space<vmem>>, vector<1x64xf32>
    %42 = vector.broadcast %41 : vector<1x64xf32> to vector<128x64xf32>
    %43 = arith.addf %40, %42 : vector<128x64xf32>
    %cst_14 = arith.constant 0.000000e+00 : f32
    %44 = vector.broadcast %cst_14 : f32 to vector<128x64xf32>
    %45 = arith.maximumf %43, %44 : vector<128x64xf32>
    %c0_15 = arith.constant 0 : index
    %c0_16 = arith.constant 0 : index
    %c0_17 = arith.constant 0 : index
    %46 = vector.load %arg3[%c0_15, %c0_16, %c0_17] : memref<1x256x64xf32, #tpu.memory_space<vmem>>, vector<1x128x64xf32>
    %47 = vector.shape_cast %46 : vector<1x128x64xf32> to vector<128x64xf32>
    %48 = arith.mulf %45, %47 : vector<128x64xf32>
    %49 = vector.extract_strided_slice %48 {offsets = [0, 0], sizes = [64, 64], strides = [1, 1]} : vector<128x64xf32> to vector<64x64xf32>
    %50 = vector.extract_strided_slice %48 {offsets = [64, 0], sizes = [64, 64], strides = [1, 1]} : vector<128x64xf32> to vector<64x64xf32>
    %51 = arith.maximumf %49, %50 : vector<64x64xf32>
    %52 = vector.extract_strided_slice %51 {offsets = [0, 0], sizes = [32, 64], strides = [1, 1]} : vector<64x64xf32> to vector<32x64xf32>
    %53 = vector.extract_strided_slice %51 {offsets = [32, 0], sizes = [32, 64], strides = [1, 1]} : vector<64x64xf32> to vector<32x64xf32>
    %54 = arith.maximumf %52, %53 : vector<32x64xf32>
    %55 = vector.extract_strided_slice %54 {offsets = [0, 0], sizes = [16, 64], strides = [1, 1]} : vector<32x64xf32> to vector<16x64xf32>
    %56 = vector.extract_strided_slice %54 {offsets = [16, 0], sizes = [16, 64], strides = [1, 1]} : vector<32x64xf32> to vector<16x64xf32>
    %57 = arith.maximumf %55, %56 : vector<16x64xf32>
    %58 = vector.extract_strided_slice %6 {offsets = [8, 0], sizes = [1, 64], strides = [1, 1]} : vector<16x64xf32> to vector<1x64xf32>
    %59 = vector.shape_cast %58 : vector<1x64xf32> to vector<1x64xf32>
    %60 = vector.broadcast %59 : vector<1x64xf32> to vector<16x64xf32>
    %61 = vector.extract_strided_slice %6 {offsets = [9, 0], sizes = [1, 64], strides = [1, 1]} : vector<16x64xf32> to vector<1x64xf32>
    %62 = vector.shape_cast %61 : vector<1x64xf32> to vector<1x64xf32>
    %63 = vector.broadcast %62 : vector<1x64xf32> to vector<16x64xf32>
    %64 = vector.extract_strided_slice %6 {offsets = [10, 0], sizes = [1, 64], strides = [1, 1]} : vector<16x64xf32> to vector<1x64xf32>
    %65 = vector.shape_cast %64 : vector<1x64xf32> to vector<1x64xf32>
    %66 = vector.broadcast %65 : vector<1x64xf32> to vector<16x64xf32>
    %67 = vector.extract_strided_slice %6 {offsets = [11, 0], sizes = [1, 64], strides = [1, 1]} : vector<16x64xf32> to vector<1x64xf32>
    %68 = vector.shape_cast %67 : vector<1x64xf32> to vector<1x64xf32>
    %69 = vector.broadcast %68 : vector<1x64xf32> to vector<16x64xf32>
    %70 = vector.extract_strided_slice %6 {offsets = [12, 0], sizes = [1, 64], strides = [1, 1]} : vector<16x64xf32> to vector<1x64xf32>
    %71 = vector.shape_cast %70 : vector<1x64xf32> to vector<1x64xf32>
    %72 = vector.broadcast %71 : vector<1x64xf32> to vector<16x64xf32>
    %73 = vector.extract_strided_slice %6 {offsets = [13, 0], sizes = [1, 64], strides = [1, 1]} : vector<16x64xf32> to vector<1x64xf32>
    %74 = vector.shape_cast %73 : vector<1x64xf32> to vector<1x64xf32>
    %75 = vector.broadcast %74 : vector<1x64xf32> to vector<16x64xf32>
    %76 = vector.extract_strided_slice %6 {offsets = [14, 0], sizes = [1, 64], strides = [1, 1]} : vector<16x64xf32> to vector<1x64xf32>
    %77 = vector.shape_cast %76 : vector<1x64xf32> to vector<1x64xf32>
    %78 = vector.broadcast %77 : vector<1x64xf32> to vector<16x64xf32>
    %79 = vector.extract_strided_slice %6 {offsets = [15, 0], sizes = [1, 64], strides = [1, 1]} : vector<16x64xf32> to vector<1x64xf32>
    %80 = vector.shape_cast %79 : vector<1x64xf32> to vector<1x64xf32>
    %81 = vector.broadcast %80 : vector<1x64xf32> to vector<16x64xf32>
    %82 = tpu.concatenate %60, %63, %66, %69, %72, %75, %78, %81 in 0 : vector<16x64xf32>, vector<16x64xf32>, vector<16x64xf32>, vector<16x64xf32>, vector<16x64xf32>, vector<16x64xf32>, vector<16x64xf32>, vector<16x64xf32> -> vector<128x64xf32>
    %c0_18 = arith.constant 0 : index
    %c128 = arith.constant 128 : index
    %c0_19 = arith.constant 0 : index
    %83 = vector.load %arg2[%c0_18, %c128, %c0_19] : memref<1x256x4xf32, #tpu.memory_space<vmem>>, vector<1x128x4xf32>
    %84 = vector.shape_cast %83 : vector<1x128x4xf32> to vector<128x4xf32>
    %c8_20 = arith.constant 8 : index
    %c0_21 = arith.constant 0 : index
    %85 = vector.load %arg4[%c8_20, %c0_21] : memref<192x64xf32, #tpu.memory_space<vmem>>, vector<4x64xf32>
    %cst_22 = arith.constant dense<0.000000e+00> : vector<128x64xf32>
    %86 = tpu.matmul %84, %85, %cst_22 {dimension_numbers = #tpu.dot_dimension_numbers<[1], [0], [0], [1], [0, 0, 1, 1], [], []>} : vector<128x4xf32>, vector<4x64xf32>, vector<128x64xf32> -> vector<128x64xf32>
    %87 = arith.addf %86, %82 : vector<128x64xf32>
    %cst_23 = arith.constant 0.000000e+00 : f32
    %88 = vector.broadcast %cst_23 : f32 to vector<128x64xf32>
    %89 = arith.maximumf %87, %88 : vector<128x64xf32>
    %c24_24 = arith.constant 24 : index
    %c0_25 = arith.constant 0 : index
    %90 = vector.load %arg4[%c24_24, %c0_25] : memref<192x64xf32, #tpu.memory_space<vmem>>, vector<64x64xf32>
    %cst_26 = arith.constant dense<0.000000e+00> : vector<128x64xf32>
    %91 = tpu.matmul %89, %90, %cst_26 {dimension_numbers = #tpu.dot_dimension_numbers<[1], [0], [0], [1], [0, 0, 1, 1], [], []>} : vector<128x64xf32>, vector<64x64xf32>, vector<128x64xf32> -> vector<128x64xf32>
    %c17_27 = arith.constant 17 : index
    %c0_28 = arith.constant 0 : index
    %92 = vector.load %arg4[%c17_27, %c0_28] : memref<192x64xf32, #tpu.memory_space<vmem>>, vector<1x64xf32>
    %93 = vector.broadcast %92 : vector<1x64xf32> to vector<128x64xf32>
    %94 = arith.addf %91, %93 : vector<128x64xf32>
    %cst_29 = arith.constant 0.000000e+00 : f32
    %95 = vector.broadcast %cst_29 : f32 to vector<128x64xf32>
    %96 = arith.maximumf %94, %95 : vector<128x64xf32>
    %c0_30 = arith.constant 0 : index
    %c128_31 = arith.constant 128 : index
    %c0_32 = arith.constant 0 : index
    %97 = vector.load %arg3[%c0_30, %c128_31, %c0_32] : memref<1x256x64xf32, #tpu.memory_space<vmem>>, vector<1x128x64xf32>
    %98 = vector.shape_cast %97 : vector<1x128x64xf32> to vector<128x64xf32>
    %99 = arith.mulf %96, %98 : vector<128x64xf32>
    %100 = vector.extract_strided_slice %99 {offsets = [0, 0], sizes = [64, 64], strides = [1, 1]} : vector<128x64xf32> to vector<64x64xf32>
    %101 = vector.extract_strided_slice %99 {offsets = [64, 0], sizes = [64, 64], strides = [1, 1]} : vector<128x64xf32> to vector<64x64xf32>
    %102 = arith.maximumf %100, %101 : vector<64x64xf32>
    %103 = vector.extract_strided_slice %102 {offsets = [0, 0], sizes = [32, 64], strides = [1, 1]} : vector<64x64xf32> to vector<32x64xf32>
    %104 = vector.extract_strided_slice %102 {offsets = [32, 0], sizes = [32, 64], strides = [1, 1]} : vector<64x64xf32> to vector<32x64xf32>
    %105 = arith.maximumf %103, %104 : vector<32x64xf32>
    %106 = vector.extract_strided_slice %105 {offsets = [0, 0], sizes = [16, 64], strides = [1, 1]} : vector<32x64xf32> to vector<16x64xf32>
    %107 = vector.extract_strided_slice %105 {offsets = [16, 0], sizes = [16, 64], strides = [1, 1]} : vector<32x64xf32> to vector<16x64xf32>
    %108 = arith.maximumf %106, %107 : vector<16x64xf32>
    %109 = arith.maximumf %57, %108 : vector<16x64xf32>
    %c88 = arith.constant 88 : index
    %c0_33 = arith.constant 0 : index
    %110 = vector.load %arg4[%c88, %c0_33] : memref<192x64xf32, #tpu.memory_space<vmem>>, vector<8x32xf32>
    %cst_34 = arith.constant dense<0.000000e+00> : vector<16x32xf32>
    %111 = tpu.matmul %1, %110, %cst_34 {dimension_numbers = #tpu.dot_dimension_numbers<[1], [0], [0], [1], [0, 0, 1, 1], [], []>} : vector<16x8xf32>, vector<8x32xf32>, vector<16x32xf32> -> vector<16x32xf32>
    %c96 = arith.constant 96 : index
    %c0_35 = arith.constant 0 : index
    %112 = vector.load %arg4[%c96, %c0_35] : memref<192x64xf32, #tpu.memory_space<vmem>>, vector<64x32xf32>
    %cst_36 = arith.constant dense<0.000000e+00> : vector<16x32xf32>
    %113 = tpu.matmul %109, %112, %cst_36 {dimension_numbers = #tpu.dot_dimension_numbers<[1], [0], [0], [1], [0, 0, 1, 1], [], []>} : vector<16x64xf32>, vector<64x32xf32>, vector<16x32xf32> -> vector<16x32xf32>
    %114 = arith.addf %111, %113 : vector<16x32xf32>
    %c18 = arith.constant 18 : index
    %c0_37 = arith.constant 0 : index
    %115 = vector.load %arg4[%c18, %c0_37] : memref<192x64xf32, #tpu.memory_space<vmem>>, vector<1x32xf32>
    %116 = vector.broadcast %115 : vector<1x32xf32> to vector<16x32xf32>
    %117 = arith.addf %114, %116 : vector<16x32xf32>
    %cst_38 = arith.constant 0.000000e+00 : f32
    %118 = vector.broadcast %cst_38 : f32 to vector<16x32xf32>
    %119 = arith.maximumf %117, %118 : vector<16x32xf32>
    %c160 = arith.constant 160 : index
    %c0_39 = arith.constant 0 : index
    %120 = vector.load %arg4[%c160, %c0_39] : memref<192x64xf32, #tpu.memory_space<vmem>>, vector<32x4xf32>
    %cst_40 = arith.constant dense<0.000000e+00> : vector<16x4xf32>
    %121 = tpu.matmul %119, %120, %cst_40 {dimension_numbers = #tpu.dot_dimension_numbers<[1], [0], [0], [1], [0, 0, 1, 1], [], []>} : vector<16x32xf32>, vector<32x4xf32>, vector<16x4xf32> -> vector<16x4xf32>
    %c19 = arith.constant 19 : index
    %c0_41 = arith.constant 0 : index
    %122 = vector.load %arg4[%c19, %c0_41] : memref<192x64xf32, #tpu.memory_space<vmem>>, vector<1x4xf32>
    %123 = vector.broadcast %122 : vector<1x4xf32> to vector<16x4xf32>
    %124 = arith.addf %121, %123 : vector<16x4xf32>
    %125 = arith.mulf %124, %124 : vector<16x4xf32>
    %cst_42 = arith.constant dense<0.000000e+00> : vector<16xf32>
    %126 = vector.multi_reduction <add>, %125, %cst_42 [1] : vector<16x4xf32> to vector<16xf32>
    %127 = vector.shape_cast %126 : vector<16xf32> to vector<16x1xf32>
    %cst_43 = arith.constant 1.000000e+00 : f32
    %128 = vector.broadcast %cst_43 : f32 to vector<16x1xf32>
    %129 = arith.maximumf %127, %128 : vector<16x1xf32>
    %130 = math.rsqrt %129 : vector<16x1xf32>
    %131 = vector.broadcast %130 : vector<16x1xf32> to vector<16x4xf32>
    %132 = arith.mulf %124, %131 : vector<16x4xf32>
    %133 = vector.extract_strided_slice %1 {offsets = [0, 0], sizes = [16, 4], strides = [1, 1]} : vector<16x8xf32> to vector<16x4xf32>
    %134 = tpu.concatenate %132, %133 in 1 : vector<16x4xf32>, vector<16x4xf32> -> vector<16x8xf32>
    %c0_44 = arith.constant 0 : index
    %c0_45 = arith.constant 0 : index
    %135 = vector.load %arg4[%c0_44, %c0_45] : memref<192x64xf32, #tpu.memory_space<vmem>>, vector<8x64xf32>
    %cst_46 = arith.constant dense<0.000000e+00> : vector<16x64xf32>
    %136 = tpu.matmul %134, %135, %cst_46 {dimension_numbers = #tpu.dot_dimension_numbers<[1], [0], [0], [1], [0, 0, 1, 1], [], []>} : vector<16x8xf32>, vector<8x64xf32>, vector<16x64xf32> -> vector<16x64xf32>
    %c16_47 = arith.constant 16 : index
    %c0_48 = arith.constant 0 : index
    %137 = vector.load %arg4[%c16_47, %c0_48] : memref<192x64xf32, #tpu.memory_space<vmem>>, vector<1x64xf32>
    %138 = vector.broadcast %137 : vector<1x64xf32> to vector<16x64xf32>
    %139 = arith.addf %136, %138 : vector<16x64xf32>
    %140 = vector.extract_strided_slice %139 {offsets = [0, 0], sizes = [1, 64], strides = [1, 1]} : vector<16x64xf32> to vector<1x64xf32>
    %141 = vector.shape_cast %140 : vector<1x64xf32> to vector<1x64xf32>
    %142 = vector.broadcast %141 : vector<1x64xf32> to vector<16x64xf32>
    %143 = vector.extract_strided_slice %139 {offsets = [1, 0], sizes = [1, 64], strides = [1, 1]} : vector<16x64xf32> to vector<1x64xf32>
    %144 = vector.shape_cast %143 : vector<1x64xf32> to vector<1x64xf32>
    %145 = vector.broadcast %144 : vector<1x64xf32> to vector<16x64xf32>
    %146 = vector.extract_strided_slice %139 {offsets = [2, 0], sizes = [1, 64], strides = [1, 1]} : vector<16x64xf32> to vector<1x64xf32>
    %147 = vector.shape_cast %146 : vector<1x64xf32> to vector<1x64xf32>
    %148 = vector.broadcast %147 : vector<1x64xf32> to vector<16x64xf32>
    %149 = vector.extract_strided_slice %139 {offsets = [3, 0], sizes = [1, 64], strides = [1, 1]} : vector<16x64xf32> to vector<1x64xf32>
    %150 = vector.shape_cast %149 : vector<1x64xf32> to vector<1x64xf32>
    %151 = vector.broadcast %150 : vector<1x64xf32> to vector<16x64xf32>
    %152 = vector.extract_strided_slice %139 {offsets = [4, 0], sizes = [1, 64], strides = [1, 1]} : vector<16x64xf32> to vector<1x64xf32>
    %153 = vector.shape_cast %152 : vector<1x64xf32> to vector<1x64xf32>
    %154 = vector.broadcast %153 : vector<1x64xf32> to vector<16x64xf32>
    %155 = vector.extract_strided_slice %139 {offsets = [5, 0], sizes = [1, 64], strides = [1, 1]} : vector<16x64xf32> to vector<1x64xf32>
    %156 = vector.shape_cast %155 : vector<1x64xf32> to vector<1x64xf32>
    %157 = vector.broadcast %156 : vector<1x64xf32> to vector<16x64xf32>
    %158 = vector.extract_strided_slice %139 {offsets = [6, 0], sizes = [1, 64], strides = [1, 1]} : vector<16x64xf32> to vector<1x64xf32>
    %159 = vector.shape_cast %158 : vector<1x64xf32> to vector<1x64xf32>
    %160 = vector.broadcast %159 : vector<1x64xf32> to vector<16x64xf32>
    %161 = vector.extract_strided_slice %139 {offsets = [7, 0], sizes = [1, 64], strides = [1, 1]} : vector<16x64xf32> to vector<1x64xf32>
    %162 = vector.shape_cast %161 : vector<1x64xf32> to vector<1x64xf32>
    %163 = vector.broadcast %162 : vector<1x64xf32> to vector<16x64xf32>
    %164 = tpu.concatenate %142, %145, %148, %151, %154, %157, %160, %163 in 0 : vector<16x64xf32>, vector<16x64xf32>, vector<16x64xf32>, vector<16x64xf32>, vector<16x64xf32>, vector<16x64xf32>, vector<16x64xf32>, vector<16x64xf32> -> vector<128x64xf32>
    %c0_49 = arith.constant 0 : index
    %c0_50 = arith.constant 0 : index
    %c0_51 = arith.constant 0 : index
    %165 = vector.load %arg2[%c0_49, %c0_50, %c0_51] : memref<1x256x4xf32, #tpu.memory_space<vmem>>, vector<1x128x4xf32>
    %166 = vector.shape_cast %165 : vector<1x128x4xf32> to vector<128x4xf32>
    %c8_52 = arith.constant 8 : index
    %c0_53 = arith.constant 0 : index
    %167 = vector.load %arg4[%c8_52, %c0_53] : memref<192x64xf32, #tpu.memory_space<vmem>>, vector<4x64xf32>
    %cst_54 = arith.constant dense<0.000000e+00> : vector<128x64xf32>
    %168 = tpu.matmul %166, %167, %cst_54 {dimension_numbers = #tpu.dot_dimension_numbers<[1], [0], [0], [1], [0, 0, 1, 1], [], []>} : vector<128x4xf32>, vector<4x64xf32>, vector<128x64xf32> -> vector<128x64xf32>
    %169 = arith.addf %168, %164 : vector<128x64xf32>
    %cst_55 = arith.constant 0.000000e+00 : f32
    %170 = vector.broadcast %cst_55 : f32 to vector<128x64xf32>
    %171 = arith.maximumf %169, %170 : vector<128x64xf32>
    %c24_56 = arith.constant 24 : index
    %c0_57 = arith.constant 0 : index
    %172 = vector.load %arg4[%c24_56, %c0_57] : memref<192x64xf32, #tpu.memory_space<vmem>>, vector<64x64xf32>
    %cst_58 = arith.constant dense<0.000000e+00> : vector<128x64xf32>
    %173 = tpu.matmul %171, %172, %cst_58 {dimension_numbers = #tpu.dot_dimension_numbers<[1], [0], [0], [1], [0, 0, 1, 1], [], []>} : vector<128x64xf32>, vector<64x64xf32>, vector<128x64xf32> -> vector<128x64xf32>
    %c17_59 = arith.constant 17 : index
    %c0_60 = arith.constant 0 : index
    %174 = vector.load %arg4[%c17_59, %c0_60] : memref<192x64xf32, #tpu.memory_space<vmem>>, vector<1x64xf32>
    %175 = vector.broadcast %174 : vector<1x64xf32> to vector<128x64xf32>
    %176 = arith.addf %173, %175 : vector<128x64xf32>
    %cst_61 = arith.constant 0.000000e+00 : f32
    %177 = vector.broadcast %cst_61 : f32 to vector<128x64xf32>
    %178 = arith.maximumf %176, %177 : vector<128x64xf32>
    %c0_62 = arith.constant 0 : index
    %c0_63 = arith.constant 0 : index
    %c0_64 = arith.constant 0 : index
    %179 = vector.load %arg3[%c0_62, %c0_63, %c0_64] : memref<1x256x64xf32, #tpu.memory_space<vmem>>, vector<1x128x64xf32>
    %180 = vector.shape_cast %179 : vector<1x128x64xf32> to vector<128x64xf32>
    %181 = arith.mulf %178, %180 : vector<128x64xf32>
    %182 = vector.extract_strided_slice %181 {offsets = [0, 0], sizes = [64, 64], strides = [1, 1]} : vector<128x64xf32> to vector<64x64xf32>
    %183 = vector.extract_strided_slice %181 {offsets = [64, 0], sizes = [64, 64], strides = [1, 1]} : vector<128x64xf32> to vector<64x64xf32>
    %184 = arith.maximumf %182, %183 : vector<64x64xf32>
    %185 = vector.extract_strided_slice %184 {offsets = [0, 0], sizes = [32, 64], strides = [1, 1]} : vector<64x64xf32> to vector<32x64xf32>
    %186 = vector.extract_strided_slice %184 {offsets = [32, 0], sizes = [32, 64], strides = [1, 1]} : vector<64x64xf32> to vector<32x64xf32>
    %187 = arith.maximumf %185, %186 : vector<32x64xf32>
    %188 = vector.extract_strided_slice %187 {offsets = [0, 0], sizes = [16, 64], strides = [1, 1]} : vector<32x64xf32> to vector<16x64xf32>
    %189 = vector.extract_strided_slice %187 {offsets = [16, 0], sizes = [16, 64], strides = [1, 1]} : vector<32x64xf32> to vector<16x64xf32>
    %190 = arith.maximumf %188, %189 : vector<16x64xf32>
    %191 = vector.extract_strided_slice %139 {offsets = [8, 0], sizes = [1, 64], strides = [1, 1]} : vector<16x64xf32> to vector<1x64xf32>
    %192 = vector.shape_cast %191 : vector<1x64xf32> to vector<1x64xf32>
    %193 = vector.broadcast %192 : vector<1x64xf32> to vector<16x64xf32>
    %194 = vector.extract_strided_slice %139 {offsets = [9, 0], sizes = [1, 64], strides = [1, 1]} : vector<16x64xf32> to vector<1x64xf32>
    %195 = vector.shape_cast %194 : vector<1x64xf32> to vector<1x64xf32>
    %196 = vector.broadcast %195 : vector<1x64xf32> to vector<16x64xf32>
    %197 = vector.extract_strided_slice %139 {offsets = [10, 0], sizes = [1, 64], strides = [1, 1]} : vector<16x64xf32> to vector<1x64xf32>
    %198 = vector.shape_cast %197 : vector<1x64xf32> to vector<1x64xf32>
    %199 = vector.broadcast %198 : vector<1x64xf32> to vector<16x64xf32>
    %200 = vector.extract_strided_slice %139 {offsets = [11, 0], sizes = [1, 64], strides = [1, 1]} : vector<16x64xf32> to vector<1x64xf32>
    %201 = vector.shape_cast %200 : vector<1x64xf32> to vector<1x64xf32>
    %202 = vector.broadcast %201 : vector<1x64xf32> to vector<16x64xf32>
    %203 = vector.extract_strided_slice %139 {offsets = [12, 0], sizes = [1, 64], strides = [1, 1]} : vector<16x64xf32> to vector<1x64xf32>
    %204 = vector.shape_cast %203 : vector<1x64xf32> to vector<1x64xf32>
    %205 = vector.broadcast %204 : vector<1x64xf32> to vector<16x64xf32>
    %206 = vector.extract_strided_slice %139 {offsets = [13, 0], sizes = [1, 64], strides = [1, 1]} : vector<16x64xf32> to vector<1x64xf32>
    %207 = vector.shape_cast %206 : vector<1x64xf32> to vector<1x64xf32>
    %208 = vector.broadcast %207 : vector<1x64xf32> to vector<16x64xf32>
    %209 = vector.extract_strided_slice %139 {offsets = [14, 0], sizes = [1, 64], strides = [1, 1]} : vector<16x64xf32> to vector<1x64xf32>
    %210 = vector.shape_cast %209 : vector<1x64xf32> to vector<1x64xf32>
    %211 = vector.broadcast %210 : vector<1x64xf32> to vector<16x64xf32>
    %212 = vector.extract_strided_slice %139 {offsets = [15, 0], sizes = [1, 64], strides = [1, 1]} : vector<16x64xf32> to vector<1x64xf32>
    %213 = vector.shape_cast %212 : vector<1x64xf32> to vector<1x64xf32>
    %214 = vector.broadcast %213 : vector<1x64xf32> to vector<16x64xf32>
    %215 = tpu.concatenate %193, %196, %199, %202, %205, %208, %211, %214 in 0 : vector<16x64xf32>, vector<16x64xf32>, vector<16x64xf32>, vector<16x64xf32>, vector<16x64xf32>, vector<16x64xf32>, vector<16x64xf32>, vector<16x64xf32> -> vector<128x64xf32>
    %c0_65 = arith.constant 0 : index
    %c128_66 = arith.constant 128 : index
    %c0_67 = arith.constant 0 : index
    %216 = vector.load %arg2[%c0_65, %c128_66, %c0_67] : memref<1x256x4xf32, #tpu.memory_space<vmem>>, vector<1x128x4xf32>
    %217 = vector.shape_cast %216 : vector<1x128x4xf32> to vector<128x4xf32>
    %c8_68 = arith.constant 8 : index
    %c0_69 = arith.constant 0 : index
    %218 = vector.load %arg4[%c8_68, %c0_69] : memref<192x64xf32, #tpu.memory_space<vmem>>, vector<4x64xf32>
    %cst_70 = arith.constant dense<0.000000e+00> : vector<128x64xf32>
    %219 = tpu.matmul %217, %218, %cst_70 {dimension_numbers = #tpu.dot_dimension_numbers<[1], [0], [0], [1], [0, 0, 1, 1], [], []>} : vector<128x4xf32>, vector<4x64xf32>, vector<128x64xf32> -> vector<128x64xf32>
    %220 = arith.addf %219, %215 : vector<128x64xf32>
    %cst_71 = arith.constant 0.000000e+00 : f32
    %221 = vector.broadcast %cst_71 : f32 to vector<128x64xf32>
    %222 = arith.maximumf %220, %221 : vector<128x64xf32>
    %c24_72 = arith.constant 24 : index
    %c0_73 = arith.constant 0 : index
    %223 = vector.load %arg4[%c24_72, %c0_73] : memref<192x64xf32, #tpu.memory_space<vmem>>, vector<64x64xf32>
    %cst_74 = arith.constant dense<0.000000e+00> : vector<128x64xf32>
    %224 = tpu.matmul %222, %223, %cst_74 {dimension_numbers = #tpu.dot_dimension_numbers<[1], [0], [0], [1], [0, 0, 1, 1], [], []>} : vector<128x64xf32>, vector<64x64xf32>, vector<128x64xf32> -> vector<128x64xf32>
    %c17_75 = arith.constant 17 : index
    %c0_76 = arith.constant 0 : index
    %225 = vector.load %arg4[%c17_75, %c0_76] : memref<192x64xf32, #tpu.memory_space<vmem>>, vector<1x64xf32>
    %226 = vector.broadcast %225 : vector<1x64xf32> to vector<128x64xf32>
    %227 = arith.addf %224, %226 : vector<128x64xf32>
    %cst_77 = arith.constant 0.000000e+00 : f32
    %228 = vector.broadcast %cst_77 : f32 to vector<128x64xf32>
    %229 = arith.maximumf %227, %228 : vector<128x64xf32>
    %c0_78 = arith.constant 0 : index
    %c128_79 = arith.constant 128 : index
    %c0_80 = arith.constant 0 : index
    %230 = vector.load %arg3[%c0_78, %c128_79, %c0_80] : memref<1x256x64xf32, #tpu.memory_space<vmem>>, vector<1x128x64xf32>
    %231 = vector.shape_cast %230 : vector<1x128x64xf32> to vector<128x64xf32>
    %232 = arith.mulf %229, %231 : vector<128x64xf32>
    %233 = vector.extract_strided_slice %232 {offsets = [0, 0], sizes = [64, 64], strides = [1, 1]} : vector<128x64xf32> to vector<64x64xf32>
    %234 = vector.extract_strided_slice %232 {offsets = [64, 0], sizes = [64, 64], strides = [1, 1]} : vector<128x64xf32> to vector<64x64xf32>
    %235 = arith.maximumf %233, %234 : vector<64x64xf32>
    %236 = vector.extract_strided_slice %235 {offsets = [0, 0], sizes = [32, 64], strides = [1, 1]} : vector<64x64xf32> to vector<32x64xf32>
    %237 = vector.extract_strided_slice %235 {offsets = [32, 0], sizes = [32, 64], strides = [1, 1]} : vector<64x64xf32> to vector<32x64xf32>
    %238 = arith.maximumf %236, %237 : vector<32x64xf32>
    %239 = vector.extract_strided_slice %238 {offsets = [0, 0], sizes = [16, 64], strides = [1, 1]} : vector<32x64xf32> to vector<16x64xf32>
    %240 = vector.extract_strided_slice %238 {offsets = [16, 0], sizes = [16, 64], strides = [1, 1]} : vector<32x64xf32> to vector<16x64xf32>
    %241 = arith.maximumf %239, %240 : vector<16x64xf32>
    %242 = arith.maximumf %190, %241 : vector<16x64xf32>
    %c88_81 = arith.constant 88 : index
    %c0_82 = arith.constant 0 : index
    %243 = vector.load %arg4[%c88_81, %c0_82] : memref<192x64xf32, #tpu.memory_space<vmem>>, vector<8x32xf32>
    %cst_83 = arith.constant dense<0.000000e+00> : vector<16x32xf32>
    %244 = tpu.matmul %134, %243, %cst_83 {dimension_numbers = #tpu.dot_dimension_numbers<[1], [0], [0], [1], [0, 0, 1, 1], [], []>} : vector<16x8xf32>, vector<8x32xf32>, vector<16x32xf32> -> vector<16x32xf32>
    %c96_84 = arith.constant 96 : index
    %c0_85 = arith.constant 0 : index
    %245 = vector.load %arg4[%c96_84, %c0_85] : memref<192x64xf32, #tpu.memory_space<vmem>>, vector<64x32xf32>
    %cst_86 = arith.constant dense<0.000000e+00> : vector<16x32xf32>
    %246 = tpu.matmul %242, %245, %cst_86 {dimension_numbers = #tpu.dot_dimension_numbers<[1], [0], [0], [1], [0, 0, 1, 1], [], []>} : vector<16x64xf32>, vector<64x32xf32>, vector<16x32xf32> -> vector<16x32xf32>
    %247 = arith.addf %244, %246 : vector<16x32xf32>
    %c18_87 = arith.constant 18 : index
    %c0_88 = arith.constant 0 : index
    %248 = vector.load %arg4[%c18_87, %c0_88] : memref<192x64xf32, #tpu.memory_space<vmem>>, vector<1x32xf32>
    %249 = vector.broadcast %248 : vector<1x32xf32> to vector<16x32xf32>
    %250 = arith.addf %247, %249 : vector<16x32xf32>
    %cst_89 = arith.constant 0.000000e+00 : f32
    %251 = vector.broadcast %cst_89 : f32 to vector<16x32xf32>
    %252 = arith.maximumf %250, %251 : vector<16x32xf32>
    %c160_90 = arith.constant 160 : index
    %c0_91 = arith.constant 0 : index
    %253 = vector.load %arg4[%c160_90, %c0_91] : memref<192x64xf32, #tpu.memory_space<vmem>>, vector<32x4xf32>
    %cst_92 = arith.constant dense<0.000000e+00> : vector<16x4xf32>
    %254 = tpu.matmul %252, %253, %cst_92 {dimension_numbers = #tpu.dot_dimension_numbers<[1], [0], [0], [1], [0, 0, 1, 1], [], []>} : vector<16x32xf32>, vector<32x4xf32>, vector<16x4xf32> -> vector<16x4xf32>
    %c19_93 = arith.constant 19 : index
    %c0_94 = arith.constant 0 : index
    %255 = vector.load %arg4[%c19_93, %c0_94] : memref<192x64xf32, #tpu.memory_space<vmem>>, vector<1x4xf32>
    %256 = vector.broadcast %255 : vector<1x4xf32> to vector<16x4xf32>
    %257 = arith.addf %254, %256 : vector<16x4xf32>
    %258 = arith.mulf %257, %257 : vector<16x4xf32>
    %cst_95 = arith.constant dense<0.000000e+00> : vector<16xf32>
    %259 = vector.multi_reduction <add>, %258, %cst_95 [1] : vector<16x4xf32> to vector<16xf32>
    %260 = vector.shape_cast %259 : vector<16xf32> to vector<16x1xf32>
    %cst_96 = arith.constant 1.000000e+00 : f32
    %261 = vector.broadcast %cst_96 : f32 to vector<16x1xf32>
    %262 = arith.maximumf %260, %261 : vector<16x1xf32>
    %263 = math.rsqrt %262 : vector<16x1xf32>
    %264 = vector.broadcast %263 : vector<16x1xf32> to vector<16x4xf32>
    %265 = arith.mulf %257, %264 : vector<16x4xf32>
    %266 = vector.extract_strided_slice %134 {offsets = [0, 0], sizes = [16, 4], strides = [1, 1]} : vector<16x8xf32> to vector<16x4xf32>
    %267 = tpu.concatenate %265, %266 in 1 : vector<16x4xf32>, vector<16x4xf32> -> vector<16x8xf32>
    %c0_97 = arith.constant 0 : index
    %c0_98 = arith.constant 0 : index
    %268 = vector.load %arg4[%c0_97, %c0_98] : memref<192x64xf32, #tpu.memory_space<vmem>>, vector<8x64xf32>
    %cst_99 = arith.constant dense<0.000000e+00> : vector<16x64xf32>
    %269 = tpu.matmul %267, %268, %cst_99 {dimension_numbers = #tpu.dot_dimension_numbers<[1], [0], [0], [1], [0, 0, 1, 1], [], []>} : vector<16x8xf32>, vector<8x64xf32>, vector<16x64xf32> -> vector<16x64xf32>
    %c16_100 = arith.constant 16 : index
    %c0_101 = arith.constant 0 : index
    %270 = vector.load %arg4[%c16_100, %c0_101] : memref<192x64xf32, #tpu.memory_space<vmem>>, vector<1x64xf32>
    %271 = vector.broadcast %270 : vector<1x64xf32> to vector<16x64xf32>
    %272 = arith.addf %269, %271 : vector<16x64xf32>
    %273 = vector.extract_strided_slice %272 {offsets = [0, 0], sizes = [1, 64], strides = [1, 1]} : vector<16x64xf32> to vector<1x64xf32>
    %274 = vector.shape_cast %273 : vector<1x64xf32> to vector<1x64xf32>
    %275 = vector.broadcast %274 : vector<1x64xf32> to vector<16x64xf32>
    %276 = vector.extract_strided_slice %272 {offsets = [1, 0], sizes = [1, 64], strides = [1, 1]} : vector<16x64xf32> to vector<1x64xf32>
    %277 = vector.shape_cast %276 : vector<1x64xf32> to vector<1x64xf32>
    %278 = vector.broadcast %277 : vector<1x64xf32> to vector<16x64xf32>
    %279 = vector.extract_strided_slice %272 {offsets = [2, 0], sizes = [1, 64], strides = [1, 1]} : vector<16x64xf32> to vector<1x64xf32>
    %280 = vector.shape_cast %279 : vector<1x64xf32> to vector<1x64xf32>
    %281 = vector.broadcast %280 : vector<1x64xf32> to vector<16x64xf32>
    %282 = vector.extract_strided_slice %272 {offsets = [3, 0], sizes = [1, 64], strides = [1, 1]} : vector<16x64xf32> to vector<1x64xf32>
    %283 = vector.shape_cast %282 : vector<1x64xf32> to vector<1x64xf32>
    %284 = vector.broadcast %283 : vector<1x64xf32> to vector<16x64xf32>
    %285 = vector.extract_strided_slice %272 {offsets = [4, 0], sizes = [1, 64], strides = [1, 1]} : vector<16x64xf32> to vector<1x64xf32>
    %286 = vector.shape_cast %285 : vector<1x64xf32> to vector<1x64xf32>
    %287 = vector.broadcast %286 : vector<1x64xf32> to vector<16x64xf32>
    %288 = vector.extract_strided_slice %272 {offsets = [5, 0], sizes = [1, 64], strides = [1, 1]} : vector<16x64xf32> to vector<1x64xf32>
    %289 = vector.shape_cast %288 : vector<1x64xf32> to vector<1x64xf32>
    %290 = vector.broadcast %289 : vector<1x64xf32> to vector<16x64xf32>
    %291 = vector.extract_strided_slice %272 {offsets = [6, 0], sizes = [1, 64], strides = [1, 1]} : vector<16x64xf32> to vector<1x64xf32>
    %292 = vector.shape_cast %291 : vector<1x64xf32> to vector<1x64xf32>
    %293 = vector.broadcast %292 : vector<1x64xf32> to vector<16x64xf32>
    %294 = vector.extract_strided_slice %272 {offsets = [7, 0], sizes = [1, 64], strides = [1, 1]} : vector<16x64xf32> to vector<1x64xf32>
    %295 = vector.shape_cast %294 : vector<1x64xf32> to vector<1x64xf32>
    %296 = vector.broadcast %295 : vector<1x64xf32> to vector<16x64xf32>
    %297 = tpu.concatenate %275, %278, %281, %284, %287, %290, %293, %296 in 0 : vector<16x64xf32>, vector<16x64xf32>, vector<16x64xf32>, vector<16x64xf32>, vector<16x64xf32>, vector<16x64xf32>, vector<16x64xf32>, vector<16x64xf32> -> vector<128x64xf32>
    %c0_102 = arith.constant 0 : index
    %c0_103 = arith.constant 0 : index
    %c0_104 = arith.constant 0 : index
    %298 = vector.load %arg2[%c0_102, %c0_103, %c0_104] : memref<1x256x4xf32, #tpu.memory_space<vmem>>, vector<1x128x4xf32>
    %299 = vector.shape_cast %298 : vector<1x128x4xf32> to vector<128x4xf32>
    %c8_105 = arith.constant 8 : index
    %c0_106 = arith.constant 0 : index
    %300 = vector.load %arg4[%c8_105, %c0_106] : memref<192x64xf32, #tpu.memory_space<vmem>>, vector<4x64xf32>
    %cst_107 = arith.constant dense<0.000000e+00> : vector<128x64xf32>
    %301 = tpu.matmul %299, %300, %cst_107 {dimension_numbers = #tpu.dot_dimension_numbers<[1], [0], [0], [1], [0, 0, 1, 1], [], []>} : vector<128x4xf32>, vector<4x64xf32>, vector<128x64xf32> -> vector<128x64xf32>
    %302 = arith.addf %301, %297 : vector<128x64xf32>
    %cst_108 = arith.constant 0.000000e+00 : f32
    %303 = vector.broadcast %cst_108 : f32 to vector<128x64xf32>
    %304 = arith.maximumf %302, %303 : vector<128x64xf32>
    %c24_109 = arith.constant 24 : index
    %c0_110 = arith.constant 0 : index
    %305 = vector.load %arg4[%c24_109, %c0_110] : memref<192x64xf32, #tpu.memory_space<vmem>>, vector<64x64xf32>
    %cst_111 = arith.constant dense<0.000000e+00> : vector<128x64xf32>
    %306 = tpu.matmul %304, %305, %cst_111 {dimension_numbers = #tpu.dot_dimension_numbers<[1], [0], [0], [1], [0, 0, 1, 1], [], []>} : vector<128x64xf32>, vector<64x64xf32>, vector<128x64xf32> -> vector<128x64xf32>
    %c17_112 = arith.constant 17 : index
    %c0_113 = arith.constant 0 : index
    %307 = vector.load %arg4[%c17_112, %c0_113] : memref<192x64xf32, #tpu.memory_space<vmem>>, vector<1x64xf32>
    %308 = vector.broadcast %307 : vector<1x64xf32> to vector<128x64xf32>
    %309 = arith.addf %306, %308 : vector<128x64xf32>
    %cst_114 = arith.constant 0.000000e+00 : f32
    %310 = vector.broadcast %cst_114 : f32 to vector<128x64xf32>
    %311 = arith.maximumf %309, %310 : vector<128x64xf32>
    %c0_115 = arith.constant 0 : index
    %c0_116 = arith.constant 0 : index
    %c0_117 = arith.constant 0 : index
    %312 = vector.load %arg3[%c0_115, %c0_116, %c0_117] : memref<1x256x64xf32, #tpu.memory_space<vmem>>, vector<1x128x64xf32>
    %313 = vector.shape_cast %312 : vector<1x128x64xf32> to vector<128x64xf32>
    %314 = arith.mulf %311, %313 : vector<128x64xf32>
    %315 = vector.extract_strided_slice %314 {offsets = [0, 0], sizes = [64, 64], strides = [1, 1]} : vector<128x64xf32> to vector<64x64xf32>
    %316 = vector.extract_strided_slice %314 {offsets = [64, 0], sizes = [64, 64], strides = [1, 1]} : vector<128x64xf32> to vector<64x64xf32>
    %317 = arith.maximumf %315, %316 : vector<64x64xf32>
    %318 = vector.extract_strided_slice %317 {offsets = [0, 0], sizes = [32, 64], strides = [1, 1]} : vector<64x64xf32> to vector<32x64xf32>
    %319 = vector.extract_strided_slice %317 {offsets = [32, 0], sizes = [32, 64], strides = [1, 1]} : vector<64x64xf32> to vector<32x64xf32>
    %320 = arith.maximumf %318, %319 : vector<32x64xf32>
    %321 = vector.extract_strided_slice %320 {offsets = [0, 0], sizes = [16, 64], strides = [1, 1]} : vector<32x64xf32> to vector<16x64xf32>
    %322 = vector.extract_strided_slice %320 {offsets = [16, 0], sizes = [16, 64], strides = [1, 1]} : vector<32x64xf32> to vector<16x64xf32>
    %323 = arith.maximumf %321, %322 : vector<16x64xf32>
    %324 = vector.extract_strided_slice %272 {offsets = [8, 0], sizes = [1, 64], strides = [1, 1]} : vector<16x64xf32> to vector<1x64xf32>
    %325 = vector.shape_cast %324 : vector<1x64xf32> to vector<1x64xf32>
    %326 = vector.broadcast %325 : vector<1x64xf32> to vector<16x64xf32>
    %327 = vector.extract_strided_slice %272 {offsets = [9, 0], sizes = [1, 64], strides = [1, 1]} : vector<16x64xf32> to vector<1x64xf32>
    %328 = vector.shape_cast %327 : vector<1x64xf32> to vector<1x64xf32>
    %329 = vector.broadcast %328 : vector<1x64xf32> to vector<16x64xf32>
    %330 = vector.extract_strided_slice %272 {offsets = [10, 0], sizes = [1, 64], strides = [1, 1]} : vector<16x64xf32> to vector<1x64xf32>
    %331 = vector.shape_cast %330 : vector<1x64xf32> to vector<1x64xf32>
    %332 = vector.broadcast %331 : vector<1x64xf32> to vector<16x64xf32>
    %333 = vector.extract_strided_slice %272 {offsets = [11, 0], sizes = [1, 64], strides = [1, 1]} : vector<16x64xf32> to vector<1x64xf32>
    %334 = vector.shape_cast %333 : vector<1x64xf32> to vector<1x64xf32>
    %335 = vector.broadcast %334 : vector<1x64xf32> to vector<16x64xf32>
    %336 = vector.extract_strided_slice %272 {offsets = [12, 0], sizes = [1, 64], strides = [1, 1]} : vector<16x64xf32> to vector<1x64xf32>
    %337 = vector.shape_cast %336 : vector<1x64xf32> to vector<1x64xf32>
    %338 = vector.broadcast %337 : vector<1x64xf32> to vector<16x64xf32>
    %339 = vector.extract_strided_slice %272 {offsets = [13, 0], sizes = [1, 64], strides = [1, 1]} : vector<16x64xf32> to vector<1x64xf32>
    %340 = vector.shape_cast %339 : vector<1x64xf32> to vector<1x64xf32>
    %341 = vector.broadcast %340 : vector<1x64xf32> to vector<16x64xf32>
    %342 = vector.extract_strided_slice %272 {offsets = [14, 0], sizes = [1, 64], strides = [1, 1]} : vector<16x64xf32> to vector<1x64xf32>
    %343 = vector.shape_cast %342 : vector<1x64xf32> to vector<1x64xf32>
    %344 = vector.broadcast %343 : vector<1x64xf32> to vector<16x64xf32>
    %345 = vector.extract_strided_slice %272 {offsets = [15, 0], sizes = [1, 64], strides = [1, 1]} : vector<16x64xf32> to vector<1x64xf32>
    %346 = vector.shape_cast %345 : vector<1x64xf32> to vector<1x64xf32>
    %347 = vector.broadcast %346 : vector<1x64xf32> to vector<16x64xf32>
    %348 = tpu.concatenate %326, %329, %332, %335, %338, %341, %344, %347 in 0 : vector<16x64xf32>, vector<16x64xf32>, vector<16x64xf32>, vector<16x64xf32>, vector<16x64xf32>, vector<16x64xf32>, vector<16x64xf32>, vector<16x64xf32> -> vector<128x64xf32>
    %c0_118 = arith.constant 0 : index
    %c128_119 = arith.constant 128 : index
    %c0_120 = arith.constant 0 : index
    %349 = vector.load %arg2[%c0_118, %c128_119, %c0_120] : memref<1x256x4xf32, #tpu.memory_space<vmem>>, vector<1x128x4xf32>
    %350 = vector.shape_cast %349 : vector<1x128x4xf32> to vector<128x4xf32>
    %c8_121 = arith.constant 8 : index
    %c0_122 = arith.constant 0 : index
    %351 = vector.load %arg4[%c8_121, %c0_122] : memref<192x64xf32, #tpu.memory_space<vmem>>, vector<4x64xf32>
    %cst_123 = arith.constant dense<0.000000e+00> : vector<128x64xf32>
    %352 = tpu.matmul %350, %351, %cst_123 {dimension_numbers = #tpu.dot_dimension_numbers<[1], [0], [0], [1], [0, 0, 1, 1], [], []>} : vector<128x4xf32>, vector<4x64xf32>, vector<128x64xf32> -> vector<128x64xf32>
    %353 = arith.addf %352, %348 : vector<128x64xf32>
    %cst_124 = arith.constant 0.000000e+00 : f32
    %354 = vector.broadcast %cst_124 : f32 to vector<128x64xf32>
    %355 = arith.maximumf %353, %354 : vector<128x64xf32>
    %c24_125 = arith.constant 24 : index
    %c0_126 = arith.constant 0 : index
    %356 = vector.load %arg4[%c24_125, %c0_126] : memref<192x64xf32, #tpu.memory_space<vmem>>, vector<64x64xf32>
    %cst_127 = arith.constant dense<0.000000e+00> : vector<128x64xf32>
    %357 = tpu.matmul %355, %356, %cst_127 {dimension_numbers = #tpu.dot_dimension_numbers<[1], [0], [0], [1], [0, 0, 1, 1], [], []>} : vector<128x64xf32>, vector<64x64xf32>, vector<128x64xf32> -> vector<128x64xf32>
    %c17_128 = arith.constant 17 : index
    %c0_129 = arith.constant 0 : index
    %358 = vector.load %arg4[%c17_128, %c0_129] : memref<192x64xf32, #tpu.memory_space<vmem>>, vector<1x64xf32>
    %359 = vector.broadcast %358 : vector<1x64xf32> to vector<128x64xf32>
    %360 = arith.addf %357, %359 : vector<128x64xf32>
    %cst_130 = arith.constant 0.000000e+00 : f32
    %361 = vector.broadcast %cst_130 : f32 to vector<128x64xf32>
    %362 = arith.maximumf %360, %361 : vector<128x64xf32>
    %c0_131 = arith.constant 0 : index
    %c128_132 = arith.constant 128 : index
    %c0_133 = arith.constant 0 : index
    %363 = vector.load %arg3[%c0_131, %c128_132, %c0_133] : memref<1x256x64xf32, #tpu.memory_space<vmem>>, vector<1x128x64xf32>
    %364 = vector.shape_cast %363 : vector<1x128x64xf32> to vector<128x64xf32>
    %365 = arith.mulf %362, %364 : vector<128x64xf32>
    %366 = vector.extract_strided_slice %365 {offsets = [0, 0], sizes = [64, 64], strides = [1, 1]} : vector<128x64xf32> to vector<64x64xf32>
    %367 = vector.extract_strided_slice %365 {offsets = [64, 0], sizes = [64, 64], strides = [1, 1]} : vector<128x64xf32> to vector<64x64xf32>
    %368 = arith.maximumf %366, %367 : vector<64x64xf32>
    %369 = vector.extract_strided_slice %368 {offsets = [0, 0], sizes = [32, 64], strides = [1, 1]} : vector<64x64xf32> to vector<32x64xf32>
    %370 = vector.extract_strided_slice %368 {offsets = [32, 0], sizes = [32, 64], strides = [1, 1]} : vector<64x64xf32> to vector<32x64xf32>
    %371 = arith.maximumf %369, %370 : vector<32x64xf32>
    %372 = vector.extract_strided_slice %371 {offsets = [0, 0], sizes = [16, 64], strides = [1, 1]} : vector<32x64xf32> to vector<16x64xf32>
    %373 = vector.extract_strided_slice %371 {offsets = [16, 0], sizes = [16, 64], strides = [1, 1]} : vector<32x64xf32> to vector<16x64xf32>
    %374 = arith.maximumf %372, %373 : vector<16x64xf32>
    %375 = arith.maximumf %323, %374 : vector<16x64xf32>
    %c88_134 = arith.constant 88 : index
    %c0_135 = arith.constant 0 : index
    %376 = vector.load %arg4[%c88_134, %c0_135] : memref<192x64xf32, #tpu.memory_space<vmem>>, vector<8x32xf32>
    %cst_136 = arith.constant dense<0.000000e+00> : vector<16x32xf32>
    %377 = tpu.matmul %267, %376, %cst_136 {dimension_numbers = #tpu.dot_dimension_numbers<[1], [0], [0], [1], [0, 0, 1, 1], [], []>} : vector<16x8xf32>, vector<8x32xf32>, vector<16x32xf32> -> vector<16x32xf32>
    %c96_137 = arith.constant 96 : index
    %c0_138 = arith.constant 0 : index
    %378 = vector.load %arg4[%c96_137, %c0_138] : memref<192x64xf32, #tpu.memory_space<vmem>>, vector<64x32xf32>
    %cst_139 = arith.constant dense<0.000000e+00> : vector<16x32xf32>
    %379 = tpu.matmul %375, %378, %cst_139 {dimension_numbers = #tpu.dot_dimension_numbers<[1], [0], [0], [1], [0, 0, 1, 1], [], []>} : vector<16x64xf32>, vector<64x32xf32>, vector<16x32xf32> -> vector<16x32xf32>
    %380 = arith.addf %377, %379 : vector<16x32xf32>
    %c18_140 = arith.constant 18 : index
    %c0_141 = arith.constant 0 : index
    %381 = vector.load %arg4[%c18_140, %c0_141] : memref<192x64xf32, #tpu.memory_space<vmem>>, vector<1x32xf32>
    %382 = vector.broadcast %381 : vector<1x32xf32> to vector<16x32xf32>
    %383 = arith.addf %380, %382 : vector<16x32xf32>
    %cst_142 = arith.constant 0.000000e+00 : f32
    %384 = vector.broadcast %cst_142 : f32 to vector<16x32xf32>
    %385 = arith.maximumf %383, %384 : vector<16x32xf32>
    %c160_143 = arith.constant 160 : index
    %c0_144 = arith.constant 0 : index
    %386 = vector.load %arg4[%c160_143, %c0_144] : memref<192x64xf32, #tpu.memory_space<vmem>>, vector<32x4xf32>
    %cst_145 = arith.constant dense<0.000000e+00> : vector<16x4xf32>
    %387 = tpu.matmul %385, %386, %cst_145 {dimension_numbers = #tpu.dot_dimension_numbers<[1], [0], [0], [1], [0, 0, 1, 1], [], []>} : vector<16x32xf32>, vector<32x4xf32>, vector<16x4xf32> -> vector<16x4xf32>
    %c19_146 = arith.constant 19 : index
    %c0_147 = arith.constant 0 : index
    %388 = vector.load %arg4[%c19_146, %c0_147] : memref<192x64xf32, #tpu.memory_space<vmem>>, vector<1x4xf32>
    %389 = vector.broadcast %388 : vector<1x4xf32> to vector<16x4xf32>
    %390 = arith.addf %387, %389 : vector<16x4xf32>
    %391 = arith.mulf %390, %390 : vector<16x4xf32>
    %cst_148 = arith.constant dense<0.000000e+00> : vector<16xf32>
    %392 = vector.multi_reduction <add>, %391, %cst_148 [1] : vector<16x4xf32> to vector<16xf32>
    %393 = vector.shape_cast %392 : vector<16xf32> to vector<16x1xf32>
    %cst_149 = arith.constant 1.000000e+00 : f32
    %394 = vector.broadcast %cst_149 : f32 to vector<16x1xf32>
    %395 = arith.maximumf %393, %394 : vector<16x1xf32>
    %396 = math.rsqrt %395 : vector<16x1xf32>
    %397 = vector.broadcast %396 : vector<16x1xf32> to vector<16x4xf32>
    %398 = arith.mulf %390, %397 : vector<16x4xf32>
    %399 = vector.extract_strided_slice %267 {offsets = [0, 0], sizes = [16, 4], strides = [1, 1]} : vector<16x8xf32> to vector<16x4xf32>
    %400 = tpu.concatenate %398, %399 in 1 : vector<16x4xf32>, vector<16x4xf32> -> vector<16x8xf32>
    %c0_150 = arith.constant 0 : index
    %c0_151 = arith.constant 0 : index
    %c0_152 = arith.constant 0 : index
    %401 = vector.load %arg5[%c0_150, %c0_151, %c0_152] : memref<1x16x8xf32, #tpu.memory_space<vmem>>, vector<1x16x8xf32>
    %402 = vector.shape_cast %401 : vector<1x16x8xf32> to vector<16x8xf32>
    %403 = vector.shape_cast %400 : vector<16x8xf32> to vector<1x16x8xf32>
    tpu.vector_store %arg5[%c0_150, %c0_151, %c0_152], %403 {strides = array<i32>} : memref<1x16x8xf32, #tpu.memory_space<vmem>>, vector<1x16x8xf32>,
    return
  }
  func.func @transform_0(%arg0: i32) -> (i32, i32, i32) {
    %c0_i32 = arith.constant 0 : i32
    %c0_i32_0 = arith.constant 0 : i32
    %c0_i32_1 = arith.constant 0 : i32
    return %arg0, %c0_i32, %c0_i32_0 : i32, i32, i32
  }
  func.func @transform_1(%arg0: i32) -> (i32, i32, i32) {
    %c0_i32 = arith.constant 0 : i32
    %c0_i32_0 = arith.constant 0 : i32
    %c0_i32_1 = arith.constant 0 : i32
    return %arg0, %c0_i32, %c0_i32_0 : i32, i32, i32
  }
  func.func @transform_2(%arg0: i32) -> (i32, i32, i32) {
    %c0_i32 = arith.constant 0 : i32
    %c0_i32_0 = arith.constant 0 : i32
    %c0_i32_1 = arith.constant 0 : i32
    return %arg0, %c0_i32, %c0_i32_0 : i32, i32, i32
  }
  func.func @transform_3(%arg0: i32) -> (i32, i32) {
    %c0_i32 = arith.constant 0 : i32
    %c0_i32_0 = arith.constant 0 : i32
    %c0_i32_1 = arith.constant 0 : i32
    return %c0_i32, %c0_i32_0 : i32, i32
  }
  func.func @transform_4(%arg0: i32) -> (i32, i32, i32) {
    %c0_i32 = arith.constant 0 : i32
    %c0_i32_0 = arith.constant 0 : i32
    %c0_i32_1 = arith.constant 0 : i32
    return %arg0, %c0_i32, %c0_i32_0 : i32, i32, i32
  }
}

</mosaic_0001>

<bundles_post_ra>
// kernel: igcnet_forward.1
= control target key start
LH: loop header
LB: loop body
LE: loop exit
PB: predicated region body
PF: predicated region fallthrough
CT: control target
= control target key end

     0   :  { %s5537_s15 = smov 0   ;;  %s6965_s0 = inlined_call_operand.vmem [shape: f32[4,16,8], index: 0, kind: input, shape index: {}]   ;;  %s6966_s1 = inlined_call_operand.vmem [shape: f32[4,256,4], index: 1, kind: input, shape index: {}]   ;;  %s6967_s2 = inlined_call_operand.vmem [shape: f32[4,256,64], index: 2, kind: input, shape index: {}]   ;;  %s6968_s3 = inlined_call_operand.vmem [shape: f32[192,64], index: 3, kind: input, shape index: {}]   ;;  %s6969_s4 = inlined_call_operand.vmem [shape: f32[4,16,8], index: 4, kind: output, shape index: {}]  }
   0x1 LB: > { %s4162_s16 = sadd.s32 4294967295, %s5509_s15   ;;  %p4166_p0 = scmp.ge.s32.totalorder %s5509_s15, 1  ;;  %s5509_s15 = sphi %s5537_s15, %s14_s15  }
   0x2   : > { %p182_p1 = scmp.lt.s32.totalorder %s5509_s15, 5 }
   0x4   : > { %p183_p2 = pnand %p4166_p0, %p182_p1 }
   0x6   : > { %186 = sbr.rel (%p183_p2) target bundleno = 3362 (0xd22), region = 36 }
   0xd   : > { %v5548_v0 = vld [vmem:[%s6968_s3] sm:$0xff]  ;;  %v5553_v1 = vld [vmem:[%s6968_s3 + $0x8] sm:$0xf]  ;;  %vm426_vm0 = vcmask 1043456   ;;  %p218_p3 = scmp.lt.s32.totalorder %s4162_s16, 3  ;;  %v591_v2 = vld [vmem:[%s6968_s3 + $0x18] sm:$0xff]  ;;  %v328_v48 = vlaneseq }
   0xe   : > { %4719 = vmatprep.subr.mxu0 %v5548_v0  ;;  %4724 = vmatprep.subr.msk.mxu1 %vm426_vm0, %v5553_v1  ;;  %v592_v3 = vld [vmem:[%s6968_s3 + $0x20] sm:$0xff]  ;;  %vm246_vm1 = vcmask 64512   ;;  %vm377_vm2 = vcmask 31744   ;;  %v593_v5 = vld [vmem:[%s6968_s3 + $0x28] sm:$0xff]  ;;  %v594_v6 = vld [vmem:[%s6968_s3 + $0x30] sm:$0xff]  ;;  %vm604_vm3 = vcmask 523264  }
   0xf   : > { %4720 = vmatpush3.msra.mxu0 %v5548_v0  ;;  %s7206_s16 = smov (!%p218_p3, %s4162_s16), 3  ;;  %4725 = vmatpush3.msk.msra.mxu1 %vm426_vm0, %v5553_v1  ;;  %v5569_v4 = vpack.c.bf16 %v592_v3, %v591_v2  ;;  %v5615_v12 = vpack.c.bf16 %v594_v6, %v593_v5  ;;  %v595_v42 = vld [vmem:[%s6968_s3 + $0x38] sm:$0xff]  ;;  %v596_v43 = vld [vmem:[%s6968_s3 + $0x40] sm:$0xff]  ;;  %v597_v45 = vld [vmem:[%s6968_s3 + $0x48] sm:$0xff]  ;;  %v5794_v49 = vshrl.u32 %v328_v48, 7  ;;  %vm1557_vm4 = vcmask 261120  }
  0x10   : > { %4790 = vmatprep.subr.msk.mxu1 %vm426_vm0, %v5553_v1  ;;  %s4403_s25 = sshll.u32 %s7206_s16, 4  ;;  %s4404_s26 = sshll.u32 %s7206_s16, 8  ;;  %v5779_v44 = vpack.c.bf16 %v596_v43, %v595_v42  ;;  %v598_v46 = vld [vmem:[%s6968_s3 + $0x50] sm:$0xff] }
  0x11   : > { %7066 = vst [vmem:[#allocation2_spill] sm:$0xff] %v5569_v4  ;;  %5236 = vmatprep.subr.bf16.mxu0 %v5569_v4  ;;  %s5587_s7 = scalar_lea.vmem %s6965_s0, %s4403_s25  ;;  %s5594_s10 = scalar_lea.vmem %s6966_s1, %s4404_s26  ;;  %7067 = vst [vmem:[#allocation3_spill] sm:$0xff] %v5615_v12  ;;  %v5789_v47 = vpack.c.bf16 %v598_v46, %v597_v45  ;;  %v5799_v50 = vld [vmem:[%s6968_s3 + $0x10] ss:$0 sm:$0xff]  ;;  %v5804_v52 = vsub.s32 0, %v5794_v49  ;;  %v5807_v54 = vsub.s32 1, %v5794_v49 }
  0x12   : > { %v5597_v7 = vld [vmem:[%s5587_s7] sm:$0xff]  ;;  %v5603_v9 = vld [vmem:[%s5587_s7 + $0x8] sm:$0xff]  ;;  %v5613_v11 = vld [vmem:[%s5594_s10 + $0x10] sm:$0xff]  ;;  %7077 = vst [vmem:[#allocation13_spill] sm:$0xff] %v5779_v44  ;;  %v5813_v58 = vsub.s32 2, %v5794_v49  ;;  %v5822_v42 = vsub.s32 3, %v5794_v49  ;;  %s5966_s27 = scalar_lea.vmem %s6967_s2, %s4404_s26  ;;  %s237_s8 = scalar_lea.vmem %s6969_s4, %s4403_s25 }
  0x13   : > { %v5600_v8 = vld [vmem:[%s5594_s10] sm:$0xff]  ;;  %4721 = vmatprep.mubr.msk.f32.mxu0 %vm246_vm1, %v5597_v7  ;;  %v5610_v10 = vld [vmem:[%s5594_s10 + $0x8] sm:$0xff]  ;;  %v5624_v13 = vld [vmem:[%s5594_s10 + $0x18] sm:$0xff]  ;;  %7078 = vst [vmem:[#allocation14_spill] sm:$0xff] %v5789_v47  ;;  %s5511_s17 = smov 4  }
  0x14   : > { %4726 = vmatprep.mubr.msk.f32.mxu1 %vm377_vm2, %v5600_v8  ;;  %4722 = vmatmul.mubr.msk.f32.vlgmr.msra.gmra.mrb[0].mxu0 %vm246_vm1, %v5603_v9  ;;  %v5629_v14 = vld [vmem:[%s5594_s10 + $0x20] sm:$0xff]  ;;  %v5638_v15 = vld [vmem:[%s5594_s10 + $0x28] sm:$0xff]  ;;  %v5641_v16 = vld [vmem:[%s5594_s10 + $0x30] sm:$0xff]  ;;  %7079 = vst [vmem:[#allocation15_spill] sm:$0xff] %v5804_v52 }
  0x15   : > { %4727 = vmatmul.mubr.msk.f32.vlgmr.msra.gmra.mrb[0].mxu1 %vm377_vm2, %v5610_v10  ;;  %5238 = vmatpush3.bf16.msra.mxu0 %v5569_v4  ;;  %v5649_v17 = vld [vmem:[%s5594_s10 + $0x38] sm:$0xff]  ;;  %v5652_v18 = vld [vmem:[%s5594_s10 + $0x40] sm:$0xff]  ;;  %v5659_v19 = vld [vmem:[%s5594_s10 + $0x48] sm:$0xff]  ;;  %7080 = vst [vmem:[#allocation16_spill] sm:$0xff] %v5807_v54 }
  0x16   : > { %4729 = vmatprep.mubr.msk.f32.mxu1 %vm377_vm2, %v5613_v11  ;;  %4791 = vmatpush3.msk.msra.mxu1 %vm426_vm0, %v5553_v1  ;;  %v5662_v20 = vld [vmem:[%s5594_s10 + $0x50] sm:$0xff]  ;;  %v5669_v21 = vld [vmem:[%s5594_s10 + $0x58] sm:$0xff]  ;;  %v5672_v22 = vld [vmem:[%s5594_s10 + $0x60] sm:$0xff]  ;;  %7081 = vst [vmem:[#allocation17_spill] sm:$0xff] %v5813_v58 }
  0x17   : > { %5240 = vmatprep.subr.bf16.mxu0 %v5615_v12  ;;  %v5679_v23 = vld [vmem:[%s5594_s10 + $0x68] sm:$0xff]  ;;  %v5682_v24 = vld [vmem:[%s5594_s10 + $0x70] sm:$0xff]  ;;  %v5689_v25 = vld [vmem:[%s5594_s10 + $0x78] sm:$0xff]  ;;  %7082 = vst [vmem:[#allocation18_spill] sm:$0xff] %v5822_v42 }
  0x18   : > { %v5692_v26 = vld [vmem:[%s5594_s10 + $0x80] sm:$0xff]  ;;  %v5699_v27 = vld [vmem:[%s5594_s10 + $0x88] sm:$0xff]  ;;  %v5702_v28 = vld [vmem:[%s5594_s10 + $0x90] sm:$0xff] }
  0x19   : > { %4730 = vmatmul.mubr.msk.f32.gmra.mrb[2].mxu1 %vm377_vm2, %v5624_v13  ;;  %5242 = vmatpush3.bf16.msra.mxu0 %v5615_v12  ;;  %v5709_v29 = vld [vmem:[%s5594_s10 + $0x98] sm:$0xff]  ;;  %v5712_v30 = vld [vmem:[%s5594_s10 + $0xa0] sm:$0xff]  ;;  %v5719_v31 = vld [vmem:[%s5594_s10 + $0xa8] sm:$0xff] }
  0x1a   : > { %4732 = vmatprep.mubr.msk.f32.mxu1 %vm377_vm2, %v5629_v14  ;;  %v5722_v32 = vld [vmem:[%s5594_s10 + $0xb0] sm:$0xff]  ;;  %v5729_v33 = vld [vmem:[%s5594_s10 + $0xb8] sm:$0xff]  ;;  %v5732_v34 = vld [vmem:[%s5594_s10 + $0xc0] sm:$0xff]  ;;  %5244 = vmatprep.subr.bf16.mxu0 %v5779_v44 }
  0x1b   : > { %7068 = vst [vmem:[#allocation4_spill] sm:$0xff] %v5729_v33  ;;  %7069 = vst [vmem:[#allocation5_spill] sm:$0xff] %v5732_v34  ;;  %v5739_v35 = vld [vmem:[%s5594_s10 + $0xc8] sm:$0xff]  ;;  %v5742_v36 = vld [vmem:[%s5594_s10 + $0xd0] sm:$0xff] }
  0x1c   : > { %7070 = vst [vmem:[#allocation6_spill] sm:$0xff] %v5739_v35  ;;  %7071 = vst [vmem:[#allocation7_spill] sm:$0xff] %v5742_v36  ;;  %v5749_v37 = vld [vmem:[%s5594_s10 + $0xd8] sm:$0xff]  ;;  %v5752_v38 = vld [vmem:[%s5594_s10 + $0xe0] sm:$0xff] }
  0x1d   : > { %4733 = vmatmul.mubr.msk.f32.gmra.mrb[4].mxu1 %vm377_vm2, %v5638_v15  ;;  %7072 = vst [vmem:[#allocation8_spill] sm:$0xff] %v5749_v37  ;;  %7073 = vst [vmem:[#allocation9_spill] sm:$0xff] %v5752_v38  ;;  %v5759_v39 = vld [vmem:[%s5594_s10 + $0xe8] sm:$0xff]  ;;  %v5762_v40 = vld [vmem:[%s5594_s10 + $0xf0] sm:$0xff]  ;;  %5246 = vmatpush3.bf16.msra.mxu0 %v5779_v44 }
  0x1e   : > { %4735 = vmatprep.mubr.msk.f32.mxu1 %vm377_vm2, %v5641_v16  ;;  %7074 = vst [vmem:[#allocation10_spill] sm:$0xff] %v5759_v39  ;;  %7075 = vst [vmem:[#allocation11_spill] sm:$0xff] %v5762_v40  ;;  %v5769_v41 = vld [vmem:[%s5594_s10 + $0xf8] sm:$0xff]  ;;  %5248 = vmatprep.subr.bf16.mxu0 %v5789_v47 }
  0x1f   : > { %7076 = vst [vmem:[#allocation12_spill] sm:$0xff] %v5769_v41 }
  0x21   : > { %4736 = vmatmul.mubr.msk.f32.gmra.mrb[6].mxu1 %vm377_vm2, %v5649_v17  ;;  %5250 = vmatpush3.bf16.msra.mxu0 %v5789_v47 }
  0x22   : > { %4738 = vmatprep.mubr.msk.f32.mxu1 %vm377_vm2, %v5652_v18  ;;  %5252 = vmatprep.subr.bf16.mxu0 %v5569_v4 }
  0x25   : > { %4739 = vmatmul.mubr.msk.f32.gmra.mrb[8].mxu1 %vm377_vm2, %v5659_v19 }
  0x26   : > { %4741 = vmatprep.mubr.msk.f32.mxu1 %vm377_vm2, %v5662_v20 }
  0x29   : > { %4742 = vmatmul.mubr.msk.f32.gmra.mrb[10].mxu1 %vm377_vm2, %v5669_v21 }
  0x2a   : > { %4744 = vmatprep.mubr.msk.f32.mxu1 %vm377_vm2, %v5672_v22 }
  0x2d   : > { %4745 = vmatmul.mubr.msk.f32.gmra.mrb[12].mxu1 %vm377_vm2, %v5679_v23 }
  0x2e   : > { %4747 = vmatprep.mubr.msk.f32.mxu1 %vm377_vm2, %v5682_v24 }
  0x31   : > { %4748 = vmatmul.mubr.msk.f32.gmra.mrb[14].mxu1 %vm377_vm2, %v5689_v25 }
  0x32   : > { %4792 = vmatprep.mubr.msk.f32.mxu1 %vm377_vm2, %v5692_v26 }
  0x35   : > { %4793 = vmatmul.mubr.msk.f32.vlgmr.msra.gmra.mrb[16].mxu1 %vm377_vm2, %v5699_v27 }
  0x36   : > { %4795 = vmatprep.mubr.msk.f32.mxu1 %vm377_vm2, %v5702_v28 }
  0x39   : > { %4796 = vmatmul.mubr.msk.f32.gmra.mrb[18].mxu1 %vm377_vm2, %v5709_v29 }
  0x3a   : > { %4798 = vmatprep.mubr.msk.f32.mxu1 %vm377_vm2, %v5712_v30 }
  0x3d   : > { %4799 = vmatmul.mubr.msk.f32.gmra.mrb[20].mxu1 %vm377_vm2, %v5719_v31 }
  0x3e   : > { %4801 = vmatprep.mubr.msk.f32.mxu1 %vm377_vm2, %v5722_v32 }
  0x41   : > { %4802 = vmatmul.mubr.msk.f32.gmra.mrb[22].mxu1 %vm377_vm2, %v5729_v33  ;;  %v6121_v33 = vld [vmem:[%s5966_s27 + $0xb8] sm:$0xff] }
  0x42   : > { %4804 = vmatprep.mubr.msk.f32.mxu1 %vm377_vm2, %v5732_v34 }
  0x45   : > { %4805 = vmatmul.mubr.msk.f32.gmra.mrb[24].mxu1 %vm377_vm2, %v5739_v35 }
  0x46   : > { %4807 = vmatprep.mubr.msk.f32.mxu1 %vm377_vm2, %v5742_v36 }
  0x49   : > { %4808 = vmatmul.mubr.msk.f32.gmra.mrb[26].mxu1 %vm377_vm2, %v5749_v37  ;;  %v6029_v37 = vld [vmem:[%s5966_s27 + $0x38] sm:$0xff] }
  0x4a   : > { %4810 = vmatprep.mubr.msk.f32.mxu1 %vm377_vm2, %v5752_v38  ;;  %7104 = vst [vmem:[#allocation40_spill] sm:$0xff] %v6029_v37 }
  0x4d   : > { %4811 = vmatmul.mubr.msk.f32.gmra.mrb[28].mxu1 %vm377_vm2, %v5759_v39 }
  0x4e   : > { %4813 = vmatprep.mubr.msk.f32.mxu1 %vm377_vm2, %v5762_v40 }
  0x51   : > { %4814 = vmatmul.mubr.msk.f32.gmra.mrb[30].mxu1 %vm377_vm2, %v5769_v41 }
  0xe7   : > { %v5801_v51 = vpop.f32.mrb[0].mxu0 }
  0xe8   : > { %v4728_v53 = vpop.f32.mrb[0].mxu1  ;;  %v319_v55 = vpop.f32.mrb[1].mxu0 }
  0xe9   : > { %v496_v56 = vpop.f32.mrb[1].mxu1  ;;  %v5810_v57 = vadd.f32 %v5799_v50, %v319_v55 }
  0xeb   : > { %v331_v59 = vrot.slane %v5810_v57, %v5804_v52  ;;  %v335_v60 = vrot.slane %v5810_v57, %v5807_v54  ;;  %v339_v6 = vrot.slane %v5810_v57, %v5813_v58 }
  0xec   : > { %v4731_v61 = vpop.f32.mrb[2].mxu1 }
  0xed   : > { %v506_v62 = vpop.f32.mrb[3].mxu1  ;;  %v502_v63 = vadd.f32 %v4728_v53, %v331_v59  ;;  %v497_v2 = vadd.f32 %v496_v56, %v331_v59  ;;  %v512_v3 = vadd.f32 %v4731_v61, %v335_v60  ;;  %v343_v53 = vrot.slane %v5810_v57, %v5822_v42 }
  0xee   : > { %v507_v5 = vadd.f32 %v506_v62, %v335_v60  ;;  %v5829_v56 = vsub.s32 4, %v5794_v49 }
  0xef   : > { %v576_v43 = vmax.f32 %v502_v63, 0.0  ;;  %v575_v45 = vmax.f32 %v497_v2, 0.0  ;;  %v578_v60 = vmax.f32 %v512_v3, 0.0 }
  0xf0   : > { %v4734_v46 = vpop.f32.mrb[4].mxu1  ;;  %v577_v41 = vmax.f32 %v507_v5, 0.0  ;;  %7083 = vst [vmem:[#allocation19_spill] sm:$0xff] %v5829_v56  ;;  %v347_v5 = vrot.slane %v5810_v57, %v5829_v56 }
  0xf1   : > { %v522_v48 = vadd.f32 %v4734_v46, %v339_v6  ;;  %v516_v55 = vpop.f32.mrb[5].mxu1  ;;  %4766 = vmatprep.mubr.msk.f32.mxu0 %vm604_vm3, %v575_v45 }
  0xf2   : > { %v517_v40 = vadd.f32 %v516_v55, %v339_v6  ;;  %4767 = vmatmul.mubr.msk.f32.vlgmr.msra.gmra.mrb[2].mxu0 %vm604_vm3, %v576_v43  ;;  %v5838_v6 = vsub.s32 5, %v5794_v49 }
  0xf3   : > { %5254 = vmatpush3.bf16.msra.mxu0 %v5569_v4  ;;  %4769 = vmatprep.mubr.msk.f32.mxu0 %vm604_vm3, %v577_v41  ;;  %v580_v41 = vmax.f32 %v522_v48, 0.0 }
  0xf4   : > { %v4737_v59 = vpop.f32.mrb[6].mxu1  ;;  %5256 = vmatprep.subr.bf16.mxu0 %v5615_v12  ;;  %v579_v63 = vmax.f32 %v517_v40, 0.0  ;;  %7084 = vst [vmem:[#allocation20_spill] sm:$0xff] %v5838_v6  ;;  %v351_v55 = vrot.slane %v5810_v57, %v5838_v6 }
  0xf5   : > { %v532_v61 = vadd.f32 %v4737_v59, %v343_v53  ;;  %v526_v62 = vpop.f32.mrb[7].mxu1 }
  0xf6   : > { %v527_v2 = vadd.f32 %v526_v62, %v343_v53  ;;  %4770 = vmatmul.mubr.msk.f32.gmra.mrb[4].mxu0 %vm604_vm3, %v578_v60  ;;  %v5847_v53 = vsub.s32 6, %v5794_v49 }
  0xf7   : > { %4772 = vmatprep.mubr.msk.f32.mxu0 %vm604_vm3, %v579_v63  ;;  %5258 = vmatpush3.bf16.msra.mxu0 %v5615_v12  ;;  %v582_v48 = vmax.f32 %v532_v61, 0.0 }
  0xf8   : > { %v4740_v43 = vpop.f32.mrb[8].mxu1  ;;  %5260 = vmatprep.subr.bf16.mxu0 %v5779_v44  ;;  %v581_v40 = vmax.f32 %v527_v2, 0.0  ;;  %7085 = vst [vmem:[#allocation21_spill] sm:$0xff] %v5847_v53 }
  0xf9   : > { %v542_v3 = vadd.f32 %v4740_v43, %v347_v5  ;;  %v536_v45 = vpop.f32.mrb[9].mxu1  ;;  %v5856_v43 = vsub.s32 7, %v5794_v49 }
  0xfa   : > { %v537_v46 = vadd.f32 %v536_v45, %v347_v5  ;;  %4773 = vmatmul.mubr.msk.f32.gmra.mrb[6].mxu0 %vm604_vm3, %v580_v41  ;;  %v355_v5 = vrot.slane %v5810_v57, %v5847_v53 }
  0xfb   : > { %4775 = vmatprep.mubr.msk.f32.mxu0 %vm604_vm3, %v581_v40  ;;  %5262 = vmatpush3.bf16.msra.mxu0 %v5779_v44  ;;  %7086 = vst [vmem:[#allocation22_spill] sm:$0xff] %v5856_v43  ;;  %v584_v61 = vmax.f32 %v542_v3, 0.0  ;;  %v359_v49 = vrot.slane %v5810_v57, %v5856_v43  ;;  %v5986_v44 = vld [vmem:[%s5966_s27 + $0x18] sm:$0xff] }
  0xfc   : > { %v4743_v59 = vpop.f32.mrb[10].mxu1  ;;  %5264 = vmatprep.subr.bf16.mxu0 %v5789_v47  ;;  %v583_v63 = vmax.f32 %v537_v46, 0.0  ;;  %7096 = vst [vmem:[#allocation32_spill] sm:$0xff] %v5986_v44 }
  0xfd   : > { %v552_v60 = vadd.f32 %v4743_v59, %v351_v55  ;;  %v546_v62 = vpop.f32.mrb[11].mxu1  ;;  %v5863_v59 = vadd.f32 %v5801_v51, %v5799_v50 }
  0xfe   : > { %v547_v2 = vadd.f32 %v546_v62, %v351_v55  ;;  %4776 = vmatmul.mubr.msk.f32.gmra.mrb[8].mxu0 %vm604_vm3, %v582_v48 }
  0xff   : > { %4778 = vmatprep.mubr.msk.f32.mxu0 %vm604_vm3, %v583_v63  ;;  %5266 = vmatpush3.bf16.msra.mxu0 %v5789_v47  ;;  %v586_v62 = vmax.f32 %v552_v60, 0.0  ;;  %v867_v60 = vrot.slane %v5863_v59, %v5807_v54 }
 0x100   : > { %v4746_v41 = vpop.f32.mrb[12].mxu1  ;;  %4891 = vmatprep.subr.mxu0 %v5548_v0  ;;  %v585_v46 = vmax.f32 %v547_v2, 0.0  ;;  %v863_v2 = vrot.slane %v5863_v59, %v5804_v52  ;;  %v5979_v52 = vld [vmem:[%s5966_s27] sm:$0xff] }
 0x101   : > { %v562_v45 = vadd.f32 %v4746_v41, %v355_v5  ;;  %v556_v40 = vpop.f32.mrb[13].mxu1  ;;  %7094 = vst [vmem:[#allocation30_spill] sm:$0xff] %v5979_v52 }
 0x102   : > { %v557_v55 = vadd.f32 %v556_v40, %v355_v5  ;;  %4779 = vmatmul.mubr.msk.f32.gmra.mrb[10].mxu0 %vm604_vm3, %v584_v61 }
 0x103   : > { %4781 = vmatprep.mubr.msk.f32.mxu0 %vm604_vm3, %v585_v46  ;;  %v588_v51 = vmax.f32 %v562_v45, 0.0  ;;  %v871_v45 = vrot.slane %v5863_v59, %v5813_v58  ;;  %v5975_v58 = vld [vmem:[%s5966_s27 + $0x48] sm:$0xff] }
 0x104   : > { %v4749_v48 = vpop.f32.mrb[14].mxu1  ;;  %v587_v41 = vmax.f32 %v557_v55, 0.0  ;;  %7093 = vst [vmem:[#allocation29_spill] sm:$0xff] %v5975_v58 }
 0x105   : > { %v572_v3 = vadd.f32 %v4749_v48, %v359_v49  ;;  %v566_v63 = vpop.f32.mrb[15].mxu1 }
 0x106   : > { %v567_v47 = vadd.f32 %v566_v63, %v359_v49  ;;  %4782 = vmatmul.mubr.msk.f32.gmra.mrb[12].mxu0 %vm604_vm3, %v586_v62 }
 0x107   : > { %4784 = vmatprep.mubr.msk.f32.mxu0 %vm604_vm3, %v587_v41  ;;  %v590_v55 = vmax.f32 %v572_v3, 0.0  ;;  %v875_v3 = vrot.slane %v5863_v59, %v5822_v42 }
 0x108   : > { %v4794_v50 = vpop.f32.mrb[16].mxu1  ;;  %v589_v57 = vmax.f32 %v567_v47, 0.0 }
 0x109   : > { %v1028_v5 = vadd.f32 %v4794_v50, %v863_v2  ;;  %v1022_v61 = vpop.f32.mrb[17].mxu1 }
 0x10a   : > { %v1023_v40 = vadd.f32 %v1022_v61, %v863_v2  ;;  %4785 = vmatmul.mubr.msk.f32.gmra.mrb[14].mxu0 %vm604_vm3, %v588_v51 }
 0x10b   : > { %4787 = vmatprep.mubr.msk.f32.mxu0 %vm604_vm3, %v589_v57  ;;  %v1102_v41 = vmax.f32 %v1028_v5, 0.0 }
 0x10c   : > { %v4797_v46 = vpop.f32.mrb[18].mxu1  ;;  %v1101_v62 = vmax.f32 %v1023_v40, 0.0 }
 0x10d   : > { %v1038_v49 = vadd.f32 %v4797_v46, %v867_v60  ;;  %v1032_v48 = vpop.f32.mrb[19].mxu1 }
 0x10e   : > { %v1033_v63 = vadd.f32 %v1032_v48, %v867_v60  ;;  %4788 = vmatmul.mubr.msk.f32.gmra.mrb[16].mxu0 %vm604_vm3, %v590_v55  ;;  %v879_v48 = vrot.slane %v5863_v59, %v5829_v56  ;;  %v5972_v56 = vld [vmem:[%s5966_s27 + $0x8] sm:$0xff] }
 0x10f   : > { %4832 = vmatprep.mubr.msk.f32.mxu0 %vm604_vm3, %v1101_v62  ;;  %v1104_v40 = vmax.f32 %v1038_v49, 0.0  ;;  %v883_v49 = vrot.slane %v5863_v59, %v5838_v6  ;;  %7092 = vst [vmem:[#allocation28_spill] sm:$0xff] %v5972_v56 }
 0x110   : > { %v4800_v47 = vpop.f32.mrb[20].mxu1  ;;  %v1103_v51 = vmax.f32 %v1033_v63, 0.0 }
 0x111   : > { %v1048_v2 = vadd.f32 %v4800_v47, %v871_v45  ;;  %v1042_v50 = vpop.f32.mrb[21].mxu1 }
 0x112   : > { %v1043_v61 = vadd.f32 %v1042_v50, %v871_v45  ;;  %4833 = vmatmul.mubr.msk.f32.vlgmr.msra.gmra.mrb[18].mxu0 %vm604_vm3, %v1102_v41 }
 0x113   : > { %4835 = vmatprep.mubr.msk.f32.mxu0 %vm604_vm3, %v1103_v51  ;;  %4892 = vmatpush3.msra.mxu0 %v5548_v0  ;;  %v1106_v63 = vmax.f32 %v1048_v2, 0.0  ;;  %v887_v2 = vrot.slane %v5863_v59, %v5847_v53 }
 0x114   : > { %v4803_v57 = vpop.f32.mrb[22].mxu1  ;;  %5292 = vmatprep.subr.bf16.mxu0 %v5569_v4  ;;  %v1105_v5 = vmax.f32 %v1043_v61, 0.0 }
 0x115   : > { %v1058_v60 = vadd.f32 %v4803_v57, %v875_v3  ;;  %v1052_v46 = vpop.f32.mrb[23].mxu1 }
 0x116   : > { %v1053_v55 = vadd.f32 %v1052_v46, %v875_v3  ;;  %4836 = vmatmul.mubr.msk.f32.gmra.mrb[20].mxu0 %vm604_vm3, %v1104_v40 }
 0x117   : > { %4838 = vmatprep.mubr.msk.f32.mxu0 %vm604_vm3, %v1105_v5  ;;  %v1108_v51 = vmax.f32 %v1058_v60, 0.0  ;;  %v891_v60 = vrot.slane %v5863_v59, %v5856_v43  ;;  %v1375_v59 = vld [vmem:[%s6968_s3 + $0x60] sm:$0xff] }
 0x118   : > { %v4806_v62 = vpop.f32.mrb[24].mxu1  ;;  %v1107_v41 = vmax.f32 %v1053_v55, 0.0 }
 0x119   : > { %v1068_v45 = vadd.f32 %v4806_v62, %v879_v48  ;;  %v1062_v47 = vpop.f32.mrb[25].mxu1 }
 0x11a   : > { %v1063_v0 = vadd.f32 %v1062_v47, %v879_v48  ;;  %4839 = vmatmul.mubr.msk.f32.gmra.mrb[22].mxu0 %vm604_vm3, %v1106_v63 }
 0x11b   : > { %4841 = vmatprep.mubr.msk.f32.mxu0 %vm604_vm3, %v1107_v41  ;;  %v1110_v5 = vmax.f32 %v1068_v45, 0.0 }
 0x11c   : > { %v4809_v50 = vpop.f32.mrb[26].mxu1  ;;  %v1109_v57 = vmax.f32 %v1063_v0, 0.0 }
 0x11d   : > { %v1078_v61 = vadd.f32 %v4809_v50, %v883_v49  ;;  %v1072_v3 = vpop.f32.mrb[27].mxu1 }
 0x11e   : > { %v1073_v40 = vadd.f32 %v1072_v3, %v883_v49  ;;  %4842 = vmatmul.mubr.msk.f32.gmra.mrb[24].mxu0 %vm604_vm3, %v1108_v51 }
 0x11f   : > { %4844 = vmatprep.mubr.msk.f32.mxu0 %vm604_vm3, %v1109_v57  ;;  %v1112_v41 = vmax.f32 %v1078_v61, 0.0  ;;  %v1376_v61 = vld [vmem:[%s6968_s3 + $0x68] sm:$0xff] }
 0x120   : > { %v4812_v46 = vpop.f32.mrb[28].mxu1  ;;  %v1111_v62 = vmax.f32 %v1073_v40, 0.0  ;;  %v5914_v40 = vpack.c.bf16 %v1376_v61, %v1375_v59 }
 0x121   : > { %v1088_v55 = vadd.f32 %v4812_v46, %v887_v2  ;;  %v1082_v48 = vpop.f32.mrb[29].mxu1  ;;  %v1378_v46 = vld [vmem:[%s6968_s3 + $0x78] sm:$0xff] }
 0x122   : > { %v1083_v63 = vadd.f32 %v1082_v48, %v887_v2  ;;  %4845 = vmatmul.mubr.msk.f32.gmra.mrb[26].mxu0 %vm604_vm3, %v1110_v5  ;;  %7087 = vst [vmem:[#allocation23_spill] sm:$0xff] %v5914_v40  ;;  %5268 = vmatprep.subr.bf16.mxu1 %v5914_v40  ;;  %v1377_v2 = vld [vmem:[%s6968_s3 + $0x70] sm:$0xff]  ;;  %v1380_v48 = vld [vmem:[%s6968_s3 + $0x88] sm:$0xff] }
 0x123   : > { %4847 = vmatprep.mubr.msk.f32.mxu0 %vm604_vm3, %v1111_v62  ;;  %v1114_v45 = vmax.f32 %v1088_v55, 0.0  ;;  %5270 = vmatpush3.bf16.msra.mxu1 %v5914_v40  ;;  %v5924_v5 = vpack.c.bf16 %v1378_v46, %v1377_v2  ;;  %v1379_v55 = vld [vmem:[%s6968_s3 + $0x80] sm:$0xff] }
 0x124   : > { %v4815_v47 = vpop.f32.mrb[30].mxu1  ;;  %v1113_v50 = vmax.f32 %v1083_v63, 0.0  ;;  %v5934_v62 = vpack.c.bf16 %v1380_v48, %v1379_v55  ;;  %v1381_v63 = vld [vmem:[%s6968_s3 + $0x90] sm:$0xff] }
 0x125   : > { %v1098_v0 = vadd.f32 %v4815_v47, %v891_v60  ;;  %v1092_v49 = vpop.f32.mrb[31].mxu1  ;;  %7088 = vst [vmem:[#allocation24_spill] sm:$0xff] %v5924_v5  ;;  %5272 = vmatprep.subr.bf16.mxu1 %v5924_v5 }
 0x126   : > { %v1093_v51 = vadd.f32 %v1092_v49, %v891_v60  ;;  %4848 = vmatmul.mubr.msk.f32.gmra.mrb[28].mxu0 %vm604_vm3, %v1112_v41  ;;  %7089 = vst [vmem:[#allocation25_spill] sm:$0xff] %v5934_v62  ;;  %v1382_v60 = vld [vmem:[%s6968_s3 + $0x98] sm:$0xff] }
 0x127   : > { %4850 = vmatprep.mubr.msk.f32.mxu0 %vm604_vm3, %v1113_v50  ;;  %v1116_v57 = vmax.f32 %v1098_v0, 0.0  ;;  %5274 = vmatpush3.bf16.msra.mxu1 %v5924_v5  ;;  %v5944_v47 = vpack.c.bf16 %v1382_v60, %v1381_v63  ;;  %v5950_v41 = vld [vmem:[%s6968_s3 + $0x58] sm:$0xff] }
 0x128   : > { %v1115_v3 = vmax.f32 %v1093_v51, 0.0  ;;  %5276 = vmatprep.subr.bf16.mxu1 %v5934_v62 }
 0x129   : > { %7090 = vst [vmem:[#allocation26_spill] sm:$0xff] %v5944_v47 }
 0x12a   : > { %4851 = vmatmul.mubr.msk.f32.gmra.mrb[30].mxu0 %vm604_vm3, %v1114_v45 }
 0x12b   : > { %4853 = vmatprep.mubr.msk.f32.mxu0 %vm604_vm3, %v1115_v3  ;;  %5278 = vmatpush3.bf16.msra.mxu1 %v5934_v62 }
 0x12c   : > { %5280 = vmatprep.subr.bf16.mxu1 %v5944_v47 }
 0x12e   : > { %4854 = vmatmul.mubr.msk.f32.gmra.mrb[32].mxu0 %vm604_vm3, %v1116_v57  ;;  %v5957_v57 = vld [vmem:[%s6968_s3 + $0x11] ss:$0 sm:$0xff] }
 0x12f   : > { %5282 = vmatpush3.bf16.msra.mxu1 %v5944_v47  ;;  %7091 = vst [vmem:[#allocation27_spill] sm:$0xff] %v5957_v57 }
 0x130   : > { %4875 = vmatprep.subr.mxu1 %v5950_v41 }
 0x1c5   : > { %v4768_v0 = vpop.f32.mrb[2].mxu0 }
 0x1c6   : > { %v719_v49 = vpop.f32.mrb[3].mxu0  ;;  %v725_v61 = vadd.f32 %v4768_v0, %v5957_v57 }
 0x1c7   : > { %v720_v46 = vadd.f32 %v5957_v57, %v719_v49 }
 0x1c8   : > { %v799_v60 = vmax.f32 %v725_v61, 0.0 }
 0x1c9   : > { %v4771_v50 = vpop.f32.mrb[4].mxu0  ;;  %v798_v42 = vmax.f32 %v720_v46, 0.0  ;;  %v5989_v46 = vld [vmem:[%s5966_s27 + $0x10] sm:$0xff] }
 0x1ca   : > { %v729_v51 = vpop.f32.mrb[5].mxu0  ;;  %v735_v55 = vadd.f32 %v4771_v50, %v5957_v57  ;;  %v5982_v50 = vld [vmem:[%s5966_s27 + $0x40] sm:$0xff]  ;;  %7097 = vst [vmem:[#allocation33_spill] sm:$0xff] %v5989_v46 }
 0x1cb   : > { %v730_v48 = vadd.f32 %v5957_v57, %v729_v51  ;;  %7095 = vst [vmem:[#allocation31_spill] sm:$0xff] %v5982_v50  ;;  %v830_v39 = vmul.f32 %v5979_v52, %v798_v42 }
 0x1cc   : > { %v801_v51 = vmax.f32 %v735_v55, 0.0 }
 0x1cd   : > { %v4774_v45 = vpop.f32.mrb[6].mxu0  ;;  %v800_v53 = vmax.f32 %v730_v48, 0.0  ;;  %v5998_v48 = vld [vmem:[%s5966_s27 + $0x58] sm:$0xff] }
 0x1ce   : > { %v739_v3 = vpop.f32.mrb[7].mxu0  ;;  %v745_v12 = vadd.f32 %v4774_v45, %v5957_v57  ;;  %7098 = vst [vmem:[#allocation34_spill] sm:$0xff] %v5998_v48  ;;  %v6002_v45 = vld [vmem:[%s5966_s27 + $0x50] sm:$0xff] }
 0x1cf   : > { %v740_v55 = vadd.f32 %v5957_v57, %v739_v3  ;;  %7099 = vst [vmem:[#allocation35_spill] sm:$0xff] %v6002_v45 }
 0x1d1   : > { %v4777_v59 = vpop.f32.mrb[8].mxu0 }
 0x1d2   : > { %v749_v2 = vpop.f32.mrb[9].mxu0 }
 0x1d5   : > { %v4780_v63 = vpop.f32.mrb[10].mxu0 }
 0x1d6   : > { %v765_v0 = vadd.f32 %v4780_v63, %v5957_v57  ;;  %v759_v49 = vpop.f32.mrb[11].mxu0  ;;  %v831_v63 = vmul.f32 %v5972_v56, %v799_v60 }
 0x1d7   : > { %v760_v54 = vadd.f32 %v5957_v57, %v759_v49 }
 0x1d8   : > { %v807_v43 = vmax.f32 %v765_v0, 0.0 }
 0x1d9   : > { %v806_v61 = vmax.f32 %v760_v54, 0.0  ;;  %v4783_v6 = vpop.f32.mrb[12].mxu0 }
 0x1da   : > { %v839_v49 = vmul.f32 %v5975_v58, %v807_v43  ;;  %v775_v0 = vadd.f32 %v4783_v6, %v5957_v57  ;;  %v769_v4 = vpop.f32.mrb[13].mxu0  ;;  %v833_v43 = vmul.f32 %v5986_v44, %v801_v51  ;;  %v832_v6 = vmul.f32 %v5989_v46, %v800_v53 }
 0x1db   : > { %v838_v54 = vmul.f32 %v5982_v50, %v806_v61  ;;  %v770_v60 = vadd.f32 %v5957_v57, %v769_v4  ;;  %v803_v61 = vmax.f32 %v745_v12, 0.0  ;;  %v755_v50 = vadd.f32 %v4777_v59, %v5957_v57  ;;  %v6019_v12 = vld [vmem:[%s5966_s27 + $0x20] sm:$0xff] }
 0x1dc   : > { %v847_v56 = vmax.f32 %v831_v63, %v839_v49  ;;  %v809_v38 = vmax.f32 %v775_v0, 0.0  ;;  %v6010_v49 = vld [vmem:[%s5966_s27 + $0x28] sm:$0xff]  ;;  %v802_v0 = vmax.f32 %v740_v55, 0.0  ;;  %v750_v51 = vadd.f32 %v5957_v57, %v749_v2  ;;  %7102 = vst [vmem:[#allocation38_spill] sm:$0xff] %v6019_v12 }
 0x1dd   : > { %v846_v42 = vmax.f32 %v830_v39, %v838_v54  ;;  %v808_v52 = vmax.f32 %v770_v60, 0.0  ;;  %v4786_v3 = vpop.f32.mrb[14].mxu0  ;;  %7100 = vst [vmem:[#allocation36_spill] sm:$0xff] %v6010_v49  ;;  %v6015_v39 = vld [vmem:[%s5966_s27 + $0x68] sm:$0xff]  ;;  %v6022_v54 = vld [vmem:[%s5966_s27 + $0x60] sm:$0xff]  ;;  %v835_v2 = vmul.f32 %v6010_v49, %v803_v61 }
 0x1de   : > { %v841_v58 = vmul.f32 %v5998_v48, %v809_v38  ;;  %v785_v4 = vadd.f32 %v4786_v3, %v5957_v57  ;;  %v779_v63 = vpop.f32.mrb[15].mxu0  ;;  %7101 = vst [vmem:[#allocation37_spill] sm:$0xff] %v6015_v39  ;;  %7103 = vst [vmem:[#allocation39_spill] sm:$0xff] %v6022_v54  ;;  %v834_v46 = vmul.f32 %v6019_v12, %v802_v0 }
 0x1df   : > { %v840_v44 = vmul.f32 %v6002_v45, %v808_v52  ;;  %v780_v53 = vadd.f32 %v5957_v57, %v779_v63  ;;  %v805_v52 = vmax.f32 %v755_v50, 0.0 }
 0x1e0   : > { %v849_v59 = vmax.f32 %v833_v43, %v841_v58  ;;  %v811_v38 = vmax.f32 %v785_v4, 0.0  ;;  %v804_v58 = vmax.f32 %v750_v51, 0.0  ;;  %v6033_v4 = vld [vmem:[%s5966_s27 + $0x78] sm:$0xff] }
 0x1e1   : > { %v848_v60 = vmax.f32 %v832_v6, %v840_v44  ;;  %v810_v3 = vmax.f32 %v780_v53, 0.0  ;;  %v4789_v55 = vpop.f32.mrb[16].mxu0  ;;  %7105 = vst [vmem:[#allocation41_spill] sm:$0xff] %v6033_v4  ;;  %v6037_v6 = vld [vmem:[%s5966_s27 + $0x30] sm:$0xff]  ;;  %v837_v0 = vmul.f32 %v6029_v37, %v805_v52  ;;  %v6071_v52 = vld [vmem:[%s5966_s27 + $0x80] sm:$0xff] }
 0x1e2   : > { %v843_v45 = vmul.f32 %v6015_v39, %v811_v38  ;;  %v795_v48 = vadd.f32 %v4789_v55, %v5957_v57  ;;  %v789_v63 = vpop.f32.mrb[17].mxu0  ;;  %7106 = vst [vmem:[#allocation42_spill] sm:$0xff] %v6037_v6  ;;  %v6040_v53 = vld [vmem:[%s5966_s27 + $0x70] sm:$0xff]  ;;  %7110 = vst [vmem:[#allocation46_spill] sm:$0xff] %v6071_v52 }
 0x1e3   : > { %v842_v43 = vmul.f32 %v6022_v54, %v810_v3  ;;  %v790_v44 = vadd.f32 %v5957_v57, %v789_v63  ;;  %7107 = vst [vmem:[#allocation43_spill] sm:$0xff] %v6040_v53  ;;  %v836_v54 = vmul.f32 %v6037_v6, %v804_v58  ;;  %v6078_v6 = vld [vmem:[%s5966_s27 + $0x98] sm:$0xff] }
 0x1e4   : > { %v851_v61 = vmax.f32 %v835_v2, %v843_v45  ;;  %v813_v50 = vmax.f32 %v795_v48, 0.0  ;;  %7112 = vst [vmem:[#allocation48_spill] sm:$0xff] %v6078_v6 }
 0x1e5   : > { %v850_v38 = vmax.f32 %v834_v46, %v842_v43  ;;  %v812_v55 = vmax.f32 %v790_v44, 0.0  ;;  %v4834_v39 = vpop.f32.mrb[18].mxu0 }
 0x1e6   : > { %v6043_v12 = vmax.f32 %v847_v56, %v851_v61  ;;  %v845_v51 = vmul.f32 %v6033_v4, %v813_v50  ;;  %v1231_v3 = vpop.f32.mrb[19].mxu0 }
 0x1e7   : > { %v6047_v49 = vmax.f32 %v846_v42, %v850_v38  ;;  %v844_v63 = vmul.f32 %v6040_v53, %v812_v55  ;;  %v1232_v61 = vadd.f32 %v5957_v57, %v1231_v3 }
 0x1e8   : > { %v853_v45 = vmax.f32 %v837_v0, %v845_v51 }
 0x1e9   : > { %v852_v48 = vmax.f32 %v836_v54, %v844_v63  ;;  %v4837_v2 = vpop.f32.mrb[20].mxu0  ;;  %v1237_v54 = vadd.f32 %v4834_v39, %v5957_v57  ;;  %v6064_v63 = vld [vmem:[%s5966_s27 + $0x88] sm:$0xff] }
 0x1ea   : > { %v6050_v36 = vmax.f32 %v849_v59, %v853_v45  ;;  %v1241_v46 = vpop.f32.mrb[21].mxu0  ;;  %7108 = vst [vmem:[#allocation44_spill] sm:$0xff] %v6064_v63  ;;  %v1310_v45 = vmax.f32 %v1232_v61, 0.0  ;;  %v6081_v61 = vld [vmem:[%s5966_s27 + $0x90] sm:$0xff] }
 0x1eb   : > { %v6052_v43 = vmax.f32 %v848_v60, %v852_v48  ;;  %v1247_v60 = vadd.f32 %v4837_v2, %v5957_v57  ;;  %v1242_v50 = vadd.f32 %v5957_v57, %v1241_v46  ;;  %v1311_v55 = vmax.f32 %v1237_v54, 0.0  ;;  %v6067_v48 = vld [vmem:[%s5966_s27 + $0xc8] sm:$0xff]  ;;  %v6074_v2 = vld [vmem:[%s5966_s27 + $0xc0] sm:$0xff]  ;;  %7113 = vst [vmem:[#allocation49_spill] sm:$0xff] %v6081_v61 }
 0x1ec   : > { %7109 = vst [vmem:[#allocation45_spill] sm:$0xff] %v6067_v48  ;;  %7111 = vst [vmem:[#allocation47_spill] sm:$0xff] %v6074_v2  ;;  %v1342_v35 = vmul.f32 %v6071_v52, %v1310_v45 }
 0x1ed   : > { %v4840_v42 = vpop.f32.mrb[22].mxu0  ;;  %v1313_v46 = vmax.f32 %v1247_v60, 0.0  ;;  %v1312_v56 = vmax.f32 %v1242_v50, 0.0 }
 0x1ee   : > { %v1251_v58 = vpop.f32.mrb[23].mxu0  ;;  %v1257_v4 = vadd.f32 %v4840_v42, %v5957_v57  ;;  %v6094_v42 = vld [vmem:[%s5966_s27 + $0xd0] sm:$0xff] }
 0x1ef   : > { %v1252_v60 = vadd.f32 %v5957_v57, %v1251_v58  ;;  %7115 = vst [vmem:[#allocation51_spill] sm:$0xff] %v6094_v42 }
 0x1f1   : > { %v4843_v44 = vpop.f32.mrb[24].mxu0 }
 0x1f2   : > { %v1261_v59 = vpop.f32.mrb[25].mxu0 }
 0x1f5   : > { %v4846_v38 = vpop.f32.mrb[26].mxu0 }
 0x1f6   : > { %v1277_v0 = vadd.f32 %v4846_v38, %v5957_v57  ;;  %v1271_v51 = vpop.f32.mrb[27].mxu0  ;;  %v1343_v38 = vmul.f32 %v6064_v63, %v1311_v55 }
 0x1f7   : > { %v1272_v39 = vadd.f32 %v5957_v57, %v1271_v51 }
 0x1f8   : > { %v1319_v3 = vmax.f32 %v1277_v0, 0.0 }
 0x1f9   : > { %v1318_v54 = vmax.f32 %v1272_v39, 0.0  ;;  %v4849_v53 = vpop.f32.mrb[28].mxu0  ;;  %v6090_v39 = vld [vmem:[%s5966_s27 + $0xd8] sm:$0xff] }
 0x1fa   : > { %v1351_v51 = vmul.f32 %v6067_v48, %v1319_v3  ;;  %v1287_v0 = vadd.f32 %v4849_v53, %v5957_v57  ;;  %v1281_v37 = vpop.f32.mrb[29].mxu0  ;;  %7114 = vst [vmem:[#allocation50_spill] sm:$0xff] %v6090_v39  ;;  %v1345_v3 = vmul.f32 %v6078_v6, %v1313_v46  ;;  %v1344_v53 = vmul.f32 %v6081_v61, %v1312_v56 }
 0x1fb   : > { %v1350_v50 = vmul.f32 %v6074_v2, %v1318_v54  ;;  %v1282_v55 = vadd.f32 %v5957_v57, %v1281_v37  ;;  %v1315_v54 = vmax.f32 %v1257_v4, 0.0  ;;  %v1267_v2 = vadd.f32 %v4843_v44, %v5957_v57  ;;  %v6111_v4 = vld [vmem:[%s5966_s27 + $0xa0] sm:$0xff] }
 0x1fc   : > { %v1359_v63 = vmax.f32 %v1343_v38, %v1351_v51  ;;  %v1321_v34 = vmax.f32 %v1287_v0, 0.0  ;;  %v6102_v51 = vld [vmem:[%s5966_s27 + $0xa8] sm:$0xff]  ;;  %v1314_v0 = vmax.f32 %v1252_v60, 0.0  ;;  %v1262_v46 = vadd.f32 %v5957_v57, %v1261_v59  ;;  %7118 = vst [vmem:[#allocation54_spill] sm:$0xff] %v6111_v4 }
 0x1fd   : > { %v1358_v45 = vmax.f32 %v1342_v35, %v1350_v50  ;;  %v1320_v52 = vmax.f32 %v1282_v55, 0.0  ;;  %v4852_v58 = vpop.f32.mrb[30].mxu0  ;;  %7116 = vst [vmem:[#allocation52_spill] sm:$0xff] %v6102_v51  ;;  %v6107_v35 = vld [vmem:[%s5966_s27 + $0xe8] sm:$0xff]  ;;  %v6114_v50 = vld [vmem:[%s5966_s27 + $0xe0] sm:$0xff]  ;;  %v1347_v59 = vmul.f32 %v6102_v51, %v1315_v54 }
 0x1fe   : > { %v1353_v48 = vmul.f32 %v6090_v39, %v1321_v34  ;;  %v1297_v37 = vadd.f32 %v4852_v58, %v5957_v57  ;;  %v1291_v38 = vpop.f32.mrb[31].mxu0  ;;  %7117 = vst [vmem:[#allocation53_spill] sm:$0xff] %v6107_v35  ;;  %7119 = vst [vmem:[#allocation55_spill] sm:$0xff] %v6114_v50  ;;  %v1346_v61 = vmul.f32 %v6111_v4, %v1314_v0 }
 0x1ff   : > { %v1352_v6 = vmul.f32 %v6094_v42, %v1320_v52  ;;  %v1292_v56 = vadd.f32 %v5957_v57, %v1291_v38  ;;  %v1317_v52 = vmax.f32 %v1267_v2, 0.0 }
 0x200   : > { %v1361_v44 = vmax.f32 %v1345_v3, %v1353_v48  ;;  %v1323_v34 = vmax.f32 %v1297_v37, 0.0  ;;  %v1316_v48 = vmax.f32 %v1262_v46, 0.0  ;;  %v6125_v37 = vld [vmem:[%s5966_s27 + $0xf8] sm:$0xff] }
 0x201   : > { %v1360_v55 = vmax.f32 %v1344_v53, %v1352_v6  ;;  %v1322_v58 = vmax.f32 %v1292_v56, 0.0  ;;  %v4855_v60 = vpop.f32.mrb[32].mxu0  ;;  %v6129_v53 = vld [vmem:[%s5966_s27 + $0xb0] sm:$0xff] }
 0x202   : > { %v1355_v42 = vmul.f32 %v6107_v35, %v1323_v34  ;;  %v1307_v39 = vadd.f32 %v4855_v60, %v5957_v57  ;;  %v1301_v38 = vpop.f32.mrb[33].mxu0  ;;  %7120 = vst [vmem:[#allocation56_spill] sm:$0xff] %v6129_v53  ;;  %v6132_v56 = vld [vmem:[%s5966_s27 + $0xf0] sm:$0xff]  ;;  %v1349_v35 = vmul.f32 %v6121_v33, %v1317_v52  ;;  %v1348_v46 = vmul.f32 %v6129_v53, %v1316_v48 }
 0x203   : > { %v1354_v3 = vmul.f32 %v6114_v50, %v1322_v58  ;;  %v1302_v6 = vadd.f32 %v5957_v57, %v1301_v38  ;;  %7121 = vst [vmem:[#allocation57_spill] sm:$0xff] %v6132_v56 }
 0x204   : > { %v1363_v54 = vmax.f32 %v1347_v59, %v1355_v42  ;;  %v1325_v2 = vmax.f32 %v1307_v39, 0.0  ;;  %v7122_v59 = vmax.f32 %v6043_v12, %v6050_v36  ;;  %v1550_v36 = vld [vmem:[%s6968_s3 + $0xb0] sm:$0xff] }
 0x205   : > { %v1362_v34 = vmax.f32 %v1346_v61, %v1354_v3  ;;  %v1324_v60 = vmax.f32 %v1302_v6, 0.0  ;;  %v1548_v61 = vld [vmem:[%s6968_s3 + $0xa0] sm:$0xff] }
 0x206   : > { %v1367_v0 = vmax.f32 %v1359_v63, %v1363_v54  ;;  %v1357_v4 = vmul.f32 %v6125_v37, %v1325_v2  ;;  %v1549_v63 = vld [vmem:[%s6968_s3 + $0xa8] sm:$0xff] }
 0x207   : > { %v1366_v58 = vmax.f32 %v1358_v45, %v1362_v34  ;;  %v1356_v50 = vmul.f32 %v6132_v56, %v1324_v60 }
 0x208   : > { %v1365_v51 = vmax.f32 %v1349_v35, %v1357_v4  ;;  %v7123_v35 = vmax.f32 %v6047_v49, %v6052_v43 }
 0x209   : > { %v1364_v38 = vmax.f32 %v1348_v46, %v1356_v50 }
 0x20a   : > { %v1369_v57 = vmax.f32 %v1361_v44, %v1365_v51  ;;  %v6150_v51 = vpack.c.bf16 %v1549_v63, %v1548_v61 }
 0x20b   : > { %v1368_v47 = vmax.f32 %v1360_v55, %v1364_v38 }
 0x20c   : > { %v1371_v42 = vmax.f32 %v1367_v0, %v1369_v57  ;;  %7124 = vst [vmem:[#allocation58_spill] sm:$0xff] %v6150_v51 }
 0x20d   : > { %v1370_v39 = vmax.f32 %v1366_v58, %v1368_v47  ;;  %v1551_v47 = vld [vmem:[%s6968_s3 + $0xb8] sm:$0xff] }
 0x20e   : > { %v1373_v45 = vmax.f32 %v7122_v59, %v1371_v42  ;;  %v6167_v57 = vpack.c.bf16 %v1551_v47, %v1550_v36 }
 0x20f   : > { %v1372_v4 = vmax.f32 %v7123_v35, %v1370_v39 }
 0x210   : > { %7125 = vst [vmem:[#allocation59_spill] sm:$0xff] %v6167_v57 }
 0x211   : > { %4872 = vmatprep.mubr.msk.f32.mxu1 %vm604_vm3, %v1372_v4 }
 0x212   : > { %4873 = vmatmul.mubr.msk.f32.vlgmr.msra.gmra.mrb[32].mxu1 %vm604_vm3, %v1373_v45 }
 0x213   : > { %4876 = vmatpush3.msra.mxu1 %v5950_v41  ;;  %4877 = vmatprep.mubr.msk.f32.mxu1 %vm246_vm1, %v5597_v7  ;;  %v6176_v7 = vld [vmem:[%s6968_s3 + $0x12] ss:$0 sm:$0xff] }
 0x214   : > { %5284 = vmatprep.subr.bf16.mxu1 %v6150_v51  ;;  %7126 = vst [vmem:[#allocation60_spill] sm:$0xff] %v6176_v7 }
 0x21a   : > { %4878 = vmatmul.mubr.msk.f32.vlgmr.msra.gmra.mrb[32].mxu1 %vm246_vm1, %v5603_v9 }
 0x21b   : > { %5286 = vmatpush3.bf16.msra.mxu1 %v6150_v51 }
 0x21c   : > { %5288 = vmatprep.subr.bf16.mxu1 %v6167_v57 }
 0x21f   : > { %5290 = vmatpush3.bf16.msra.mxu1 %v6167_v57 }
 0x220   : > { %4896 = vmatprep.subr.msk.mxu1 %vm426_vm0, %v5553_v1  ;;  %v6185_v1 = vld [vmem:[%s6968_s3 + $0x8] sm:$0xf] }
 0x221   : > { %7127 = vst [vmem:[#allocation61_spill] sm:$0xff] %v6185_v1 }
 0x2ed   : > { %v4879_v9 = vpop.f32.mrb[32].mxu1 }
 0x2ee   : > { %v1545_v49 = vadd.f32 %v4879_v9, %v6176_v7  ;;  %v1530_v12 = vpop.f32.mrb[33].mxu1 }
 0x2ef   : > { %v1544_v43 = vadd.f32 %v6176_v7, %v1530_v12 }
 0x2f0   : > { %v1547_v50 = vmax.f32 %v1545_v49, 0.0 }
 0x2f1   : > { %v1546_v44 = vmax.f32 %v1544_v43, 0.0 }
 0x2f3   : > { %4888 = vmatprep.mubr.msk.f32.mxu1 %vm1557_vm4, %v1546_v44 }
 0x2f4   : > { %4889 = vmatmul.mubr.msk.f32.vlgmr.msra.gmra.mrb[34].mxu1 %vm1557_vm4, %v1547_v50 }
 0x2f5   : > { %4897 = vmatpush3.msk.msra.mxu1 %vm426_vm0, %v6185_v1  ;;  %4898 = vmatprep.mubr.msk.f32.mxu1 %vm377_vm2, %v5600_v8  ;;  %v7128_v8 = vld [vmem:[#allocation26_spill] sm:$0xff] }
 0x2f6   : > { %4962 = vmatprep.subr.msk.mxu1 %vm426_vm0, %v6185_v1 }
 0x2f8   : > { %4899 = vmatmul.mubr.msk.f32.vlgmr.msra.gmra.mrb[36].mxu1 %vm377_vm2, %v5610_v10  ;;  %v7129_v10 = vld [vmem:[#allocation4_spill] sm:$0xff] }
 0x2f9   : > { %4901 = vmatprep.mubr.msk.f32.mxu1 %vm377_vm2, %v5613_v11  ;;  %4963 = vmatpush3.msk.msra.mxu1 %vm426_vm0, %v6185_v1  ;;  %v7130_v11 = vld [vmem:[#allocation5_spill] sm:$0xff] }
 0x2fa   : > { %5324 = vmatprep.subr.bf16.mxu1 %v5914_v40 }
 0x2fc   : > { %4902 = vmatmul.mubr.msk.f32.gmra.mrb[38].mxu1 %vm377_vm2, %v5624_v13  ;;  %v7131_v13 = vld [vmem:[#allocation6_spill] sm:$0xff] }
 0x2fd   : > { %4904 = vmatprep.mubr.msk.f32.mxu1 %vm377_vm2, %v5629_v14  ;;  %v7132_v14 = vld [vmem:[#allocation7_spill] sm:$0xff] }
 0x300   : > { %4905 = vmatmul.mubr.msk.f32.gmra.mrb[40].mxu1 %vm377_vm2, %v5638_v15  ;;  %v7133_v15 = vld [vmem:[#allocation8_spill] sm:$0xff] }
 0x301   : > { %4907 = vmatprep.mubr.msk.f32.mxu1 %vm377_vm2, %v5641_v16  ;;  %v7134_v16 = vld [vmem:[#allocation9_spill] sm:$0xff] }
 0x304   : > { %4908 = vmatmul.mubr.msk.f32.gmra.mrb[42].mxu1 %vm377_vm2, %v5649_v17  ;;  %v7135_v17 = vld [vmem:[#allocation10_spill] sm:$0xff] }
 0x305   : > { %4910 = vmatprep.mubr.msk.f32.mxu1 %vm377_vm2, %v5652_v18  ;;  %v7136_v18 = vld [vmem:[#allocation11_spill] sm:$0xff] }
 0x308   : > { %4911 = vmatmul.mubr.msk.f32.gmra.mrb[44].mxu1 %vm377_vm2, %v5659_v19  ;;  %v7137_v19 = vld [vmem:[#allocation12_spill] sm:$0xff] }
 0x309   : > { %4913 = vmatprep.mubr.msk.f32.mxu1 %vm377_vm2, %v5662_v20  ;;  %v5431_v20 = vld [vmem:[%s5587_s7] sm:$0xff] }
 0x30a   : > { %1653 = vrot.lane.b32.xlu1 %v5431_v20, %s5511_s17 }
 0x30c   : > { %4914 = vmatmul.mubr.msk.f32.gmra.mrb[46].mxu1 %vm377_vm2, %v5669_v21  ;;  %v5432_v21 = vld [vmem:[%s5587_s7 + $0x8] sm:$0xff] }
 0x30d   : > { %4916 = vmatprep.mubr.msk.f32.mxu1 %vm377_vm2, %v5672_v22  ;;  %v6273_v22 = vld [vmem:[%s6968_s3 + $0x13] ss:$0 sm:$0xff] }
 0x30e   : > { %1655 = vrot.lane.b32.xlu1 %v5432_v21, %s5511_s17  ;;  %7138 = vst [vmem:[#allocation4_spill] sm:$0xff] %v6273_v22  ;;  %v7144_v21 = vld [vmem:[#allocation14_spill] sm:$0xff] }
 0x310   : > { %4917 = vmatmul.mubr.msk.f32.gmra.mrb[48].mxu1 %vm377_vm2, %v5679_v23 }
 0x311   : > { %4919 = vmatprep.mubr.msk.f32.mxu1 %vm377_vm2, %v5682_v24 }
 0x314   : > { %4920 = vmatmul.mubr.msk.f32.gmra.mrb[50].mxu1 %vm377_vm2, %v5689_v25 }
 0x315   : > { %4964 = vmatprep.mubr.msk.f32.mxu1 %vm377_vm2, %v5692_v26 }
 0x318   : > { %4965 = vmatmul.mubr.msk.f32.vlgmr.msra.gmra.mrb[52].mxu1 %vm377_vm2, %v5699_v27 }
 0x319   : > { %4967 = vmatprep.mubr.msk.f32.mxu1 %vm377_vm2, %v5702_v28  ;;  %5326 = vmatpush3.bf16.msra.mxu1 %v5914_v40 }
 0x31a   : > { %5328 = vmatprep.subr.bf16.mxu1 %v5924_v5 }
 0x31c   : > { %4968 = vmatmul.mubr.msk.f32.gmra.mrb[54].mxu1 %vm377_vm2, %v5709_v29 }
 0x31d   : > { %4970 = vmatprep.mubr.msk.f32.mxu1 %vm377_vm2, %v5712_v30  ;;  %5330 = vmatpush3.bf16.msra.mxu1 %v5924_v5 }
 0x31e   : > { %5332 = vmatprep.subr.bf16.mxu1 %v5934_v62 }
 0x320   : > { %4971 = vmatmul.mubr.msk.f32.gmra.mrb[56].mxu1 %vm377_vm2, %v5719_v31 }
 0x321   : > { %4973 = vmatprep.mubr.msk.f32.mxu1 %vm377_vm2, %v5722_v32  ;;  %5334 = vmatpush3.bf16.msra.mxu1 %v5934_v62  ;;  %v7151_v62 = vld [vmem:[#allocation17_spill] sm:$0xff] }
 0x322   : > { %5336 = vmatprep.subr.bf16.mxu1 %v7128_v8 }
 0x324   : > { %4974 = vmatmul.mubr.msk.f32.gmra.mrb[58].mxu1 %vm377_vm2, %v7129_v10  ;;  %v7141_v10 = vld [vmem:[#allocation2_spill] sm:$0xff] }
 0x325   : > { %4976 = vmatprep.mubr.msk.f32.mxu1 %vm377_vm2, %v7130_v11  ;;  %5338 = vmatpush3.bf16.msra.mxu1 %v7128_v8 }
 0x326   : > { %5047 = vmatprep.subr.mxu1 %v5950_v41 }
 0x328   : > { %4977 = vmatmul.mubr.msk.f32.gmra.mrb[60].mxu1 %vm377_vm2, %v7131_v13  ;;  %v7142_v13 = vld [vmem:[#allocation3_spill] sm:$0xff] }
 0x329   : > { %4979 = vmatprep.mubr.msk.f32.mxu1 %vm377_vm2, %v7132_v14 }
 0x32c   : > { %4980 = vmatmul.mubr.msk.f32.gmra.mrb[62].mxu1 %vm377_vm2, %v7133_v15 }
 0x32d   : > { %4982 = vmatprep.mubr.msk.f32.mxu1 %vm377_vm2, %v7134_v16 }
 0x330   : > { %4983 = vmatmul.mubr.msk.f32.gmra.mrb[64].mxu1 %vm377_vm2, %v7135_v17 }
 0x331   : > { %4985 = vmatprep.mubr.msk.f32.mxu1 %vm377_vm2, %v7136_v18  ;;  %v7143_v18 = vld [vmem:[#allocation13_spill] sm:$0xff] }
 0x334   : > { %4986 = vmatmul.mubr.msk.f32.gmra.mrb[66].mxu1 %vm377_vm2, %v7137_v19 }
 0x37c   : > { %v1654_v0 = vpop.permute.xlu1 %1653 }
 0x380   : > { %v1656_v4 = vpop.permute.xlu1 %1655 }
 0x3c7   : > { %v4890_v23 = vpop.f32.mrb[34].mxu1 }
 0x3c8   : > { %v1630_v24 = vpop.f32.mrb[35].mxu1  ;;  %v1636_v25 = vadd.f32 %v4890_v23, %v6273_v22 }
 0x3c9   : > { %v1631_v26 = vadd.f32 %v6273_v22, %v1630_v24  ;;  %v7150_v22 = vld [vmem:[#allocation16_spill] sm:$0xff] }
 0x3ca   : > { %v1640_v29 = vmul.f32 %v1636_v25, %v1636_v25 }
 0x3cb   : > { %v1639_v27 = vmul.f32 %v1631_v26, %v1631_v26  ;;  %v6279_v41 = vpop.f32.mrb[36].mxu1 }
 0x3cc   : > { %v1644_v30 = vsel %vm377_vm2, %v1640_v29, 0.0  ;;  %v6281_v52 = vpop.f32.mrb[37].mxu1  ;;  %v6354_v29 = vld [vmem:[%s6968_s3 + $0x10] ss:$0 sm:$0xff] }
 0x3cd   : > { %v1641_v28 = vsel %vm377_vm2, %v1639_v27, 0.0  ;;  %7145 = vst [vmem:[#allocation7_spill] sm:$0xff] %v6354_v29 }
 0x3ce   : > { %1642 = vadd.xlane.f32.xlu0 %v1641_v28 }
 0x3cf   : > { %v6283_v3 = vpop.f32.mrb[38].mxu1 }
 0x3d0   : > { %v6285_v6 = vpop.f32.mrb[39].mxu1 }
 0x3d2   : > { %1645 = vadd.xlane.f32.xlu0 %v1644_v30 }
 0x3d3   : > { %v6287_v54 = vpop.f32.mrb[40].mxu1 }
 0x3d4   : > { %v6289_v2 = vpop.f32.mrb[41].mxu1 }
 0x3d7   : > { %v6291_v34 = vpop.f32.mrb[42].mxu1 }
 0x3d8   : > { %v6293_v60 = vpop.f32.mrb[43].mxu1 }
 0x3db   : > { %v6295_v46 = vpop.f32.mrb[44].mxu1 }
 0x3dc   : > { %v6297_v58 = vpop.f32.mrb[45].mxu1 }
 0x3df   : > { %v6299_v42 = vpop.f32.mrb[46].mxu1 }
 0x3e0   : > { %v6301_v61 = vpop.f32.mrb[47].mxu1 }
 0x3e3   : > { %v6303_v63 = vpop.f32.mrb[48].mxu1 }
 0x3e4   : > { %v6308_v45 = vpop.f32.mrb[49].mxu1 }
 0x3e7   : > { %v6314_v36 = vpop.f32.mrb[50].mxu1 }
 0x3e8   : > { %v6316_v9 = vpop.f32.mrb[51].mxu1 }
 0x3eb   : > { %v6318_v49 = vpop.f32.mrb[52].mxu1 }
 0x3ec   : > { %v6323_v43 = vpop.f32.mrb[53].mxu1 }
 0x3ef   : > { %v6327_v44 = vpop.f32.mrb[54].mxu1 }
 0x3f0   : > { %v6329_v50 = vpop.f32.mrb[55].mxu1 }
 0x3f3   : > { %v6332_v11 = vpop.f32.mrb[56].mxu1 }
 0x3f4   : > { %v6335_v14 = vpop.f32.mrb[57].mxu1 }
 0x3f7   : > { %v6337_v15 = vpop.f32.mrb[58].mxu1 }
 0x3f8   : > { %v6339_v16 = vpop.f32.mrb[59].mxu1 }
 0x3fb   : > { %v6342_v17 = vpop.f32.mrb[60].mxu1 }
 0x3fc   : > { %v6345_v19 = vpop.f32.mrb[61].mxu1 }
 0x3ff   : > { %v4981_v20 = vpop.f32.mrb[62].mxu1 }
 0x400   : > { %v2322_v23 = vpop.f32.mrb[63].mxu1 }
 0x403   : > { %v4984_v24 = vpop.f32.mrb[64].mxu1 }
 0x45b   : > { %v1643_v31 = vpop.xlane.xlu0 %1642 }
 0x45c   : > { %v1647_v32 = vmax.f32 %v1643_v31, 1.0 }
 0x45e   : > { %5418 = vrsqrt.f32 %v1647_v32 }
 0x45f   : > { %v1646_v55 = vpop.xlane.xlu0 %1645 }
 0x460   : > { %v1648_v48 = vmax.f32 %v1646_v55, 1.0  ;;  %v7146_v55 = vld [vmem:[#allocation20_spill] sm:$0xff] }
 0x462   : > { %5420 = vrsqrt.f32 %v1648_v48 }
 0x468   : > { %v5419_v38 = vpop.eup %5418 }
 0x469   : > { %v1651_v39 = vmul.f32 %v5419_v38, %v1631_v26 }
 0x46b   : > { %v6306_v59 = vsel %vm377_vm2, %v1651_v39, %v1654_v0  ;;  %v7147_v0 = vld [vmem:[#allocation21_spill] sm:$0xff]  ;;  %v7148_v39 = vld [vmem:[#allocation22_spill] sm:$0xff] }
 0x46c   : > { %7139 = vst [vmem:[#allocation5_spill] sm:$0xff] %v6306_v59  ;;  %v5421_v35 = vpop.eup %5420  ;;  %2863 = vrot.lane.b32.xlu0 %v6306_v59, %s5511_s17  ;;  %4893 = vmatprep.mubr.msk.f32.mxu0 %vm246_vm1, %v6306_v59 }
 0x46d   : > { %v1652_v47 = vmul.f32 %v5421_v35, %v1636_v25  ;;  %v2332_v25 = vpop.f32.mrb[65].mxu1 }
 0x46e   : > { %v4987_v26 = vpop.f32.mrb[66].mxu1 }
 0x46f   : > { %v6321_v12 = vsel %vm377_vm2, %v1652_v47, %v1656_v4  ;;  %v2342_v27 = vpop.f32.mrb[67].mxu1  ;;  %v7149_v4 = vld [vmem:[#allocation15_spill] sm:$0xff] }
 0x470   : > { %7140 = vst [vmem:[#allocation6_spill] sm:$0xff] %v6321_v12  ;;  %4894 = vmatmul.mubr.msk.f32.vlgmr.msra.gmra.mrb[34].mxu0 %vm246_vm1, %v6321_v12 }
 0x471   : > { %5294 = vmatpush3.bf16.msra.mxu0 %v7141_v10 }
 0x472   : > { %5296 = vmatprep.subr.bf16.mxu0 %v7142_v13 }
 0x475   : > { %5298 = vmatpush3.bf16.msra.mxu0 %v7142_v13 }
 0x476   : > { %5300 = vmatprep.subr.bf16.mxu0 %v7143_v18 }
 0x479   : > { %5302 = vmatpush3.bf16.msra.mxu0 %v7143_v18 }
 0x47a   : > { %5304 = vmatprep.subr.bf16.mxu0 %v7144_v21 }
 0x47d   : > { %5306 = vmatpush3.bf16.msra.mxu0 %v7144_v21 }
 0x47e   : > { %5308 = vmatprep.subr.bf16.mxu0 %v7141_v10 }
 0x543   : > { %v4895_v28 = vpop.f32.mrb[34].mxu0 }
 0x544   : > { %v6357_v30 = vadd.f32 %v6354_v29, %v4895_v28  ;;  %v1733_v31 = vpop.f32.mrb[35].mxu0  ;;  %v7152_v28 = vld [vmem:[#allocation18_spill] sm:$0xff] }
 0x545   : > { %v1734_v32 = vadd.f32 %v6354_v29, %v1733_v31 }
 0x546   : > { %v2197_v48 = vrot.slane %v6357_v30, %v7146_v55  ;;  %v2201_v38 = vrot.slane %v6357_v30, %v7147_v0  ;;  %v2205_v35 = vrot.slane %v6357_v30, %v7148_v39 }
 0x547   : > { %v1745_v47 = vrot.slane %v1734_v32, %v7149_v4  ;;  %v1749_v8 = vrot.slane %v1734_v32, %v7150_v22  ;;  %v1753_v5 = vrot.slane %v1734_v32, %v7151_v62  ;;  %v1757_v40 = vrot.slane %v1734_v32, %v7152_v28 }
 0x548   : > { %v6370_v7 = vadd.f32 %v2322_v23, %v2197_v48  ;;  %v6372_v31 = vadd.f32 %v4981_v20, %v2197_v48  ;;  %v6374_v29 = vadd.f32 %v4984_v24, %v2201_v38  ;;  %v6376_v1 = vadd.f32 %v2332_v25, %v2201_v38 }
 0x549   : > { %v6378_v57 = vadd.f32 %v4987_v26, %v2205_v35  ;;  %v6380_v12 = vadd.f32 %v2342_v27, %v2205_v35  ;;  %v1841_v51 = vadd.f32 %v6281_v52, %v1745_v47  ;;  %v1846_v59 = vadd.f32 %v6279_v41, %v1745_v47  ;;  %v7153_v41 = vld [vmem:[#allocation19_spill] sm:$0xff] }
 0x54a   : > { %v2177_v23 = vrot.slane %v6357_v30, %v7149_v4  ;;  %v1851_v20 = vadd.f32 %v6285_v6, %v1749_v8  ;;  %v1856_v24 = vadd.f32 %v6283_v3, %v1749_v8  ;;  %v1861_v25 = vadd.f32 %v6289_v2, %v1753_v5 }
 0x54b   : > { %v1919_v56 = vmax.f32 %v1841_v51, 0.0  ;;  %v1920_v53 = vmax.f32 %v1846_v59, 0.0  ;;  %v1866_v26 = vadd.f32 %v6287_v54, %v1753_v5  ;;  %v1871_v27 = vadd.f32 %v6293_v60, %v1757_v40 }
 0x54c   : > { %v1876_v52 = vadd.f32 %v6291_v34, %v1757_v40  ;;  %v1761_v51 = vrot.slane %v1734_v32, %v7153_v41  ;;  %v1765_v59 = vrot.slane %v1734_v32, %v7146_v55  ;;  %v1921_v48 = vmax.f32 %v1851_v20, 0.0 }
 0x54d   : > { %4938 = vmatprep.mubr.msk.f32.mxu0 %vm604_vm3, %v1919_v56  ;;  %v1922_v5 = vmax.f32 %v1856_v24, 0.0  ;;  %v1769_v6 = vrot.slane %v1734_v32, %v7147_v0  ;;  %v1923_v54 = vmax.f32 %v1861_v25, 0.0  ;;  %v2273_v2 = vadd.f32 %v6323_v43, %v2177_v23 }
 0x54e   : > { %4939 = vmatmul.mubr.msk.f32.vlgmr.msra.gmra.mrb[36].mxu0 %vm604_vm3, %v1920_v53  ;;  %v1881_v8 = vadd.f32 %v6297_v58, %v1761_v51  ;;  %v1886_v3 = vadd.f32 %v6295_v46, %v1761_v51  ;;  %v1891_v40 = vadd.f32 %v6301_v61, %v1765_v59  ;;  %v1896_v56 = vadd.f32 %v6299_v42, %v1765_v59 }
 0x54f   : > { %5310 = vmatpush3.bf16.msra.mxu0 %v7141_v10  ;;  %4941 = vmatprep.mubr.msk.f32.mxu0 %vm604_vm3, %v1921_v48  ;;  %v1773_v53 = vrot.slane %v1734_v32, %v7148_v39  ;;  %v1901_v34 = vadd.f32 %v6308_v45, %v1769_v6  ;;  %v1906_v60 = vadd.f32 %v6303_v63, %v1769_v6  ;;  %v1924_v61 = vmax.f32 %v1866_v26, 0.0 }
 0x550   : > { %5312 = vmatprep.subr.bf16.mxu0 %v7142_v13  ;;  %v2278_v42 = vadd.f32 %v6318_v49, %v2177_v23  ;;  %v2181_v43 = vrot.slane %v6357_v30, %v7150_v22  ;;  %v2185_v45 = vrot.slane %v6357_v30, %v7151_v62  ;;  %v1925_v63 = vmax.f32 %v1871_v27, 0.0 }
 0x551   : > { %v1911_v46 = vadd.f32 %v6316_v9, %v1773_v53  ;;  %v1916_v58 = vadd.f32 %v6314_v36, %v1773_v53  ;;  %v2189_v32 = vrot.slane %v6357_v30, %v7152_v28  ;;  %v2193_v23 = vrot.slane %v6357_v30, %v7153_v41 }
 0x552   : > { %4942 = vmatmul.mubr.msk.f32.gmra.mrb[38].mxu0 %vm604_vm3, %v1922_v5  ;;  %v2283_v9 = vadd.f32 %v6329_v50, %v2181_v43  ;;  %v2288_v36 = vadd.f32 %v6327_v44, %v2181_v43  ;;  %v2293_v49 = vadd.f32 %v6335_v14, %v2185_v45  ;;  %v2298_v38 = vadd.f32 %v6332_v11, %v2185_v45 }
 0x553   : > { %4944 = vmatprep.mubr.msk.f32.mxu0 %vm604_vm3, %v1923_v54  ;;  %5314 = vmatpush3.bf16.msra.mxu0 %v7142_v13  ;;  %v2303_v35 = vadd.f32 %v6339_v16, %v2189_v32  ;;  %v2308_v47 = vadd.f32 %v6337_v15, %v2189_v32  ;;  %v1926_v20 = vmax.f32 %v1876_v52, 0.0  ;;  %v1927_v50 = vmax.f32 %v1881_v8, 0.0  ;;  %v5434_v15 = vld [vmem:[%s6968_s3] sm:$0xff] }
 0x554   : > { %5316 = vmatprep.subr.bf16.mxu0 %v7143_v18  ;;  %v2313_v44 = vadd.f32 %v6345_v19, %v2193_v23  ;;  %v2318_v14 = vadd.f32 %v6342_v17, %v2193_v23  ;;  %v1928_v11 = vmax.f32 %v1886_v3, 0.0  ;;  %v1929_v16 = vmax.f32 %v1891_v40, 0.0 }
 0x555   : > { %v1930_v19 = vmax.f32 %v1896_v56, 0.0  ;;  %v1931_v30 = vmax.f32 %v1901_v34, 0.0  ;;  %v1932_v17 = vmax.f32 %v1906_v60, 0.0  ;;  %v1933_v24 = vmax.f32 %v1911_v46, 0.0 }
 0x556   : > { %4945 = vmatmul.mubr.msk.f32.gmra.mrb[40].mxu0 %vm604_vm3, %v1924_v61  ;;  %v1934_v25 = vmax.f32 %v1916_v58, 0.0  ;;  %v2351_v26 = vmax.f32 %v2273_v2, 0.0  ;;  %v2352_v27 = vmax.f32 %v2278_v42, 0.0  ;;  %v2353_v52 = vmax.f32 %v2283_v9, 0.0  ;;  %v7154_v61 = vld [vmem:[#allocation27_spill] sm:$0xff] }
 0x557   : > { %4947 = vmatprep.mubr.msk.f32.mxu0 %vm604_vm3, %v1925_v63  ;;  %5318 = vmatpush3.bf16.msra.mxu0 %v7143_v18  ;;  %v2354_v51 = vmax.f32 %v2288_v36, 0.0  ;;  %v2355_v59 = vmax.f32 %v2293_v49, 0.0  ;;  %v2356_v48 = vmax.f32 %v2298_v38, 0.0  ;;  %v2357_v8 = vmax.f32 %v2303_v35, 0.0 }
 0x558   : > { %5320 = vmatprep.subr.bf16.mxu0 %v7144_v21  ;;  %v2358_v3 = vmax.f32 %v2308_v47, 0.0  ;;  %v2359_v5 = vmax.f32 %v2313_v44, 0.0  ;;  %v2360_v40 = vmax.f32 %v2318_v14, 0.0  ;;  %v2361_v56 = vmax.f32 %v6370_v7, 0.0  ;;  %v7155_v44 = vld [vmem:[#allocation28_spill] sm:$0xff] }
 0x559   : > { %v2362_v6 = vmax.f32 %v6372_v31, 0.0  ;;  %v2363_v54 = vmax.f32 %v6376_v1, 0.0  ;;  %v2364_v53 = vmax.f32 %v6374_v29, 0.0  ;;  %v2365_v2 = vmax.f32 %v6380_v12, 0.0 }
 0x55a   : > { %4948 = vmatmul.mubr.msk.f32.gmra.mrb[42].mxu0 %vm604_vm3, %v1926_v20  ;;  %v2366_v7 = vmax.f32 %v6378_v57, 0.0 }
 0x55b   : > { %4950 = vmatprep.mubr.msk.f32.mxu0 %vm604_vm3, %v1927_v50  ;;  %5322 = vmatpush3.bf16.msra.mxu0 %v7144_v21 }
 0x55c   : > { %5063 = vmatprep.subr.mxu0 %v5434_v15 }
 0x55e   : > { %4951 = vmatmul.mubr.msk.f32.gmra.mrb[44].mxu0 %vm604_vm3, %v1928_v11 }
 0x55f   : > { %4953 = vmatprep.mubr.msk.f32.mxu0 %vm604_vm3, %v1929_v16 }
 0x562   : > { %4954 = vmatmul.mubr.msk.f32.gmra.mrb[46].mxu0 %vm604_vm3, %v1930_v19 }
 0x563   : > { %4956 = vmatprep.mubr.msk.f32.mxu0 %vm604_vm3, %v1931_v30 }
 0x566   : > { %4957 = vmatmul.mubr.msk.f32.gmra.mrb[48].mxu0 %vm604_vm3, %v1932_v17  ;;  %v7157_v17 = vld [vmem:[#allocation30_spill] sm:$0xff] }
 0x567   : > { %4959 = vmatprep.mubr.msk.f32.mxu0 %vm604_vm3, %v1933_v24 }
 0x56a   : > { %4960 = vmatmul.mubr.msk.f32.gmra.mrb[50].mxu0 %vm604_vm3, %v1934_v25 }
 0x56b   : > { %5004 = vmatprep.mubr.msk.f32.mxu0 %vm604_vm3, %v2351_v26  ;;  %v7158_v26 = vld [vmem:[#allocation31_spill] sm:$0xff] }
 0x56e   : > { %5005 = vmatmul.mubr.msk.f32.vlgmr.msra.gmra.mrb[52].mxu0 %vm604_vm3, %v2352_v27 }
 0x56f   : > { %5007 = vmatprep.mubr.msk.f32.mxu0 %vm604_vm3, %v2353_v52  ;;  %5064 = vmatpush3.msra.mxu0 %v5434_v15  ;;  %v7156_v15 = vld [vmem:[#allocation29_spill] sm:$0xff] }
 0x570   : > { %5348 = vmatprep.subr.bf16.mxu0 %v7141_v10 }
 0x572   : > { %5008 = vmatmul.mubr.msk.f32.gmra.mrb[54].mxu0 %vm604_vm3, %v2354_v51 }
 0x573   : > { %5010 = vmatprep.mubr.msk.f32.mxu0 %vm604_vm3, %v2355_v59 }
 0x576   : > { %5011 = vmatmul.mubr.msk.f32.gmra.mrb[56].mxu0 %vm604_vm3, %v2356_v48  ;;  %v7159_v48 = vld [vmem:[#allocation32_spill] sm:$0xff] }
 0x577   : > { %5013 = vmatprep.mubr.msk.f32.mxu0 %vm604_vm3, %v2357_v8 }
 0x57a   : > { %5014 = vmatmul.mubr.msk.f32.gmra.mrb[58].mxu0 %vm604_vm3, %v2358_v3  ;;  %v7160_v3 = vld [vmem:[#allocation33_spill] sm:$0xff] }
 0x57b   : > { %5016 = vmatprep.mubr.msk.f32.mxu0 %vm604_vm3, %v2359_v5 }
 0x57e   : > { %5017 = vmatmul.mubr.msk.f32.gmra.mrb[60].mxu0 %vm604_vm3, %v2360_v40 }
 0x57f   : > { %5019 = vmatprep.mubr.msk.f32.mxu0 %vm604_vm3, %v2361_v56 }
 0x582   : > { %5020 = vmatmul.mubr.msk.f32.gmra.mrb[62].mxu0 %vm604_vm3, %v2362_v6 }
 0x583   : > { %5022 = vmatprep.mubr.msk.f32.mxu0 %vm604_vm3, %v2363_v54 }
 0x586   : > { %5023 = vmatmul.mubr.msk.f32.gmra.mrb[64].mxu0 %vm604_vm3, %v2364_v53 }
 0x587   : > { %5025 = vmatprep.mubr.msk.f32.mxu0 %vm604_vm3, %v2365_v2  ;;  %v7161_v2 = vld [vmem:[#allocation34_spill] sm:$0xff] }
 0x58a   : > { %5026 = vmatmul.mubr.msk.f32.gmra.mrb[66].mxu0 %vm604_vm3, %v2366_v7 }
 0x621   : > { %v4940_v34 = vpop.f32.mrb[36].mxu0 }
 0x622   : > { %v2049_v31 = vpop.f32.mrb[37].mxu0  ;;  %v2055_v43 = vadd.f32 %v4940_v34, %v7154_v61 }
 0x623   : > { %v2050_v12 = vadd.f32 %v7154_v61, %v2049_v31 }
 0x624   : > { %v2129_v57 = vmax.f32 %v2055_v43, 0.0 }
 0x625   : > { %v4943_v60 = vpop.f32.mrb[38].mxu0  ;;  %v2128_v49 = vmax.f32 %v2050_v12, 0.0 }
 0x626   : > { %v2059_v1 = vpop.f32.mrb[39].mxu0  ;;  %v2065_v45 = vadd.f32 %v4943_v60, %v7154_v61  ;;  %v2145_v14 = vmul.f32 %v2129_v57, %v7155_v44 }
 0x627   : > { %v2060_v63 = vadd.f32 %v7154_v61, %v2059_v1  ;;  %v2144_v24 = vmul.f32 %v2128_v49, %v7157_v17  ;;  %v7164_v49 = vld [vmem:[#allocation37_spill] sm:$0xff] }
 0x628   : > { %v2131_v47 = vmax.f32 %v2065_v45, 0.0 }
 0x629   : > { %v4946_v46 = vpop.f32.mrb[40].mxu0  ;;  %v2130_v23 = vmax.f32 %v2060_v63, 0.0 }
 0x62a   : > { %v2069_v58 = vpop.f32.mrb[41].mxu0  ;;  %v2075_v11 = vadd.f32 %v4946_v46, %v7154_v61  ;;  %v2147_v8 = vmul.f32 %v2131_v47, %v7159_v48  ;;  %v7162_v46 = vld [vmem:[#allocation35_spill] sm:$0xff] }
 0x62b   : > { %v2070_v25 = vadd.f32 %v7154_v61, %v2069_v58  ;;  %v2146_v5 = vmul.f32 %v2130_v23, %v7160_v3  ;;  %v7165_v23 = vld [vmem:[#allocation38_spill] sm:$0xff]  ;;  %v7170_v3 = vld [vmem:[#allocation43_spill] sm:$0xff] }
 0x62c   : > { %v2133_v54 = vmax.f32 %v2075_v11, 0.0 }
 0x62d   : > { %v4949_v42 = vpop.f32.mrb[42].mxu0  ;;  %v2132_v60 = vmax.f32 %v2070_v25, 0.0 }
 0x62e   : > { %v2079_v29 = vpop.f32.mrb[43].mxu0  ;;  %v2085_v53 = vadd.f32 %v4949_v42, %v7154_v61 }
 0x62f   : > { %v2080_v1 = vadd.f32 %v7154_v61, %v2079_v29 }
 0x630   : > { %v2135_v42 = vmax.f32 %v2085_v53, 0.0 }
 0x631   : > { %v4952_v32 = vpop.f32.mrb[44].mxu0  ;;  %v2134_v29 = vmax.f32 %v2080_v1, 0.0 }
 0x632   : > { %v2095_v9 = vadd.f32 %v4952_v32, %v7154_v61  ;;  %v2089_v36 = vpop.f32.mrb[45].mxu0 }
 0x633   : > { %v2090_v38 = vadd.f32 %v7154_v61, %v2089_v36 }
 0x634   : > { %v2137_v35 = vmax.f32 %v2095_v9, 0.0  ;;  %v7163_v9 = vld [vmem:[#allocation36_spill] sm:$0xff] }
 0x635   : > { %v2136_v20 = vmax.f32 %v2090_v38, 0.0  ;;  %v4955_v50 = vpop.f32.mrb[46].mxu0  ;;  %v2149_v36 = vmul.f32 %v2133_v54, %v7163_v9 }
 0x636   : > { %v2153_v16 = vmul.f32 %v2137_v35, %v7156_v15  ;;  %v2105_v19 = vadd.f32 %v4955_v50, %v7154_v61  ;;  %v2099_v30 = vpop.f32.mrb[47].mxu0  ;;  %v7166_v50 = vld [vmem:[#allocation39_spill] sm:$0xff] }
 0x637   : > { %v2152_v27 = vmul.f32 %v2136_v20, %v7158_v26  ;;  %v2100_v52 = vadd.f32 %v7154_v61, %v2099_v30  ;;  %v2148_v20 = vmul.f32 %v2132_v60, %v7165_v23  ;;  %v7168_v26 = vld [vmem:[#allocation41_spill] sm:$0xff]  ;;  %v7171_v23 = vld [vmem:[#allocation44_spill] sm:$0xff] }
 0x638   : > { %v2161_v51 = vmax.f32 %v2145_v14, %v2153_v16  ;;  %v2139_v59 = vmax.f32 %v2105_v19, 0.0  ;;  %v6501_v14 = vld [vmem:[%s6968_s3 + $0x11] ss:$0 sm:$0xff] }
 0x639   : > { %v2160_v40 = vmax.f32 %v2144_v24, %v2152_v27  ;;  %v2138_v56 = vmax.f32 %v2100_v52, 0.0  ;;  %v4958_v6 = vpop.f32.mrb[48].mxu0  ;;  %v7167_v24 = vld [vmem:[#allocation40_spill] sm:$0xff] }
 0x63a   : > { %v2155_v7 = vmul.f32 %v2139_v59, %v7161_v2  ;;  %v2115_v34 = vadd.f32 %v4958_v6, %v7154_v61  ;;  %v2109_v31 = vpop.f32.mrb[49].mxu0  ;;  %v7169_v59 = vld [vmem:[#allocation42_spill] sm:$0xff] }
 0x63b   : > { %v2154_v58 = vmul.f32 %v2138_v56, %v7162_v46  ;;  %v2110_v43 = vadd.f32 %v7154_v61, %v2109_v31  ;;  %v2150_v48 = vmul.f32 %v2134_v29, %v7169_v59 }
 0x63c   : > { %v2163_v12 = vmax.f32 %v2147_v8, %v2155_v7  ;;  %v2141_v45 = vmax.f32 %v2115_v34, 0.0 }
 0x63d   : > { %v2162_v63 = vmax.f32 %v2146_v5, %v2154_v58  ;;  %v2140_v32 = vmax.f32 %v2110_v43, 0.0  ;;  %v4961_v57 = vpop.f32.mrb[50].mxu0 }
 0x63e   : > { %v2157_v38 = vmul.f32 %v2141_v45, %v7164_v49  ;;  %v2125_v35 = vadd.f32 %v4961_v57, %v7154_v61  ;;  %v2119_v47 = vpop.f32.mrb[51].mxu0  ;;  %v2151_v61 = vmul.f32 %v2135_v42, %v7167_v24 }
 0x63f   : > { %v2156_v44 = vmul.f32 %v2140_v32, %v7166_v50  ;;  %v2120_v11 = vadd.f32 %v6501_v14, %v2119_v47  ;;  %v7172_v50 = vld [vmem:[#allocation45_spill] sm:$0xff] }
 0x640   : > { %v2165_v15 = vmax.f32 %v2149_v36, %v2157_v38  ;;  %v2143_v16 = vmax.f32 %v2125_v35, 0.0 }
 0x641   : > { %v2164_v19 = vmax.f32 %v2148_v20, %v2156_v44  ;;  %v2142_v30 = vmax.f32 %v2120_v11, 0.0  ;;  %v5006_v17 = vpop.f32.mrb[52].mxu0 }
 0x642   : > { %v6505_v25 = vmax.f32 %v2161_v51, %v2165_v15  ;;  %v2159_v27 = vmul.f32 %v2143_v16, %v7168_v26  ;;  %v2481_v52 = vpop.f32.mrb[53].mxu0  ;;  %v2487_v1 = vadd.f32 %v6501_v14, %v5006_v17  ;;  %v7173_v16 = vld [vmem:[#allocation46_spill] sm:$0xff]  ;;  %v7174_v17 = vld [vmem:[#allocation47_spill] sm:$0xff] }
 0x643   : > { %v6509_v8 = vmax.f32 %v2160_v40, %v2164_v19  ;;  %v2158_v5 = vmul.f32 %v2142_v30, %v7170_v3  ;;  %v2482_v58 = vadd.f32 %v6501_v14, %v2481_v52  ;;  %v7175_v52 = vld [vmem:[#allocation48_spill] sm:$0xff] }
 0x644   : > { %v2167_v56 = vmax.f32 %v2151_v61, %v2159_v27 }
 0x645   : > { %v2166_v6 = vmax.f32 %v2150_v48, %v2158_v5  ;;  %v5009_v54 = vpop.f32.mrb[54].mxu0  ;;  %v2560_v9 = vmax.f32 %v2482_v58, 0.0  ;;  %v7176_v48 = vld [vmem:[#allocation49_spill] sm:$0xff] }
 0x646   : > { %v6512_v53 = vmax.f32 %v2163_v12, %v2167_v56  ;;  %v2491_v2 = vpop.f32.mrb[55].mxu0  ;;  %v2497_v43 = vadd.f32 %v6501_v14, %v5009_v54 }
 0x647   : > { %v6514_v7 = vmax.f32 %v2162_v63, %v2166_v6  ;;  %v2492_v12 = vadd.f32 %v6501_v14, %v2491_v2  ;;  %v2561_v63 = vmax.f32 %v2487_v1, 0.0  ;;  %v2576_v19 = vmul.f32 %v2560_v9, %v7173_v16 }
 0x648   : > { %v2173_v51 = vmax.f32 %v6505_v25, %v6512_v53  ;;  %v2563_v49 = vmax.f32 %v2497_v43, 0.0  ;;  %v7187_v25 = vld [vmem:[#allocation58_spill] sm:$0xff] }
 0x649   : > { %v2172_v34 = vmax.f32 %v6509_v8, %v6514_v7  ;;  %v5012_v31 = vpop.f32.mrb[56].mxu0  ;;  %v2562_v38 = vmax.f32 %v2492_v12, 0.0  ;;  %v2577_v20 = vmul.f32 %v2561_v63, %v7171_v23  ;;  %v7188_v53 = vld [vmem:[#allocation6_spill] sm:$0xff]  ;;  %v7189_v8 = vld [vmem:[#allocation59_spill] sm:$0xff]  ;;  %v7190_v7 = vld [vmem:[#allocation61_spill] sm:$0xff] }
 0x64a   : > { %v2501_v60 = vpop.f32.mrb[57].mxu0  ;;  %v2507_v29 = vadd.f32 %v6501_v14, %v5012_v31  ;;  %v2579_v59 = vmul.f32 %v2563_v49, %v7175_v52  ;;  %v7177_v31 = vld [vmem:[#allocation50_spill] sm:$0xff] }
 0x64b   : > { %v2502_v30 = vadd.f32 %v6501_v14, %v2501_v60  ;;  %v2578_v3 = vmul.f32 %v2562_v38, %v7176_v48  ;;  %v7179_v38 = vld [vmem:[#allocation52_spill] sm:$0xff] }
 0x64c   : > { %v2565_v54 = vmax.f32 %v2507_v29, 0.0 }
 0x64d   : > { %v5015_v40 = vpop.f32.mrb[58].mxu0  ;;  %v2564_v43 = vmax.f32 %v2502_v30, 0.0 }
 0x64e   : > { %v2511_v46 = vpop.f32.mrb[59].mxu0  ;;  %v2517_v2 = vadd.f32 %v6501_v14, %v5015_v40 }
 0x64f   : > { %v2512_v12 = vadd.f32 %v6501_v14, %v2511_v46 }
 0x650   : > { %v2567_v40 = vmax.f32 %v2517_v2, 0.0 }
 0x651   : > { %v5018_v45 = vpop.f32.mrb[60].mxu0  ;;  %v2566_v46 = vmax.f32 %v2512_v12, 0.0 }
 0x652   : > { %v2527_v32 = vadd.f32 %v6501_v14, %v5018_v45  ;;  %v2521_v57 = vpop.f32.mrb[61].mxu0  ;;  %v7178_v45 = vld [vmem:[#allocation51_spill] sm:$0xff] }
 0x653   : > { %v2522_v36 = vadd.f32 %v6501_v14, %v2521_v57 }
 0x654   : > { %v2569_v42 = vmax.f32 %v2527_v32, 0.0 }
 0x655   : > { %v2568_v35 = vmax.f32 %v2522_v36, 0.0  ;;  %v5021_v47 = vpop.f32.mrb[62].mxu0 }
 0x656   : > { %v2585_v44 = vmul.f32 %v2569_v42, %v7172_v50  ;;  %v2537_v11 = vadd.f32 %v6501_v14, %v5021_v47  ;;  %v2531_v15 = vpop.f32.mrb[63].mxu0  ;;  %v7180_v47 = vld [vmem:[#allocation53_spill] sm:$0xff]  ;;  %v7181_v50 = vld [vmem:[#allocation54_spill] sm:$0xff] }
 0x657   : > { %v2584_v24 = vmul.f32 %v2568_v35, %v7174_v17  ;;  %v2532_v61 = vadd.f32 %v6501_v14, %v2531_v15  ;;  %v2581_v35 = vmul.f32 %v2565_v54, %v7179_v38  ;;  %v5441_v38 = vld [vmem:[%s5594_s10 + $0x20] sm:$0xff] }
 0x658   : > { %v2593_v26 = vmax.f32 %v2577_v20, %v2585_v44  ;;  %v2571_v27 = vmax.f32 %v2537_v11, 0.0  ;;  %v2580_v44 = vmul.f32 %v2564_v43, %v7181_v50  ;;  %v7182_v11 = vld [vmem:[#allocation55_spill] sm:$0xff]  ;;  %v5448_v50 = vld [vmem:[%s5594_s10 + $0x58] sm:$0xff] }
 0x659   : > { %v2592_v5 = vmax.f32 %v2576_v19, %v2584_v24  ;;  %v2570_v56 = vmax.f32 %v2532_v61, 0.0  ;;  %v5024_v6 = vpop.f32.mrb[64].mxu0  ;;  %v2583_v61 = vmul.f32 %v2567_v40, %v6121_v33  ;;  %v5443_v40 = vld [vmem:[%s5594_s10 + $0x30] sm:$0xff] }
 0x65a   : > { %v2587_v1 = vmul.f32 %v2571_v27, %v7177_v31  ;;  %v2547_v60 = vadd.f32 %v6501_v14, %v5024_v6  ;;  %v2541_v58 = vpop.f32.mrb[65].mxu0 }
 0x65b   : > { %v2586_v63 = vmul.f32 %v2570_v56, %v7178_v45  ;;  %v2542_v32 = vadd.f32 %v6501_v14, %v2541_v58  ;;  %v7184_v56 = vld [vmem:[#allocation57_spill] sm:$0xff] }
 0x65c   : > { %v2595_v57 = vmax.f32 %v2579_v59, %v2587_v1  ;;  %v2573_v9 = vmax.f32 %v2547_v60, 0.0  ;;  %v7183_v59 = vld [vmem:[#allocation56_spill] sm:$0xff] }
 0x65d   : > { %v2594_v36 = vmax.f32 %v2578_v3, %v2586_v63  ;;  %v2572_v42 = vmax.f32 %v2542_v32, 0.0  ;;  %v5027_v49 = vpop.f32.mrb[66].mxu0  ;;  %v2582_v48 = vmul.f32 %v2566_v46, %v7183_v59  ;;  %v5450_v46 = vld [vmem:[%s5594_s10 + $0x68] sm:$0xff]  ;;  %v5459_v59 = vld [vmem:[%s5594_s10 + $0xb0] sm:$0xff] }
 0x65e   : > { %v2589_v23 = vmul.f32 %v2573_v9, %v7180_v47  ;;  %v2557_v20 = vadd.f32 %v6501_v14, %v5027_v49  ;;  %v2551_v29 = vpop.f32.mrb[67].mxu0  ;;  %v5438_v9 = vld [vmem:[%s5594_s10 + $0x8] sm:$0xff]  ;;  %v5440_v49 = vld [vmem:[%s5594_s10 + $0x18] sm:$0xff] }
 0x65f   : > { %v2588_v15 = vmul.f32 %v2572_v42, %v7182_v11  ;;  %v2552_v16 = vadd.f32 %v6501_v14, %v2551_v29  ;;  %v7192_v42 = vld [vmem:[#allocation23_spill] sm:$0xff]  ;;  %v5444_v47 = vld [vmem:[%s5594_s10 + $0x38] sm:$0xff]  ;;  %v5447_v29 = vld [vmem:[%s5594_s10 + $0x50] sm:$0xff] }
 0x660   : > { %v2597_v19 = vmax.f32 %v2581_v35, %v2589_v23  ;;  %v2575_v30 = vmax.f32 %v2557_v20, 0.0  ;;  %v5442_v35 = vld [vmem:[%s5594_s10 + $0x28] sm:$0xff]  ;;  %v5445_v23 = vld [vmem:[%s5594_s10 + $0x40] sm:$0xff]  ;;  %v5451_v11 = vld [vmem:[%s5594_s10 + $0x70] sm:$0xff] }
 0x661   : > { %v2596_v17 = vmax.f32 %v2580_v44, %v2588_v15  ;;  %v2574_v24 = vmax.f32 %v2552_v16, 0.0  ;;  %v5446_v20 = vld [vmem:[%s5594_s10 + $0x48] sm:$0xff]  ;;  %v5449_v44 = vld [vmem:[%s5594_s10 + $0x60] sm:$0xff]  ;;  %v5452_v15 = vld [vmem:[%s5594_s10 + $0x78] sm:$0xff] }
 0x662   : > { %v2601_v27 = vmax.f32 %v2593_v26, %v2597_v19  ;;  %v2591_v52 = vmul.f32 %v2575_v30, %v6125_v37  ;;  %v6563_v37 = vld [vmem:[%s6968_s3 + $0x58] sm:$0xff]  ;;  %v5453_v16 = vld [vmem:[%s5594_s10 + $0x80] sm:$0xff]  ;;  %v5454_v19 = vld [vmem:[%s5594_s10 + $0x88] sm:$0xff] }
 0x663   : > { %v2600_v3 = vmax.f32 %v2592_v5, %v2596_v17  ;;  %v2590_v6 = vmul.f32 %v2574_v24, %v7184_v56  ;;  %7185 = vst [vmem:[#allocation8_spill] sm:$0xff] %v6563_v37  ;;  %v7186_v26 = vld [vmem:[#allocation5_spill] sm:$0xff]  ;;  %v5455_v30 = vld [vmem:[%s5594_s10 + $0x90] sm:$0xff]  ;;  %v5461_v56 = vld [vmem:[%s5594_s10 + $0xc0] sm:$0xff] }
 0x664   : > { %v2599_v54 = vmax.f32 %v2583_v61, %v2591_v52  ;;  %v7193_v17 = vld [vmem:[#allocation24_spill] sm:$0xff]  ;;  %v5456_v24 = vld [vmem:[%s5594_s10 + $0x98] sm:$0xff]  ;;  %v5457_v61 = vld [vmem:[%s5594_s10 + $0xa0] sm:$0xff] }
 0x665   : > { %v2598_v2 = vmax.f32 %v2582_v48, %v2590_v6  ;;  %v5458_v52 = vld [vmem:[%s5594_s10 + $0xa8] sm:$0xff]  ;;  %v7195_v48 = vld [vmem:[#allocation26_spill] sm:$0xff] }
 0x666   : > { %v2603_v31 = vmax.f32 %v2595_v57, %v2599_v54  ;;  %v5437_v57 = vld [vmem:[%s5594_s10] sm:$0xff]  ;;  %v5462_v6 = vld [vmem:[%s5594_s10 + $0xc8] sm:$0xff]  ;;  %v5463_v54 = vld [vmem:[%s5594_s10 + $0xd0] sm:$0xff] }
 0x667   : > { %v2602_v1 = vmax.f32 %v2594_v36, %v2598_v2  ;;  %v5439_v36 = vld [vmem:[%s5594_s10 + $0x10] sm:$0xff]  ;;  %v5464_v2 = vld [vmem:[%s5594_s10 + $0xd8] sm:$0xff] }
 0x668   : > { %v2605_v60 = vmax.f32 %v2601_v27, %v2603_v31  ;;  %v7194_v27 = vld [vmem:[#allocation25_spill] sm:$0xff]  ;;  %v5465_v31 = vld [vmem:[%s5594_s10 + $0xe0] sm:$0xff] }
 0x669   : > { %v2604_v58 = vmax.f32 %v2600_v3, %v2602_v1  ;;  %v5460_v3 = vld [vmem:[%s5594_s10 + $0xb8] sm:$0xff]  ;;  %v5466_v1 = vld [vmem:[%s5594_s10 + $0xe8] sm:$0xff] }
 0x66a   : > { %v2607_v43 = vmax.f32 %v2173_v51, %v2605_v60  ;;  %v5467_v60 = vld [vmem:[%s5594_s10 + $0xf0] sm:$0xff] }
 0x66b   : > { %v2606_v33 = vmax.f32 %v2172_v34, %v2604_v58  ;;  %v7191_v34 = vld [vmem:[#allocation60_spill] sm:$0xff]  ;;  %v5468_v58 = vld [vmem:[%s5594_s10 + $0xf8] sm:$0xff] }
 0x66d   : > { %5044 = vmatprep.mubr.msk.f32.mxu1 %vm604_vm3, %v2606_v33  ;;  %v7196_v33 = vld [vmem:[#allocation4_spill] sm:$0xff] }
 0x66e   : > { %5045 = vmatmul.mubr.msk.f32.vlgmr.msra.gmra.mrb[68].mxu1 %vm604_vm3, %v2607_v43 }
 0x66f   : > { %5048 = vmatpush3.msra.mxu1 %v6563_v37  ;;  %5049 = vmatprep.mubr.msk.f32.mxu1 %vm246_vm1, %v7186_v26 }
 0x670   : > { %5340 = vmatprep.subr.bf16.mxu1 %v7187_v25 }
 0x676   : > { %5050 = vmatmul.mubr.msk.f32.vlgmr.msra.gmra.mrb[68].mxu1 %vm246_vm1, %v7188_v53 }
 0x677   : > { %5342 = vmatpush3.bf16.msra.mxu1 %v7187_v25 }
 0x678   : > { %5344 = vmatprep.subr.bf16.mxu1 %v7189_v8 }
 0x67b   : > { %5346 = vmatpush3.bf16.msra.mxu1 %v7189_v8 }
 0x67c   : > { %5068 = vmatprep.subr.msk.mxu1 %vm426_vm0, %v7190_v7 }
 0x749   : > { %v5051_v51 = vpop.f32.mrb[68].mxu1 }
 0x74a   : > { %v2765_v5 = vadd.f32 %v5051_v51, %v7191_v34  ;;  %v2755_v12 = vpop.f32.mrb[69].mxu1 }
 0x74b   : > { %v2764_v45 = vadd.f32 %v7191_v34, %v2755_v12 }
 0x74c   : > { %v2767_v32 = vmax.f32 %v2765_v5, 0.0 }
 0x74d   : > { %v2766_v63 = vmax.f32 %v2764_v45, 0.0 }
 0x74f   : > { %5060 = vmatprep.mubr.msk.f32.mxu1 %vm1557_vm4, %v2766_v63 }
 0x750   : > { %5061 = vmatmul.mubr.msk.f32.vlgmr.msra.gmra.mrb[70].mxu1 %vm1557_vm4, %v2767_v32 }
 0x751   : > { %5069 = vmatpush3.msk.msra.mxu1 %vm426_vm0, %v7190_v7  ;;  %5070 = vmatprep.mubr.msk.f32.mxu1 %vm377_vm2, %v5437_v57 }
 0x752   : > { %5134 = vmatprep.subr.msk.mxu1 %vm426_vm0, %v7190_v7 }
 0x754   : > { %5071 = vmatmul.mubr.msk.f32.vlgmr.msra.gmra.mrb[72].mxu1 %vm377_vm2, %v5438_v9 }
 0x755   : > { %5073 = vmatprep.mubr.msk.f32.mxu1 %vm377_vm2, %v5439_v36  ;;  %5135 = vmatpush3.msk.msra.mxu1 %vm426_vm0, %v7190_v7 }
 0x756   : > { %5380 = vmatprep.subr.bf16.mxu1 %v7192_v42 }
 0x758   : > { %5074 = vmatmul.mubr.msk.f32.gmra.mrb[74].mxu1 %vm377_vm2, %v5440_v49 }
 0x759   : > { %5076 = vmatprep.mubr.msk.f32.mxu1 %vm377_vm2, %v5441_v38 }
 0x75c   : > { %5077 = vmatmul.mubr.msk.f32.gmra.mrb[76].mxu1 %vm377_vm2, %v5442_v35 }
 0x75d   : > { %5079 = vmatprep.mubr.msk.f32.mxu1 %vm377_vm2, %v5443_v40 }
 0x760   : > { %5080 = vmatmul.mubr.msk.f32.gmra.mrb[78].mxu1 %vm377_vm2, %v5444_v47 }
 0x761   : > { %5082 = vmatprep.mubr.msk.f32.mxu1 %vm377_vm2, %v5445_v23 }
 0x764   : > { %5083 = vmatmul.mubr.msk.f32.gmra.mrb[80].mxu1 %vm377_vm2, %v5446_v20 }
 0x765   : > { %5085 = vmatprep.mubr.msk.f32.mxu1 %vm377_vm2, %v5447_v29 }
 0x768   : > { %5086 = vmatmul.mubr.msk.f32.gmra.mrb[82].mxu1 %vm377_vm2, %v5448_v50 }
 0x769   : > { %5088 = vmatprep.mubr.msk.f32.mxu1 %vm377_vm2, %v5449_v44 }
 0x76c   : > { %5089 = vmatmul.mubr.msk.f32.gmra.mrb[84].mxu1 %vm377_vm2, %v5450_v46 }
 0x76d   : > { %5091 = vmatprep.mubr.msk.f32.mxu1 %vm377_vm2, %v5451_v11 }
 0x770   : > { %5092 = vmatmul.mubr.msk.f32.gmra.mrb[86].mxu1 %vm377_vm2, %v5452_v15 }
 0x771   : > { %5136 = vmatprep.mubr.msk.f32.mxu1 %vm377_vm2, %v5453_v16 }
 0x774   : > { %5137 = vmatmul.mubr.msk.f32.vlgmr.msra.gmra.mrb[88].mxu1 %vm377_vm2, %v5454_v19 }
 0x775   : > { %5139 = vmatprep.mubr.msk.f32.mxu1 %vm377_vm2, %v5455_v30  ;;  %5382 = vmatpush3.bf16.msra.mxu1 %v7192_v42 }
 0x776   : > { %5384 = vmatprep.subr.bf16.mxu1 %v7193_v17 }
 0x778   : > { %5140 = vmatmul.mubr.msk.f32.gmra.mrb[90].mxu1 %vm377_vm2, %v5456_v24 }
 0x779   : > { %5142 = vmatprep.mubr.msk.f32.mxu1 %vm377_vm2, %v5457_v61  ;;  %5386 = vmatpush3.bf16.msra.mxu1 %v7193_v17 }
 0x77a   : > { %5388 = vmatprep.subr.bf16.mxu1 %v7194_v27 }
 0x77c   : > { %5143 = vmatmul.mubr.msk.f32.gmra.mrb[92].mxu1 %vm377_vm2, %v5458_v52  ;;  %v2864_v52 = vpop.permute.xlu0 %2863 }
 0x77d   : > { %5145 = vmatprep.mubr.msk.f32.mxu1 %vm377_vm2, %v5459_v59  ;;  %5390 = vmatpush3.bf16.msra.mxu1 %v7194_v27 }
 0x77e   : > { %5392 = vmatprep.subr.bf16.mxu1 %v7195_v48 }
 0x780   : > { %5146 = vmatmul.mubr.msk.f32.gmra.mrb[94].mxu1 %vm377_vm2, %v5460_v3 }
 0x781   : > { %5148 = vmatprep.mubr.msk.f32.mxu1 %vm377_vm2, %v5461_v56  ;;  %5394 = vmatpush3.bf16.msra.mxu1 %v7195_v48 }
 0x782   : > { %5219 = vmatprep.subr.mxu1 %v6563_v37 }
 0x784   : > { %5149 = vmatmul.mubr.msk.f32.gmra.mrb[96].mxu1 %vm377_vm2, %v5462_v6 }
 0x785   : > { %5151 = vmatprep.mubr.msk.f32.mxu1 %vm377_vm2, %v5463_v54 }
 0x788   : > { %5152 = vmatmul.mubr.msk.f32.gmra.mrb[98].mxu1 %vm377_vm2, %v5464_v2 }
 0x789   : > { %5154 = vmatprep.mubr.msk.f32.mxu1 %vm377_vm2, %v5465_v31 }
 0x78c   : > { %5155 = vmatmul.mubr.msk.f32.gmra.mrb[100].mxu1 %vm377_vm2, %v5466_v1 }
 0x78d   : > { %5157 = vmatprep.mubr.msk.f32.mxu1 %vm377_vm2, %v5467_v60 }
 0x790   : > { %5158 = vmatmul.mubr.msk.f32.gmra.mrb[102].mxu1 %vm377_vm2, %v5468_v58 }
 0x823   : > { %v5062_v43 = vpop.f32.mrb[70].mxu1 }
 0x824   : > { %v2846_v26 = vadd.f32 %v5062_v43, %v7196_v33  ;;  %v2840_v7 = vpop.f32.mrb[71].mxu1 }
 0x825   : > { %v2841_v51 = vadd.f32 %v7196_v33, %v2840_v7 }
 0x826   : > { %v2850_v34 = vmul.f32 %v2846_v26, %v2846_v26 }
 0x827   : > { %v2849_v5 = vmul.f32 %v2841_v51, %v2841_v51  ;;  %v6665_v63 = vpop.f32.mrb[72].mxu1 }
 0x828   : > { %v2854_v12 = vsel %vm377_vm2, %v2850_v34, 0.0  ;;  %v6667_v32 = vpop.f32.mrb[73].mxu1 }
 0x829   : > { %2855 = vadd.xlane.f32.xlu1 %v2854_v12  ;;  %v2851_v45 = vsel %vm377_vm2, %v2849_v5, 0.0  ;;  %v7199_v5 = vld [vmem:[#allocation7_spill] sm:$0xff] }
 0x82a   : > { %2852 = vadd.xlane.f32.xlu0 %v2851_v45 }
 0x82b   : > { %v6669_v57 = vpop.f32.mrb[74].mxu1 }
 0x82c   : > { %v6671_v9 = vpop.f32.mrb[75].mxu1 }
 0x82f   : > { %v6673_v36 = vpop.f32.mrb[76].mxu1 }
 0x830   : > { %v6675_v42 = vpop.f32.mrb[77].mxu1 }
 0x833   : > { %v6677_v49 = vpop.f32.mrb[78].mxu1 }
 0x834   : > { %v6679_v38 = vpop.f32.mrb[79].mxu1 }
 0x837   : > { %v6681_v35 = vpop.f32.mrb[80].mxu1 }
 0x838   : > { %v6683_v40 = vpop.f32.mrb[81].mxu1 }
 0x840   : > { %2865 = vrot.lane.b32.xlu0 %v7188_v53, %s5511_s17  ;;  %v6685_v53 = vpop.f32.mrb[82].mxu1 }
 0x841   : > { %v6687_v47 = vpop.f32.mrb[83].mxu1 }
 0x842   : > { %v6689_v23 = vpop.f32.mrb[84].mxu1 }
 0x843   : > { %v6691_v20 = vpop.f32.mrb[85].mxu1 }
 0x844   : > { %v6693_v29 = vpop.f32.mrb[86].mxu1 }
 0x845   : > { %v6695_v50 = vpop.f32.mrb[87].mxu1 }
 0x847   : > { %v6697_v44 = vpop.f32.mrb[88].mxu1 }
 0x848   : > { %v6699_v46 = vpop.f32.mrb[89].mxu1 }
 0x84b   : > { %v6701_v11 = vpop.f32.mrb[90].mxu1 }
 0x84c   : > { %v6703_v15 = vpop.f32.mrb[91].mxu1 }
 0x84f   : > { %v6705_v16 = vpop.f32.mrb[92].mxu1 }
 0x850   : > { %v6707_v19 = vpop.f32.mrb[93].mxu1 }
 0x853   : > { %v6709_v30 = vpop.f32.mrb[94].mxu1 }
 0x854   : > { %v6711_v17 = vpop.f32.mrb[95].mxu1 }
 0x857   : > { %v6713_v24 = vpop.f32.mrb[96].mxu1 }
 0x858   : > { %v6715_v61 = vpop.f32.mrb[97].mxu1 }
 0x85b   : > { %v5153_v27 = vpop.f32.mrb[98].mxu1 }
 0x85c   : > { %v3532_v43 = vpop.f32.mrb[99].mxu1 }
 0x85f   : > { %v5156_v33 = vpop.f32.mrb[100].mxu1 }
 0x8b6   : > { %v2856_v59 = vpop.xlane.xlu1 %2855 }
 0x8b7   : > { %v2858_v48 = vmax.f32 %v2856_v59, 1.0  ;;  %v2853_v3 = vpop.xlane.xlu0 %2852 }
 0x8b8   : > { %v2857_v56 = vmax.f32 %v2853_v3, 1.0 }
 0x8b9   : > { %5422 = vrsqrt.f32 %v2858_v48 }
 0x8ba   : > { %5424 = vrsqrt.f32 %v2857_v56 }
 0x8bb   : > { %v2866_v1 = vpop.permute.xlu0 %2865 }
 0x8c3   : > { %v5423_v6 = vpop.eup %5422 }
 0x8c4   : > { %v5425_v54 = vpop.eup %5424  ;;  %v2862_v2 = vmul.f32 %v5423_v6, %v2846_v26  ;;  %v3542_v26 = vpop.f32.mrb[101].mxu1 }
 0x8c5   : > { %v2861_v31 = vmul.f32 %v5425_v54, %v2841_v51  ;;  %v5159_v7 = vpop.f32.mrb[102].mxu1 }
 0x8c6   : > { %v6721_v58 = vsel %vm377_vm2, %v2862_v2, %v2866_v1  ;;  %v3552_v51 = vpop.f32.mrb[103].mxu1 }
 0x8c7   : > { %v6718_v60 = vsel %vm377_vm2, %v2861_v31, %v2864_v52  ;;  %7198 = vst [vmem:[#allocation10_spill] sm:$0xff] %v6721_v58 }
 0x8c8   : > { %7197 = vst [vmem:[#allocation9_spill] sm:$0xff] %v6718_v60  ;;  %5065 = vmatprep.mubr.msk.f32.mxu0 %vm246_vm1, %v6718_v60 }
 0x8c9   : > { %5066 = vmatmul.mubr.msk.f32.vlgmr.msra.gmra.mrb[68].mxu0 %vm246_vm1, %v6721_v58 }
 0x8ca   : > { %5350 = vmatpush3.bf16.msra.mxu0 %v7141_v10 }
 0x8cb   : > { %5352 = vmatprep.subr.bf16.mxu0 %v7142_v13 }
 0x8ce   : > { %5354 = vmatpush3.bf16.msra.mxu0 %v7142_v13 }
 0x8cf   : > { %5356 = vmatprep.subr.bf16.mxu0 %v7143_v18 }
 0x8d2   : > { %5358 = vmatpush3.bf16.msra.mxu0 %v7143_v18 }
 0x8d3   : > { %5360 = vmatprep.subr.bf16.mxu0 %v7144_v21 }
 0x8d6   : > { %5362 = vmatpush3.bf16.msra.mxu0 %v7144_v21 }
 0x8d7   : > { %5364 = vmatprep.subr.bf16.mxu0 %v7141_v10 }
 0x99c   : > { %v5067_v34 = vpop.f32.mrb[68].mxu0 }
 0x99d   : > { %v6736_v12 = vadd.f32 %v7199_v5, %v5067_v34  ;;  %v2943_v45 = vpop.f32.mrb[69].mxu0 }
 0x99e   : > { %v2944_v52 = vadd.f32 %v7199_v5, %v2943_v45 }
 0x99f   : > { %v3407_v59 = vrot.slane %v6736_v12, %v7146_v55  ;;  %v3411_v48 = vrot.slane %v6736_v12, %v7147_v0  ;;  %v3415_v3 = vrot.slane %v6736_v12, %v7148_v39 }
 0x9a0   : > { %v2955_v56 = vrot.slane %v2944_v52, %v7149_v4  ;;  %v2959_v6 = vrot.slane %v2944_v52, %v7150_v22  ;;  %v2963_v54 = vrot.slane %v2944_v52, %v7151_v62  ;;  %v2967_v2 = vrot.slane %v2944_v52, %v7152_v28 }
 0x9a1   : > { %v6749_v31 = vadd.f32 %v3532_v43, %v3407_v59  ;;  %v6751_v1 = vadd.f32 %v5153_v27, %v3407_v59  ;;  %v6753_v34 = vadd.f32 %v5156_v33, %v3411_v48  ;;  %v6755_v5 = vadd.f32 %v3542_v26, %v3411_v48 }
 0x9a2   : > { %v6757_v45 = vadd.f32 %v5159_v7, %v3415_v3  ;;  %v6759_v8 = vadd.f32 %v3552_v51, %v3415_v3  ;;  %v3051_v58 = vadd.f32 %v6667_v32, %v2955_v56  ;;  %v3056_v25 = vadd.f32 %v6665_v63, %v2955_v56 }
 0x9a3   : > { %v3387_v43 = vrot.slane %v6736_v12, %v7149_v4  ;;  %v3061_v27 = vadd.f32 %v6671_v9, %v2959_v6  ;;  %v3066_v33 = vadd.f32 %v6669_v57, %v2959_v6  ;;  %v3071_v26 = vadd.f32 %v6675_v42, %v2963_v54 }
 0x9a4   : > { %v3129_v60 = vmax.f32 %v3051_v58, 0.0  ;;  %v3130_v37 = vmax.f32 %v3056_v25, 0.0  ;;  %v3076_v7 = vadd.f32 %v6673_v36, %v2963_v54  ;;  %v3081_v51 = vadd.f32 %v6679_v38, %v2967_v2 }
 0x9a5   : > { %v3086_v32 = vadd.f32 %v6677_v49, %v2967_v2  ;;  %v2971_v63 = vrot.slane %v2944_v52, %v7153_v41  ;;  %v2975_v25 = vrot.slane %v2944_v52, %v7146_v55  ;;  %v3131_v4 = vmax.f32 %v3061_v27, 0.0 }
 0x9a6   : > { %5110 = vmatprep.mubr.msk.f32.mxu0 %vm604_vm3, %v3129_v60  ;;  %v3132_v36 = vmax.f32 %v3066_v33, 0.0  ;;  %v2979_v55 = vrot.slane %v2944_v52, %v7147_v0  ;;  %v3133_v38 = vmax.f32 %v3071_v26, 0.0  ;;  %v3488_v0 = vadd.f32 %v6697_v44, %v3387_v43 }
 0x9a7   : > { %5111 = vmatmul.mubr.msk.f32.vlgmr.msra.gmra.mrb[70].mxu0 %vm604_vm3, %v3130_v37  ;;  %v3091_v57 = vadd.f32 %v6683_v40, %v2971_v63  ;;  %v3096_v9 = vadd.f32 %v6681_v35, %v2971_v63  ;;  %v3101_v42 = vadd.f32 %v6687_v47, %v2975_v25  ;;  %v3106_v49 = vadd.f32 %v6685_v53, %v2975_v25 }
 0x9a8   : > { %5366 = vmatpush3.bf16.msra.mxu0 %v7141_v10  ;;  %5113 = vmatprep.mubr.msk.f32.mxu0 %vm604_vm3, %v3131_v4  ;;  %v2983_v37 = vrot.slane %v2944_v52, %v7148_v39  ;;  %v3483_v10 = vadd.f32 %v6699_v46, %v3387_v43  ;;  %v3111_v35 = vadd.f32 %v6691_v20, %v2979_v55  ;;  %v3134_v60 = vmax.f32 %v3076_v7, 0.0 }
 0x9a9   : > { %5368 = vmatprep.subr.bf16.mxu0 %v7142_v13  ;;  %v3116_v40 = vadd.f32 %v6689_v23, %v2979_v55  ;;  %v3391_v39 = vrot.slane %v6736_v12, %v7150_v22  ;;  %v3395_v20 = vrot.slane %v6736_v12, %v7151_v62  ;;  %v3135_v23 = vmax.f32 %v3081_v51, 0.0 }
 0x9aa   : > { %v3121_v47 = vadd.f32 %v6695_v50, %v2983_v37  ;;  %v3126_v53 = vadd.f32 %v6693_v29, %v2983_v37  ;;  %v3399_v46 = vrot.slane %v6736_v12, %v7152_v28  ;;  %v3403_v28 = vrot.slane %v6736_v12, %v7153_v41 }
 0x9ab   : > { %5114 = vmatmul.mubr.msk.f32.gmra.mrb[72].mxu0 %vm604_vm3, %v3132_v36  ;;  %v3498_v29 = vadd.f32 %v6701_v11, %v3391_v39  ;;  %v3503_v50 = vadd.f32 %v6707_v19, %v3395_v20  ;;  %v3508_v44 = vadd.f32 %v6705_v16, %v3395_v20  ;;  %v3136_v58 = vmax.f32 %v3086_v32, 0.0  ;;  %v5470_v20 = vld [vmem:[%s5966_s27 + $0x48] sm:$0xff] }
 0x9ac   : > { %5116 = vmatprep.mubr.msk.f32.mxu0 %vm604_vm3, %v3133_v38  ;;  %5370 = vmatpush3.bf16.msra.mxu0 %v7142_v13  ;;  %v3493_v13 = vadd.f32 %v6703_v15, %v3391_v39  ;;  %v3513_v62 = vadd.f32 %v6711_v17, %v3399_v46  ;;  %v3518_v22 = vadd.f32 %v6709_v30, %v3399_v46  ;;  %v3137_v15 = vmax.f32 %v3091_v57, 0.0 }
 0x9ad   : > { %5372 = vmatprep.subr.bf16.mxu0 %v7143_v18  ;;  %v3523_v11 = vadd.f32 %v6715_v61, %v3403_v28  ;;  %v3528_v19 = vadd.f32 %v6713_v24, %v3403_v28  ;;  %v3139_v16 = vmax.f32 %v3101_v42, 0.0  ;;  %v3140_v41 = vmax.f32 %v3106_v49, 0.0 }
 0x9ae   : > { %v3141_v30 = vmax.f32 %v3111_v35, 0.0  ;;  %v3142_v17 = vmax.f32 %v3116_v40, 0.0  ;;  %v3143_v24 = vmax.f32 %v3121_v47, 0.0  ;;  %v3144_v61 = vmax.f32 %v3126_v53, 0.0 }
 0x9af   : > { %5117 = vmatmul.mubr.msk.f32.gmra.mrb[74].mxu0 %vm604_vm3, %v3134_v60  ;;  %v3562_v12 = vmax.f32 %v3488_v0, 0.0  ;;  %v3563_v52 = vmax.f32 %v3493_v13, 0.0  ;;  %v3564_v59 = vmax.f32 %v3498_v29, 0.0  ;;  %v3565_v48 = vmax.f32 %v3503_v50, 0.0  ;;  %v5469_v0 = vld [vmem:[%s5966_s27 + $0x8] sm:$0xff]  ;;  %v5471_v29 = vld [vmem:[%s5966_s27] sm:$0xff] }
 0x9b0   : > { %5119 = vmatprep.mubr.msk.f32.mxu0 %vm604_vm3, %v3135_v23  ;;  %5374 = vmatpush3.bf16.msra.mxu0 %v7143_v18  ;;  %v3138_v18 = vmax.f32 %v3096_v9, 0.0  ;;  %v3566_v3 = vmax.f32 %v3508_v44, 0.0  ;;  %v3567_v56 = vmax.f32 %v3513_v62, 0.0  ;;  %v3568_v6 = vmax.f32 %v3518_v22, 0.0  ;;  %v5472_v62 = vld [vmem:[%s5966_s27 + $0x40] sm:$0xff] }
 0x9b1   : > { %5376 = vmatprep.subr.bf16.mxu0 %v7144_v21  ;;  %v3569_v54 = vmax.f32 %v3523_v11, 0.0  ;;  %v3570_v2 = vmax.f32 %v3528_v19, 0.0  ;;  %v3571_v43 = vmax.f32 %v6749_v31, 0.0  ;;  %v3572_v27 = vmax.f32 %v6751_v1, 0.0  ;;  %v5473_v11 = vld [vmem:[%s5966_s27 + $0x18] sm:$0xff] }
 0x9b2   : > { %v3573_v33 = vmax.f32 %v6755_v5, 0.0  ;;  %v3574_v26 = vmax.f32 %v6753_v34, 0.0  ;;  %v3575_v7 = vmax.f32 %v6759_v8, 0.0  ;;  %v3576_v31 = vmax.f32 %v6757_v45, 0.0 }
 0x9b3   : > { %5120 = vmatmul.mubr.msk.f32.gmra.mrb[76].mxu0 %vm604_vm3, %v3136_v58 }
 0x9b4   : > { %5122 = vmatprep.mubr.msk.f32.mxu0 %vm604_vm3, %v3137_v15  ;;  %5378 = vmatpush3.bf16.msra.mxu0 %v7144_v21  ;;  %v3561_v21 = vmax.f32 %v3483_v10, 0.0 }
 0x9b7   : > { %5123 = vmatmul.mubr.msk.f32.gmra.mrb[78].mxu0 %vm604_vm3, %v3138_v18  ;;  %v5474_v18 = vld [vmem:[%s5966_s27 + $0x10] sm:$0xff] }
 0x9b8   : > { %5125 = vmatprep.mubr.msk.f32.mxu0 %vm604_vm3, %v3139_v16 }
 0x9bb   : > { %5126 = vmatmul.mubr.msk.f32.gmra.mrb[80].mxu0 %vm604_vm3, %v3140_v41 }
 0x9bc   : > { %5128 = vmatprep.mubr.msk.f32.mxu0 %vm604_vm3, %v3141_v30 }
 0x9bf   : > { %5129 = vmatmul.mubr.msk.f32.gmra.mrb[82].mxu0 %vm604_vm3, %v3142_v17 }
 0x9c0   : > { %5131 = vmatprep.mubr.msk.f32.mxu0 %vm604_vm3, %v3143_v24 }
 0x9c3   : > { %5132 = vmatmul.mubr.msk.f32.gmra.mrb[84].mxu0 %vm604_vm3, %v3144_v61 }
 0x9c4   : > { %5176 = vmatprep.mubr.msk.f32.mxu0 %vm604_vm3, %v3561_v21  ;;  %v5475_v21 = vld [vmem:[%s5966_s27 + $0x58] sm:$0xff] }
 0x9c7   : > { %5177 = vmatmul.mubr.msk.f32.vlgmr.msra.gmra.mrb[86].mxu0 %vm604_vm3, %v3562_v12 }
 0x9c8   : > { %5179 = vmatprep.mubr.msk.f32.mxu0 %vm604_vm3, %v3563_v52 }
 0x9cb   : > { %5180 = vmatmul.mubr.msk.f32.gmra.mrb[88].mxu0 %vm604_vm3, %v3564_v59 }
 0x9cc   : > { %5182 = vmatprep.mubr.msk.f32.mxu0 %vm604_vm3, %v3565_v48 }
 0x9cf   : > { %5183 = vmatmul.mubr.msk.f32.gmra.mrb[90].mxu0 %vm604_vm3, %v3566_v3 }
 0x9d0   : > { %5185 = vmatprep.mubr.msk.f32.mxu0 %vm604_vm3, %v3567_v56  ;;  %v5476_v56 = vld [vmem:[%s5966_s27 + $0x50] sm:$0xff] }
 0x9d3   : > { %5186 = vmatmul.mubr.msk.f32.gmra.mrb[92].mxu0 %vm604_vm3, %v3568_v6 }
 0x9d4   : > { %5188 = vmatprep.mubr.msk.f32.mxu0 %vm604_vm3, %v3569_v54 }
 0x9d7   : > { %5189 = vmatmul.mubr.msk.f32.gmra.mrb[94].mxu0 %vm604_vm3, %v3570_v2 }
 0x9d8   : > { %5191 = vmatprep.mubr.msk.f32.mxu0 %vm604_vm3, %v3571_v43 }
 0x9db   : > { %5192 = vmatmul.mubr.msk.f32.gmra.mrb[96].mxu0 %vm604_vm3, %v3572_v27 }
 0x9dc   : > { %5194 = vmatprep.mubr.msk.f32.mxu0 %vm604_vm3, %v3573_v33 }
 0x9df   : > { %5195 = vmatmul.mubr.msk.f32.gmra.mrb[98].mxu0 %vm604_vm3, %v3574_v26 }
 0x9e0   : > { %5197 = vmatprep.mubr.msk.f32.mxu0 %vm604_vm3, %v3575_v7  ;;  %v5477_v7 = vld [vmem:[%s5966_s27 + $0x28] sm:$0xff] }
 0x9e3   : > { %5198 = vmatmul.mubr.msk.f32.gmra.mrb[100].mxu0 %vm604_vm3, %v3576_v31 }
 0xa7a   : > { %v5112_v51 = vpop.f32.mrb[70].mxu0 }
 0xa7b   : > { %v3259_v1 = vpop.f32.mrb[71].mxu0  ;;  %v3265_v57 = vadd.f32 %v6501_v14, %v5112_v51 }
 0xa7c   : > { %v3260_v8 = vadd.f32 %v6501_v14, %v3259_v1  ;;  %v5478_v1 = vld [vmem:[%s5966_s27 + $0x68] sm:$0xff] }
 0xa7d   : > { %v3339_v42 = vmax.f32 %v3265_v57, 0.0 }
 0xa7e   : > { %v5115_v32 = vpop.f32.mrb[72].mxu0  ;;  %v3338_v38 = vmax.f32 %v3260_v8, 0.0 }
 0xa7f   : > { %v3269_v5 = vpop.f32.mrb[73].mxu0  ;;  %v3275_v9 = vadd.f32 %v6501_v14, %v5115_v32  ;;  %v3355_v60 = vmul.f32 %v5469_v0, %v3339_v42 }
 0xa80   : > { %v3270_v45 = vadd.f32 %v6501_v14, %v3269_v5  ;;  %v3354_v50 = vmul.f32 %v5471_v29, %v3338_v38  ;;  %v5481_v38 = vld [vmem:[%s5966_s27 + $0x38] sm:$0xff] }
 0xa81   : > { %v3341_v35 = vmax.f32 %v3275_v9, 0.0 }
 0xa82   : > { %v5118_v63 = vpop.f32.mrb[74].mxu0  ;;  %v3340_v40 = vmax.f32 %v3270_v45, 0.0 }
 0xa83   : > { %v3279_v25 = vpop.f32.mrb[75].mxu0  ;;  %v3285_v39 = vadd.f32 %v6501_v14, %v5118_v63  ;;  %v3357_v19 = vmul.f32 %v5473_v11, %v3341_v35  ;;  %v5482_v35 = vld [vmem:[%s5966_s27 + $0x78] sm:$0xff] }
 0xa84   : > { %v3280_v44 = vadd.f32 %v6501_v14, %v3279_v25  ;;  %v3356_v16 = vmul.f32 %v5474_v18, %v3340_v40  ;;  %v5479_v25 = vld [vmem:[%s5966_s27 + $0x20] sm:$0xff] }
 0xa85   : > { %v3343_v24 = vmax.f32 %v3285_v39, 0.0  ;;  %v5484_v39 = vld [vmem:[%s5966_s27 + $0x70] sm:$0xff] }
 0xa86   : > { %v5121_v4 = vpop.f32.mrb[76].mxu0  ;;  %v3342_v48 = vmax.f32 %v3280_v44, 0.0 }
 0xa87   : > { %v3289_v34 = vpop.f32.mrb[77].mxu0  ;;  %v3295_v61 = vadd.f32 %v6501_v14, %v5121_v4  ;;  %v3359_v31 = vmul.f32 %v5477_v7, %v3343_v24  ;;  %v5487_v7 = vld [vmem:[%s5966_s27 + $0x80] sm:$0xff] }
 0xa88   : > { %v3290_v3 = vadd.f32 %v6501_v14, %v3289_v34  ;;  %v3358_v4 = vmul.f32 %v5479_v25, %v3342_v48  ;;  %v5480_v34 = vld [vmem:[%s5966_s27 + $0x60] sm:$0xff] }
 0xa89   : > { %v3345_v51 = vmax.f32 %v3295_v61, 0.0 }
 0xa8a   : > { %v5124_v36 = vpop.f32.mrb[78].mxu0  ;;  %v3344_v57 = vmax.f32 %v3290_v3, 0.0 }
 0xa8b   : > { %v3305_v49 = vadd.f32 %v6501_v14, %v5124_v36  ;;  %v3299_v55 = vpop.f32.mrb[79].mxu0 }
 0xa8c   : > { %v3300_v37 = vadd.f32 %v6501_v14, %v3299_v55 }
 0xa8d   : > { %v3347_v10 = vmax.f32 %v3305_v49, 0.0 }
 0xa8e   : > { %v3346_v47 = vmax.f32 %v3300_v37, 0.0  ;;  %v5127_v53 = vpop.f32.mrb[80].mxu0  ;;  %v3361_v37 = vmul.f32 %v5481_v38, %v3345_v51 }
 0xa8f   : > { %v3363_v23 = vmul.f32 %v5470_v20, %v3347_v10  ;;  %v3315_v46 = vadd.f32 %v6501_v14, %v5127_v53  ;;  %v3309_v13 = vpop.f32.mrb[81].mxu0  ;;  %v5483_v53 = vld [vmem:[%s5966_s27 + $0x30] sm:$0xff] }
 0xa90   : > { %v3362_v22 = vmul.f32 %v5472_v62, %v3346_v47  ;;  %v3310_v28 = vadd.f32 %v6501_v14, %v3309_v13  ;;  %v3360_v0 = vmul.f32 %v5483_v53, %v3344_v57  ;;  %v5492_v53 = vld [vmem:[%s5966_s27 + $0xd0] sm:$0xff] }
 0xa91   : > { %v3371_v58 = vmax.f32 %v3355_v60, %v3363_v23  ;;  %v3349_v15 = vmax.f32 %v3315_v46, 0.0 }
 0xa92   : > { %v3370_v41 = vmax.f32 %v3354_v50, %v3362_v22  ;;  %v3348_v30 = vmax.f32 %v3310_v28, 0.0  ;;  %v5130_v17 = vpop.f32.mrb[82].mxu0 }
 0xa93   : > { %v3365_v12 = vmul.f32 %v5475_v21, %v3349_v15  ;;  %v3325_v52 = vadd.f32 %v6501_v14, %v5130_v17  ;;  %v3319_v59 = vpop.f32.mrb[83].mxu0 }
 0xa94   : > { %v3364_v6 = vmul.f32 %v5476_v56, %v3348_v30  ;;  %v3320_v54 = vadd.f32 %v6501_v14, %v3319_v59 }
 0xa95   : > { %v3373_v2 = vmax.f32 %v3357_v19, %v3365_v12  ;;  %v3351_v43 = vmax.f32 %v3325_v52, 0.0 }
 0xa96   : > { %v3372_v27 = vmax.f32 %v3356_v16, %v3364_v6  ;;  %v3350_v33 = vmax.f32 %v3320_v54, 0.0  ;;  %v5133_v26 = vpop.f32.mrb[84].mxu0  ;;  %v5485_v6 = vld [vmem:[%s5966_s27 + $0x88] sm:$0xff] }
 0xa97   : > { %v3367_v32 = vmul.f32 %v5478_v1, %v3351_v43  ;;  %v3335_v5 = vadd.f32 %v6501_v14, %v5133_v26  ;;  %v3329_v63 = vpop.f32.mrb[85].mxu0  ;;  %v5486_v43 = vld [vmem:[%s5966_s27 + $0xc8] sm:$0xff]  ;;  %v5488_v1 = vld [vmem:[%s5966_s27 + $0xc0] sm:$0xff] }
 0xa98   : > { %v3366_v8 = vmul.f32 %v5480_v34, %v3350_v33  ;;  %v3330_v9 = vadd.f32 %v6501_v14, %v3329_v63  ;;  %v5490_v34 = vld [vmem:[%s5966_s27 + $0x90] sm:$0xff] }
 0xa99   : > { %v3375_v45 = vmax.f32 %v3359_v31, %v3367_v32  ;;  %v3353_v36 = vmax.f32 %v3335_v5, 0.0 }
 0xa9a   : > { %v3374_v42 = vmax.f32 %v3358_v4, %v3366_v8  ;;  %v3352_v49 = vmax.f32 %v3330_v9, 0.0  ;;  %v5178_v55 = vpop.f32.mrb[86].mxu0  ;;  %v5489_v4 = vld [vmem:[%s5966_s27 + $0x98] sm:$0xff] }
 0xa9b   : > { %v6875_v10 = vmax.f32 %v3371_v58, %v3375_v45  ;;  %v3369_v40 = vmul.f32 %v5482_v35, %v3353_v36  ;;  %v3691_v47 = vpop.f32.mrb[87].mxu0  ;;  %v3697_v11 = vadd.f32 %v6501_v14, %v5178_v55  ;;  %v5491_v55 = vld [vmem:[%s5966_s27 + $0xd8] sm:$0xff] }
 0xa9c   : > { %v6879_v60 = vmax.f32 %v3370_v41, %v3374_v42  ;;  %v3368_v20 = vmul.f32 %v5484_v39, %v3352_v49  ;;  %v3692_v18 = vadd.f32 %v6501_v14, %v3691_v47 }
 0xa9d   : > { %v3377_v23 = vmax.f32 %v3361_v37, %v3369_v40  ;;  %v3771_v17 = vmax.f32 %v3697_v11, 0.0  ;;  %v5494_v11 = vld [vmem:[%s5966_s27 + $0xe8] sm:$0xff] }
 0xa9e   : > { %v3376_v46 = vmax.f32 %v3360_v0, %v3368_v20  ;;  %v5181_v13 = vpop.f32.mrb[88].mxu0  ;;  %v3770_v21 = vmax.f32 %v3692_v18, 0.0 }
 0xa9f   : > { %v6882_v29 = vmax.f32 %v3373_v2, %v3377_v23  ;;  %v3701_v50 = vpop.f32.mrb[89].mxu0  ;;  %v3707_v16 = vadd.f32 %v6501_v14, %v5181_v13  ;;  %v3787_v54 = vmul.f32 %v5485_v6, %v3771_v17 }
 0xaa0   : > { %v6884_v44 = vmax.f32 %v3372_v27, %v3376_v46  ;;  %v3702_v41 = vadd.f32 %v6501_v14, %v3701_v50  ;;  %v3786_v31 = vmul.f32 %v5487_v7, %v3770_v21 }
 0xaa1   : > { %v3383_v62 = vmax.f32 %v6875_v10, %v6882_v29  ;;  %v3773_v59 = vmax.f32 %v3707_v16, 0.0  ;;  %v7204_v10 = vld [vmem:[#allocation59_spill] sm:$0xff]  ;;  %v5501_v29 = vld [vmem:[%s6968_s3 + $0x12] ss:$0 sm:$0xff] }
 0xaa2   : > { %v3382_v22 = vmax.f32 %v6879_v60, %v6884_v44  ;;  %v5184_v28 = vpop.f32.mrb[90].mxu0  ;;  %v3772_v48 = vmax.f32 %v3702_v41, 0.0  ;;  %v5495_v41 = vld [vmem:[%s5966_s27 + $0xa0] sm:$0xff] }
 0xaa3   : > { %v3711_v58 = vpop.f32.mrb[91].mxu0  ;;  %v3717_v2 = vadd.f32 %v6501_v14, %v5184_v28  ;;  %v3789_v57 = vmul.f32 %v5489_v4, %v3773_v59  ;;  %v5493_v28 = vld [vmem:[%s5966_s27 + $0xa8] sm:$0xff]  ;;  %v7200_v4 = vld [vmem:[#allocation8_spill] sm:$0xff] }
 0xaa4   : > { %v3712_v51 = vadd.f32 %v6501_v14, %v3711_v58  ;;  %v3788_v8 = vmul.f32 %v5490_v34, %v3772_v48  ;;  %v7202_v34 = vld [vmem:[#allocation58_spill] sm:$0xff] }
 0xaa5   : > { %v3775_v42 = vmax.f32 %v3717_v2, 0.0 }
 0xaa6   : > { %v5187_v15 = vpop.f32.mrb[92].mxu0  ;;  %v3774_v40 = vmax.f32 %v3712_v51, 0.0 }
 0xaa7   : > { %v3721_v19 = vpop.f32.mrb[93].mxu0  ;;  %v3727_v49 = vadd.f32 %v6501_v14, %v5187_v15  ;;  %v3791_v58 = vmul.f32 %v5493_v28, %v3775_v42  ;;  %v5502_v42 = vld [vmem:[%s6968_s3 + $0x13] ss:$0 sm:$0xff] }
 0xaa8   : > { %v3722_v47 = vadd.f32 %v6501_v14, %v3721_v19 }
 0xaa9   : > { %v3777_v15 = vmax.f32 %v3727_v49, 0.0 }
 0xaaa   : > { %v5190_v30 = vpop.f32.mrb[94].mxu0  ;;  %v3776_v17 = vmax.f32 %v3722_v47, 0.0 }
 0xaab   : > { %v3737_v24 = vadd.f32 %v6501_v14, %v5190_v30  ;;  %v3731_v61 = vpop.f32.mrb[95].mxu0  ;;  %v3790_v30 = vmul.f32 %v5495_v41, %v3774_v40 }
 0xaac   : > { %v3732_v12 = vadd.f32 %v6501_v14, %v3731_v61 }
 0xaad   : > { %v3779_v52 = vmax.f32 %v3737_v24, 0.0  ;;  %v5496_v24 = vld [vmem:[%s5966_s27 + $0xe0] sm:$0xff] }
 0xaae   : > { %v3778_v3 = vmax.f32 %v3732_v12, 0.0  ;;  %v5193_v56 = vpop.f32.mrb[96].mxu0 }
 0xaaf   : > { %v3795_v27 = vmul.f32 %v5486_v43, %v3779_v52  ;;  %v3747_v33 = vadd.f32 %v6501_v14, %v5193_v56  ;;  %v3741_v26 = vpop.f32.mrb[97].mxu0  ;;  %v5499_v43 = vld [vmem:[%s5966_s27 + $0xb0] sm:$0xff] }
 0xab0   : > { %v3794_v32 = vmul.f32 %v5488_v1, %v3778_v3  ;;  %v3742_v5 = vadd.f32 %v6501_v14, %v3741_v26  ;;  %v5497_v3 = vld [vmem:[%s5966_s27 + $0xb8] sm:$0xff]  ;;  %v5500_v26 = vld [vmem:[%s5966_s27 + $0xf0] sm:$0xff] }
 0xab1   : > { %v3803_v63 = vmax.f32 %v3787_v54, %v3795_v27  ;;  %v3781_v25 = vmax.f32 %v3747_v33, 0.0  ;;  %v3793_v56 = vmul.f32 %v5497_v3, %v3777_v15  ;;  %v5498_v54 = vld [vmem:[%s5966_s27 + $0xf8] sm:$0xff]  ;;  %v3792_v27 = vmul.f32 %v5499_v43, %v3776_v17 }
 0xab2   : > { %v3802_v9 = vmax.f32 %v3786_v31, %v3794_v32  ;;  %v3780_v45 = vmax.f32 %v3742_v5, 0.0  ;;  %v5196_v36 = vpop.f32.mrb[98].mxu0 }
 0xab3   : > { %v3797_v38 = vmul.f32 %v5491_v55, %v3781_v25  ;;  %v3757_v37 = vadd.f32 %v6501_v14, %v5196_v36  ;;  %v3751_v35 = vpop.f32.mrb[99].mxu0 }
 0xab4   : > { %v3796_v0 = vmul.f32 %v5492_v53, %v3780_v45  ;;  %v3752_v39 = vadd.f32 %v6501_v14, %v3751_v35 }
 0xab5   : > { %v3805_v20 = vmax.f32 %v3789_v57, %v3797_v38  ;;  %v3783_v23 = vmax.f32 %v3757_v37, 0.0  ;;  %v7201_v57 = vld [vmem:[#allocation9_spill] sm:$0xff] }
 0xab6   : > { %v3804_v46 = vmax.f32 %v3788_v8, %v3796_v0  ;;  %v3782_v13 = vmax.f32 %v3752_v39, 0.0  ;;  %v5199_v50 = vpop.f32.mrb[100].mxu0  ;;  %v7203_v8 = vld [vmem:[#allocation10_spill] sm:$0xff] }
 0xab7   : > { %v3799_v18 = vmul.f32 %v5494_v11, %v3783_v23  ;;  %v3767_v19 = vadd.f32 %v6501_v14, %v5199_v50  ;;  %v3761_v16 = vpop.f32.mrb[101].mxu0 }
 0xab8   : > { %v3798_v61 = vmul.f32 %v5496_v24, %v3782_v13  ;;  %v3762_v21 = vadd.f32 %v6501_v14, %v3761_v16 }
 0xab9   : > { %v3807_v12 = vmax.f32 %v3791_v58, %v3799_v18  ;;  %v3785_v52 = vmax.f32 %v3767_v19, 0.0 }
 0xaba   : > { %v3806_v59 = vmax.f32 %v3790_v30, %v3798_v61  ;;  %v3784_v48 = vmax.f32 %v3762_v21, 0.0 }
 0xabb   : > { %v3811_v6 = vmax.f32 %v3803_v63, %v3807_v12  ;;  %v3801_v2 = vmul.f32 %v5498_v54, %v3785_v52 }
 0xabc   : > { %v3810_v33 = vmax.f32 %v3802_v9, %v3806_v59  ;;  %v3800_v7 = vmul.f32 %v5500_v26, %v3784_v48 }
 0xabd   : > { %v3809_v31 = vmax.f32 %v3793_v56, %v3801_v2 }
 0xabe   : > { %v3808_v51 = vmax.f32 %v3792_v27, %v3800_v7 }
 0xabf   : > { %v3813_v1 = vmax.f32 %v3805_v20, %v3809_v31 }
 0xac0   : > { %v3812_v32 = vmax.f32 %v3804_v46, %v3808_v51 }
 0xac1   : > { %v3815_v5 = vmax.f32 %v3811_v6, %v3813_v1 }
 0xac2   : > { %v3814_v14 = vmax.f32 %v3810_v33, %v3812_v32 }
 0xac3   : > { %v3817_v25 = vmax.f32 %v3383_v62, %v3815_v5 }
 0xac4   : > { %v3816_v63 = vmax.f32 %v3382_v22, %v3814_v14 }
 0xac6   : > { %5216 = vmatprep.mubr.msk.f32.mxu1 %vm604_vm3, %v3816_v63 }
 0xac7   : > { %5217 = vmatmul.mubr.msk.f32.vlgmr.msra.gmra.mrb[104].mxu1 %vm604_vm3, %v3817_v25 }
 0xac8   : > { %5220 = vmatpush3.msra.mxu1 %v7200_v4  ;;  %5221 = vmatprep.mubr.msk.f32.mxu1 %vm246_vm1, %v7201_v57 }
 0xac9   : > { %5396 = vmatprep.subr.bf16.mxu1 %v7202_v34 }
 0xacf   : > { %5222 = vmatmul.mubr.msk.f32.vlgmr.msra.gmra.mrb[104].mxu1 %vm246_vm1, %v7203_v8 }
 0xad0   : > { %5398 = vmatpush3.bf16.msra.mxu1 %v7202_v34 }
 0xad1   : > { %5400 = vmatprep.subr.bf16.mxu1 %v7204_v10 }
 0xad4   : > { %5402 = vmatpush3.bf16.msra.mxu1 %v7204_v10 }
 0xba2   : > { %v5223_v60 = vpop.f32.mrb[104].mxu1 }
 0xba3   : > { %v3975_v44 = vadd.f32 %v5501_v29, %v5223_v60  ;;  %v3965_v62 = vpop.f32.mrb[105].mxu1 }
 0xba4   : > { %v3974_v22 = vadd.f32 %v5501_v29, %v3965_v62 }
 0xba5   : > { %v3977_v45 = vmax.f32 %v3975_v44, 0.0 }
 0xba6   : > { %v3976_v9 = vmax.f32 %v3974_v22, 0.0 }
 0xba8   : > { %5232 = vmatprep.mubr.msk.f32.mxu1 %vm1557_vm4, %v3976_v9 }
 0xba9   : > { %5233 = vmatmul.mubr.msk.f32.vlgmr.msra.gmra.mrb[106].mxu1 %vm1557_vm4, %v3977_v45 }
 0xc7c   : > { %v5234_v36 = vpop.f32.mrb[106].mxu1 }
 0xc7d   : > { %v4056_v49 = vadd.f32 %v5502_v42, %v5234_v36  ;;  %v4050_v55 = vpop.f32.mrb[107].mxu1 }
 0xc7e   : > { %v4051_v38 = vadd.f32 %v5502_v42, %v4050_v55 }
 0xc7f   : > { %v4060_v37 = vmul.f32 %v4056_v49, %v4056_v49 }
 0xc80   : > { %v4059_v35 = vmul.f32 %v4051_v38, %v4051_v38 }
 0xc81   : > { %v4064_v40 = vsel %vm377_vm2, %v4060_v37, 0.0 }
 0xc82   : > { %4065 = vadd.xlane.f32.xlu1 %v4064_v40  ;;  %v4061_v47 = vsel %vm377_vm2, %v4059_v35, 0.0 }
 0xc83   : > { %4062 = vadd.xlane.f32.xlu0 %v4061_v47 }
 0xc93   : > { %4073 = vrot.lane.b32.xlu1 %v7201_v57, %s5511_s17 }
 0xc97   : > { %4075 = vrot.lane.b32.xlu1 %v7203_v8, %s5511_s17 }
 0xd0f   : > { %v4066_v53 = vpop.xlane.xlu1 %4065 }
 0xd10   : > { %v4068_v0 = vmax.f32 %v4066_v53, 1.0  ;;  %v4063_v39 = vpop.xlane.xlu0 %4062 }
 0xd11   : > { %v4067_v20 = vmax.f32 %v4063_v39, 1.0 }
 0xd12   : > { %5426 = vrsqrt.f32 %v4068_v0 }
 0xd13   : > { %5428 = vrsqrt.f32 %v4067_v20  ;;  %v4074_v23 = vpop.permute.xlu1 %4073 }
 0xd17   : > { %v4076_v58 = vpop.permute.xlu1 %4075 }
 0xd1c   : > { %v5427_v46 = vpop.eup %5426 }
 0xd1d   : > { %v5429_v13 = vpop.eup %5428  ;;  %v4072_v50 = vmul.f32 %v5427_v46, %v4056_v49 }
 0xd1e   : > { %v4071_v28 = vmul.f32 %v5429_v13, %v4051_v38 }
 0xd1f   : > { %v4080_v15 = vsel %vm377_vm2, %v4072_v50, %v4076_v58 }
 0xd20   : > { %v4079_v11 = vsel %vm377_vm2, %v4071_v28, %v4074_v23  ;;  %4082 = vst.msk [vmem:[%s237_s8 + $0x8] sm:$0xff] %vm246_vm1, %v4080_v15 }
 0xd21   : > { %4081 = vst.msk [vmem:[%s237_s8] sm:$0xff] %vm246_vm1, %v4079_v11 }
 0xd22 PF: > { %s14_s15 = sadd.s32 1, %s5509_s15  }
 0xd23   : > { %p11_p4 = scmp.ge.s32.totalorder %s14_s15, 6  }
 0xd25   :  { %13 = sbr.rel (!%p11_p4) target bundleno = 1 (0x1), region = 72 }

</bundles_post_ra>
